<compile_context>
chip_gen: v6e
topology: v6e:2x2x1
jax: 0.10.0
libtpu: 0.0.40
codegen_flags: <defaults>
</compile_context>

<pallas_src>
import math

import jax
import jax.numpy as jnp
from jax.experimental import pallas as pl
from jax.experimental.pallas import tpu as pltpu


H_IN = 10
W_IN = 10
KH = 3
KW = 3
C_OUT = 16
H_OUT = H_IN - KH + 1          # 8
W_OUT = W_IN - KW + 1          # 8
OUT_DIM = C_OUT * H_OUT * W_OUT  # 1024


def _round_up(x, m):
    return (x + m - 1) // m * m


def _conv_relu_flat_kernel(x_ref, w_ref, b_ref, o_ref):
    """One batch tile of the fused conv + bias + ReLU + NCHW-flatten.

    x_ref: (TN, 10*10*C)  native dtype (int8/uint8/float...) -- cast to f32 here.
    w_ref: (10*10*C, 1024) f32 conv-as-dense matrix, resident across the grid.
    b_ref: (1, 1024)       f32 bias expanded to flatten order.
    o_ref: (TN, 1024)      f32 output in PyTorch NCHW flatten order.
    """
    x = x_ref[...].astype(jnp.float32)                      # in-kernel cast (cuts input DMA bytes)
    acc = jnp.dot(x, w_ref[...], preferred_element_type=jnp.float32)
    o_ref[...] = jnp.maximum(acc + b_ref[...], 0.0)         # lane-dense epilogue + store


def _conv_as_dense_matrix(weight):
    """PyTorch Conv2d weight (16, C, 3, 3) -> dense (10*10*C, 1024) matrix.

    Row index  = (i*10 + j)*C + c        (matches row-major reshape of NHWC input)
    Col index  = co*64 + h*8 + w         (matches NCHW flatten of the conv output)
    Entry      = weight[co, c, i-h, j-w] when 0 <= i-h < 3 and 0 <= j-w < 3, else 0.
    """
    c_in = weight.shape[1]
    w_khwc = jnp.transpose(weight.astype(jnp.float32), (2, 3, 1, 0))       # (KH, KW, C, C_OUT)
    sel_h = (jnp.arange(H_IN)[:, None, None]
             == jnp.arange(H_OUT)[None, :, None] + jnp.arange(KH)[None, None, :]
             ).astype(jnp.float32)                                         # (10, 8, 3)
    sel_w = (jnp.arange(W_IN)[:, None, None]
             == jnp.arange(W_OUT)[None, :, None] + jnp.arange(KW)[None, None, :]
             ).astype(jnp.float32)                                         # (10, 8, 3)
    w_full = jnp.einsum('ihp,jwq,pqcd->ijcdhw', sel_h, sel_w, w_khwc)      # (10,10,C,16,8,8)
    return w_full.reshape(H_IN * W_IN * c_in, OUT_DIM)


def minatar_forward(x, weight, bias, *, tile_n=512):
    """x: (N, 10, 10, C) NHWC, any dtype (cast to f32 inside the kernel).
    weight: (16, C, 3, 3) PyTorch Conv2d layout.  bias: (16,).
    Returns (N, 1024) float32, identical to MinAtarModel.forward."""
    n, h, w, c = x.shape
    assert (h, w) == (H_IN, W_IN)
    k_in = H_IN * W_IN * c

    x_flat = x.reshape(n, k_in)                                   # native dtype, (i, j, c) order
    w_full = _conv_as_dense_matrix(weight)                        # (k_in, 1024) f32
    b_full = jnp.repeat(bias.astype(jnp.float32), H_OUT * W_OUT).reshape(1, OUT_DIM)

    # Batch tile: multiple of 32 (safe sublane packing for 8-bit inputs), capped at N.
    tile_n = _round_up(min(tile_n, n), 32)
    n_pad = _round_up(n, tile_n)
    if n_pad != n:
        x_flat = jnp.pad(x_flat, ((0, n_pad - n), (0, 0)))

    out = pl.pallas_call(
        _conv_relu_flat_kernel,
        out_shape=jax.ShapeDtypeStruct((n_pad, OUT_DIM), jnp.float32),
        grid=(n_pad // tile_n,),
        in_specs=[
            pl.BlockSpec((tile_n, k_in), lambda i: (i, 0)),       # batch-tiled, auto double-buffered
            pl.BlockSpec((k_in, OUT_DIM), lambda i: (0, 0)),      # weights stay resident
            pl.BlockSpec((1, OUT_DIM), lambda i: (0, 0)),         # bias stays resident
        ],
        out_specs=pl.BlockSpec((tile_n, OUT_DIM), lambda i: (i, 0)),
        compiler_params=pltpu.CompilerParams(
            dimension_semantics=("parallel",),                    # megacore sharding on v7x
            vmem_limit_bytes=48 * 1024 * 1024,
        ),
    )(x_flat, w_full, b_full)

    return out[:n] if n_pad != n else out


def _reference_forward(x, weight, bias):
    """Pure-JAX reference (lax conv, HIGHEST precision) of the same PyTorch forward."""
    x_nchw = jnp.transpose(x.astype(jnp.float32), (0, 3, 1, 2))
    out = jax.lax.conv_general_dilated(
        x_nchw, weight.astype(jnp.float32),
        window_strides=(1, 1), padding="VALID",
        dimension_numbers=("NCHW", "OIHW", "NCHW"),
        precision=jax.lax.Precision.HIGHEST)
    out = out + bias.astype(jnp.float32).reshape(1, C_OUT, 1, 1)
    out = jnp.maximum(out, 0.0)
    return out.reshape(out.shape[0], -1)


if __name__ == "__main__":
    key = jax.random.PRNGKey(0)
    k_x, k_w, k_b = jax.random.split(key, 3)

    batch = 256          # small demo batch; tile_n=128 below exercises a 2-step pipelined grid
    in_channels = 4

    # Deterministic "PyTorch-like" Conv2d init: U(-1/sqrt(fan_in), 1/sqrt(fan_in)).
    fan_in = in_channels * KH * KW
    bound = 1.0 / math.sqrt(fan_in)
    weight = jax.random.uniform(k_w, (C_OUT, in_channels, KH, KW),
                                jnp.float32, -bound, bound)
    bias = jax.random.uniform(k_b, (C_OUT,), jnp.float32, -bound, bound)

    # Binary MinAtar-style observations stored as int8 (native dtype; cast happens in-kernel).
    x = jax.random.bernoulli(k_x, 0.3, (batch, H_IN, W_IN, in_channels)).astype(jnp.int8)

    out = minatar_forward(x, weight, bias, tile_n=128)
    out = jax.block_until_ready(out)

    ref = _reference_forward(x, weight, bias)
    assert out.shape == (batch, OUT_DIM), out.shape
    assert out.dtype == jnp.float32, out.dtype
    # Tolerance leaves margin for the MXU's bf16-pass decomposition of f32 matmuls;
    # any structural/ordering bug would produce O(0.1-1) errors and still be caught.
    assert jnp.allclose(out, ref, atol=5e-3, rtol=5e-3), "mismatch vs reference"

    print("KERNEL_OK")
</pallas_src>

<mosaic_0001>
module attributes {stable_mosaic.version = 11 : i64} {
  func.func @_conv_relu_flat_kernel(%arg0: i32, %arg1: memref<128x400xi8, #tpu.memory_space<vmem>>, %arg2: memref<400x1024xf32, #tpu.memory_space<vmem>>, %arg3: memref<1x1024xf32, #tpu.memory_space<vmem>>, %arg4: memref<128x1024xf32, #tpu.memory_space<vmem>>) attributes {dimension_semantics = [#tpu.dimension_semantics<parallel>], iteration_bounds = array<i64: 2>, scalar_prefetch = 0 : i64, scratch_operands = 0 : i64, tpu.core_type = #tpu.core_type<tc>, window_params = [{transform_indices = @transform_0, window_bounds = array<i64: 128, 400>}, {pipeline_mode = #tpu.pipeline_mode<synchronous>, transform_indices = @transform_1, window_bounds = array<i64: 400, 1024>}, {pipeline_mode = #tpu.pipeline_mode<synchronous>, transform_indices = @transform_2, window_bounds = array<i64: 1, 1024>}, {transform_indices = @transform_3, window_bounds = array<i64: 128, 1024>}]} {
    %c0 = arith.constant 0 : index
    %c0_0 = arith.constant 0 : index
    %0 = vector.load %arg1[%c0, %c0_0] : memref<128x400xi8, #tpu.memory_space<vmem>>, vector<128x400xi8>
    %1 = arith.sitofp %0 : vector<128x400xi8> to vector<128x400xf32>
    %c0_1 = arith.constant 0 : index
    %c0_2 = arith.constant 0 : index
    %2 = vector.load %arg2[%c0_1, %c0_2] : memref<400x1024xf32, #tpu.memory_space<vmem>>, vector<400x1024xf32>
    %cst = arith.constant dense<0.000000e+00> : vector<128x1024xf32>
    %3 = tpu.matmul %1, %2, %cst {dimension_numbers = #tpu.dot_dimension_numbers<[1], [0], [0], [1], [0, 0, 1, 1], [], []>} : vector<128x400xf32>, vector<400x1024xf32>, vector<128x1024xf32> -> vector<128x1024xf32>
    %c0_3 = arith.constant 0 : index
    %c0_4 = arith.constant 0 : index
    %4 = vector.load %arg3[%c0_3, %c0_4] : memref<1x1024xf32, #tpu.memory_space<vmem>>, vector<1x1024xf32>
    %5 = vector.broadcast %4 : vector<1x1024xf32> to vector<128x1024xf32>
    %6 = arith.addf %3, %5 : vector<128x1024xf32>
    %cst_5 = arith.constant 0.000000e+00 : f32
    %7 = vector.broadcast %cst_5 : f32 to vector<128x1024xf32>
    %8 = arith.maximumf %6, %7 : vector<128x1024xf32>
    %c0_6 = arith.constant 0 : index
    %c0_7 = arith.constant 0 : index
    %9 = vector.load %arg4[%c0_6, %c0_7] : memref<128x1024xf32, #tpu.memory_space<vmem>>, vector<128x1024xf32>
    tpu.vector_store %arg4[%c0_6, %c0_7], %8 {strides = array<i32>} : memref<128x1024xf32, #tpu.memory_space<vmem>>, vector<128x1024xf32>,
    return
  }
  func.func @transform_0(%arg0: i32) -> (i32, i32) {
    %c0_i32 = arith.constant 0 : i32
    %c0_i32_0 = arith.constant 0 : i32
    return %arg0, %c0_i32 : i32, i32
  }
  func.func @transform_1(%arg0: i32) -> (i32, i32) {
    %c0_i32 = arith.constant 0 : i32
    %c0_i32_0 = arith.constant 0 : i32
    %c0_i32_1 = arith.constant 0 : i32
    return %c0_i32, %c0_i32_0 : i32, i32
  }
  func.func @transform_2(%arg0: i32) -> (i32, i32) {
    %c0_i32 = arith.constant 0 : i32
    %c0_i32_0 = arith.constant 0 : i32
    %c0_i32_1 = arith.constant 0 : i32
    return %c0_i32, %c0_i32_0 : i32, i32
  }
  func.func @transform_3(%arg0: i32) -> (i32, i32) {
    %c0_i32 = arith.constant 0 : i32
    %c0_i32_0 = arith.constant 0 : i32
    return %arg0, %c0_i32 : i32, i32
  }
}

</mosaic_0001>

<bundles_post_ra>
// kernel: tpu_custom_call.1
= control target key start
LH: loop header
LB: loop body
LE: loop exit
PB: predicated region body
PF: predicated region fallthrough
CT: control target
= control target key end

     0   :  { %8 = vsyncpa [#allocation3], 0  ;;  %s4347_s0 = inlined_call_operand.vmem [shape: s8[256,400], index: 0, kind: input, shape index: {}]   ;;  %s4348_s1 = inlined_call_operand.hbm [shape: f32[400,1024], index: 1, kind: input, shape index: {}]   ;;  %s4349_s2 = inlined_call_operand.hbm [shape: f32[1,1024], index: 2, kind: input, shape index: {}]   ;;  %s4350_s3 = inlined_call_operand.hbm [shape: f32[256,1024], index: 3, kind: output, shape index: {}]  }
   0x1   :  { %9 = vsyncpa [#allocation6], 0 }
   0x2   :  { %10 = vsyncpa [#allocation4], 0 }
   0x3   :  { %12 = vsyncpa [#allocation4 + $0x1], 0  ;;  %s2816_s12 = smov 0   ;;  %s2818_s13 = smov 0  }
   0x4   :  { %s2820_s14 = smov 0   ;;  %s2822_s15 = smov 0  }
   0x5 LB: > { %s2837_s16 = sadd.s32 4294967295, %s2787_s15   ;;  %s2481_s17 = sadd.s32 4294967294, %s2787_s15   ;;  %s2787_s15 = sphi %s2822_s15, %s4563_s15   ;;  %s2783_s14 = sphi %s2820_s14, %s4562_s14   ;;  %s2779_s13 = sphi %s2818_s13, %s4561_s13   ;;  %s2775_s12 = sphi %s2816_s12, %s4560_s12  }
   0x6   : > { %s2841_s18 = sadd.s32 1, %s2787_s15   ;;  %s93_s19 = sadd.s32 1, %s2783_s14 }
   0x7   : > { %s90_s20 = ssub.s32 %s2787_s15, %s2841_s18  ;;  %p103_p0 = scmp.ne.s32.totalorder %s2783_s14, %s2779_s13 }
   0x8   : > { %p91_p1 = scmp.eq.s32.totalorder %s90_s20, 0  ;;  %p104_p2 = scmp.eq.s32.totalorder %s2837_s16, 1 }
   0x9   : > { %p109_p3 = scmp.ne.s32.totalorder %s2779_s13, %s2775_s12  ;;  %p110_p4 = scmp.eq.s32.totalorder %s2481_s17, 1 }
   0xa   : > { %s2852_s21 = scalar_select %p91_p1, %s2783_s14, %s93_s19  }
   0xb   : > { %p2854_p5 = por %p104_p2, %p103_p0  ;;  %p2858_p6 = por %p110_p4, %p109_p3 }
   0xc   : > { %p2482_p7 = scmp.ge.s32.totalorder %s2787_s15, 1  ;;  %p117_p8 = scmp.lt.s32.totalorder %s2787_s15, 3 }
   0xd   : > { %s4423_s23 = scalar_select %p2858_p6, 1, 0 }
   0xe   : > { %p4351_p9 = scmp.eq.s32.totalorder %s2837_s16, 0  ;;  %p2865_p10 = pnand %p2482_p7, %p117_p8 }
   0xf   : > { %s2789_s25 = smov [#allocation2]   ;;  %s2790_s28 = smov [#allocation5]  }
  0x10   : > { %s129_s26 = sshll.u32 %s2789_s25, 4  ;;  %p2612_p11 = pneg %p2865_p10  ;;  %s130_s26 = int_to_ptr.vmem [resolvable:$true] %s129_s26 }
  0x11   : > { %s143_s29 = sshll.u32 %s2790_s28, 4  ;;  %s2678_s30 = scalar_lea.vmem %s130_s26, 51200  ;;  %s144_s29 = int_to_ptr.vmem [resolvable:$true] %s143_s29 }
  0x12   : > { %p2873_p12 = pnand %p4351_p9, %p2612_p11  ;;  %p2679_p0 = scmp.ne.s32.totalorder %s130_s26, %s2678_s30 }
  0x13   : > { %p2686_p3 = scmp.lt.s32.totalorder %s130_s26, %s130_s26  ;;  %p2687_p4 = scmp.lt.s32.totalorder %s2678_s30, %s2678_s30 }
  0x14   : > { %p2669_p13 = pneg %p2873_p12 }
  0x15   : > { %p2688_p7 = por %p2687_p4, %p2686_p3 }
  0x16   : > { %p2681_p1 = pnand %p2679_p0, %p2669_p13 }
  0x18   : > { %p2682_p2 = pneg %p2681_p1 }
  0x1a   : > { %p2689_p8 = pnand %p2688_p7, %p2682_p2 }
  0x1c   : > { %2692 = shalt.err (!%p2689_p8)
}
  0x1d   : > { %s2791_s4 = smov 1024   ;;  %s2792_s5 = smov 64  }
  0x1e   : > { %2615 = dma.hbm_to_vmem [thread:$0]  (!%p2873_p12), %s4348_s1, 51200, %s130_s26, [#allocation3], %s2791_s4, %s2791_s4, %s2792_s5  }
  0x1f   : > { %s2704_s8 = scalar_lea.vmem %s144_s29, 128  ;;  %p2712_p9 = scmp.lt.s32.totalorder %s144_s29, %s144_s29 }
  0x20   : > { %p2705_p11 = scmp.ne.s32.totalorder %s144_s29, %s2704_s8  ;;  %p2713_p6 = scmp.lt.s32.totalorder %s2704_s8, %s2704_s8 }
  0x22   : > { %p2707_p0 = pnand %p2705_p11, %p2669_p13  ;;  %p2714_p3 = por %p2713_p6, %p2712_p9 }
  0x24   : > { %p2708_p1 = pneg %p2707_p0 }
  0x26   : > { %p2715_p2 = pnand %p2714_p3, %p2708_p1 }
  0x28   : > { %2718 = shalt.err (!%p2715_p2)
}
  0x29   : > { %2618 = dma.hbm_to_vmem [thread:$0]  (!%p2873_p12), %s4349_s2, 128, %s144_s29, [#allocation6]  }
  0x2a   : > { %166 = sbr.rel (%p2865_p10) target bundleno = 627 (0x273), region = 32 }
  0x2f   : > { %p4426_p4 = scmp.eq.s32.totalorder %s2837_s16, 0 }
  0x31   : > { %2762 = dma.done.wait (%p4426_p4), [#allocation3], 51200   ;;  %p4427_p13 = pmov %p4426_p4 }
  0x32   : > { %p4428_p7 = pmov %p4426_p4 }
  0x33   : > { %2764 = vsyncadd (%p4427_p13), [#allocation3], 4294916096 }
  0x34   : > { %2766 = dma.done.wait (%p4428_p7), [#allocation6], 128   ;;  %p4429_p6 = pmov %p4426_p4 }
  0x35   : > { %v468_v0 = vld [vmem:[#allocation2 + $0x3c8] sm:$0xff]  ;;  %v467_v2 = vld [vmem:[#allocation2 + $0x3c0] sm:$0xff]  ;;  %s2490_s11 = sshll.u32 %s2837_s16, 2  ;;  %vm789_vm0 = vcmask 130048   ;;  %s192_s26 = sand.u32 1, %s2779_s13  }
  0x36   : > { %2768 = vsyncadd (%p4429_p6), [#allocation6], 4294967168  ;;  %v724_v1 = vld [vmem:[#allocation2 + $0xbc8] sm:$0xff]  ;;  %838 = vmatprep.subr.mxu0 %v468_v0  ;;  %v723_v3 = vld [vmem:[#allocation2 + $0xbc0] sm:$0xff]  ;;  %p2908_p9 = scmp.lt.s32.totalorder %s2490_s11, 7  ;;  %s3459_s27 = sshll.u32 %s192_s26, 10 }
  0x37   : > { %999 = vmatprep.subr.mxu1 %v724_v1  ;;  %v460_v4 = vld [vmem:[#allocation2 + $0x388] sm:$0xff]  ;;  %839 = vmatpush1.msra.mxu0 %v467_v2  ;;  %v459_v6 = vld [vmem:[#allocation2 + $0x380] sm:$0xff]  ;;  %s3485_s28 = scalar_lea.vmem [#allocation7], %s3459_s27  ;;  %s2565_s29 = sshll.u32 %s2837_s16, 14 }
  0x38   : > { %v716_v5 = vld [vmem:[#allocation2 + $0xb88] sm:$0xff]  ;;  %1000 = vmatpush1.msra.mxu1 %v723_v3  ;;  %v715_v7 = vld [vmem:[#allocation2 + $0xb80] sm:$0xff]  ;;  %840 = vmatprep.subr.mxu0 %v460_v4  ;;  %s4565_s11 = smov (!%p2908_p9, %s2490_s11), 7  ;;  %s2397_s30 = sshll.u32 %s3485_s28, 4  ;;  %s4301_s30 = int_to_ptr.vmem [resolvable:$true] %s2397_s30 }
  0x39   : > { %v452_v8 = vld [vmem:[#allocation2 + $0x348] sm:$0xff]  ;;  %1001 = vmatprep.subr.mxu1 %v716_v5  ;;  %v451_v10 = vld [vmem:[#allocation2 + $0x340] sm:$0xff]  ;;  %841 = vmatpush1.msra.mxu0 %v459_v6  ;;  %s2563_s19 = sshll.u32 %s4565_s11, 5  ;;  %s4299_s6 = scalar_lea.hbm %s4350_s3, %s2565_s29 }
  0x3a   : > { %v708_v9 = vld [vmem:[#allocation2 + $0xb48] sm:$0xff]  ;;  %v707_v11 = vld [vmem:[#allocation2 + $0xb40] sm:$0xff]  ;;  %1002 = vmatpush1.msra.mxu1 %v715_v7  ;;  %842 = vmatprep.subr.mxu0 %v452_v8  ;;  %s2922_s25 = scalar_lea.vmem %s4347_s0, %s2563_s19  ;;  %s4307_s16 = scalar_lea.sflag [#allocation4], %s192_s26 }
  0x3b   : > { %v444_v12 = vld [vmem:[#allocation2 + $0x308] sm:$0xff]  ;;  %1003 = vmatprep.subr.mxu1 %v708_v9  ;;  %v443_v14 = vld [vmem:[#allocation2 + $0x300] sm:$0xff]  ;;  %843 = vmatpush1.msra.mxu0 %v451_v10  ;;  %v2925_v58 = vld [vmem:[%s2922_s25 + $0x18] sm:$0xff]  ;;  %s2719_s7 = scalar_lea.vmem %s4301_s30, 16384  ;;  %s2793_s8 = smov [#allocation7]  }
  0x3c   : > { %v700_v13 = vld [vmem:[#allocation2 + $0xb08] sm:$0xff]  ;;  %v699_v15 = vld [vmem:[#allocation2 + $0xb00] sm:$0xff]  ;;  %1004 = vmatpush1.msra.mxu1 %v707_v11  ;;  %844 = vmatprep.subr.mxu0 %v444_v12  ;;  %v2928_v61 = vld [vmem:[%s2922_s25 + $0x10] sm:$0xff]  ;;  %v222_v2 = vunpack.c.0.s8 %v2925_v58  ;;  %p2720_p10 = scmp.ne.s32.totalorder %s4301_s30, %s2719_s7  ;;  %s2723_s9 = sshll.u32 %s2793_s8, 4  ;;  %s2724_s9 = int_to_ptr.vmem [resolvable:$false] %s2723_s9 }
  0x3d   : > { %v436_v16 = vld [vmem:[#allocation2 + $0x2c8] sm:$0xff]  ;;  %1005 = vmatprep.subr.mxu1 %v700_v13  ;;  %v435_v18 = vld [vmem:[#allocation2 + $0x2c0] sm:$0xff]  ;;  %845 = vmatpush1.msra.mxu0 %v443_v14  ;;  %v221_v5 = vunpack.c.0.s8 %v2928_v61  ;;  %v226_v13 = vunpack.c.1.s8 %v2925_v58  ;;  %s2725_s10 = scalar_lea.vmem %s2724_s9, 32768  ;;  %p2726_p11 = scmp.lt.s32.totalorder %s4301_s30, %s2724_s9 }
  0x3e   : > { %v692_v17 = vld [vmem:[#allocation2 + $0xac8] sm:$0xff]  ;;  %v691_v19 = vld [vmem:[#allocation2 + $0xac0] sm:$0xff]  ;;  %1006 = vmatpush1.msra.mxu1 %v699_v15  ;;  %846 = vmatprep.subr.mxu0 %v436_v16  ;;  %v2932_v12 = vcvt.s32.f32 %v222_v2  ;;  %v470_v16 = vld [vmem:[#allocation2 + $0x3d8] sm:$0xff]  ;;  %p2721_p12 = pnand %p2720_p10, %p2854_p5  ;;  %p2727_p0 = scmp.lt.s32.totalorder %s2725_s10, %s2719_s7 }
  0x3f   : > { %v428_v20 = vld [vmem:[#allocation2 + $0x288] sm:$0xff]  ;;  %1007 = vmatprep.subr.mxu1 %v692_v17  ;;  %v427_v22 = vld [vmem:[#allocation2 + $0x280] sm:$0xff]  ;;  %847 = vmatpush1.msra.mxu0 %v435_v18  ;;  %v2935_v15 = vcvt.s32.f32 %v221_v5  ;;  %v225_v17 = vunpack.c.1.s8 %v2928_v61  ;;  %v406_v2 = vld [vmem:[#allocation2 + $0x1d8] sm:$0xff] }
  0x40   : > { %v684_v21 = vld [vmem:[#allocation2 + $0xa88] sm:$0xff]  ;;  %v683_v23 = vld [vmem:[#allocation2 + $0xa80] sm:$0xff]  ;;  %1008 = vmatpush1.msra.mxu1 %v691_v19  ;;  %848 = vmatprep.subr.mxu0 %v428_v20  ;;  %4431 = vst [vmem:[#allocation11_spill] sm:$0xff] %v2932_v12  ;;  %v469_v19 = vld [vmem:[#allocation2 + $0x3d0] sm:$0xff]  ;;  %p2722_p8 = pneg %p2721_p12  ;;  %p2728_p1 = por %p2727_p0, %p2726_p11 }
  0x41   : > { %v420_v24 = vld [vmem:[#allocation2 + $0x248] sm:$0xff]  ;;  %1009 = vmatprep.subr.mxu1 %v684_v21  ;;  %v419_v26 = vld [vmem:[#allocation2 + $0x240] sm:$0xff]  ;;  %849 = vmatpush1.msra.mxu0 %v427_v22  ;;  %4432 = vst [vmem:[#allocation12_spill] sm:$0xff] %v2935_v15  ;;  %v462_v21 = vld [vmem:[#allocation2 + $0x398] sm:$0xff]  ;;  %v2940_v22 = vcvt.s32.f32 %v226_v13 }
  0x42   : > { %v676_v25 = vld [vmem:[#allocation2 + $0xa48] sm:$0xff]  ;;  %v675_v27 = vld [vmem:[#allocation2 + $0xa40] sm:$0xff]  ;;  %1010 = vmatpush1.msra.mxu1 %v683_v23  ;;  %850 = vmatprep.subr.mxu0 %v420_v24  ;;  %v230_v24 = vunpack.c.2.s8 %v2925_v58  ;;  %v405_v5 = vld [vmem:[#allocation2 + $0x1d0] sm:$0xff]  ;;  %p2729_p3 = pnand %p2728_p1, %p2722_p8 }
  0x43   : > { %v412_v28 = vld [vmem:[#allocation2 + $0x208] sm:$0xff]  ;;  %1011 = vmatprep.subr.mxu1 %v676_v25  ;;  %v411_v30 = vld [vmem:[#allocation2 + $0x200] sm:$0xff]  ;;  %851 = vmatpush1.msra.mxu0 %v419_v26  ;;  %4433 = vst [vmem:[#allocation13_spill] sm:$0xff] %v2940_v22  ;;  %v461_v25 = vld [vmem:[#allocation2 + $0x390] sm:$0xff] }
  0x44   : > { %v668_v29 = vld [vmem:[#allocation2 + $0xa08] sm:$0xff]  ;;  %v667_v31 = vld [vmem:[#allocation2 + $0xa00] sm:$0xff]  ;;  %1012 = vmatpush1.msra.mxu1 %v675_v27  ;;  %852 = vmatprep.subr.mxu0 %v412_v28  ;;  %v2944_v27 = vcvt.s32.f32 %v225_v17  ;;  %v454_v28 = vld [vmem:[#allocation2 + $0x358] sm:$0xff] }
  0x45   : > { %v404_v32 = vld [vmem:[#allocation2 + $0x1c8] sm:$0xff]  ;;  %1013 = vmatprep.subr.mxu1 %v668_v29  ;;  %v403_v34 = vld [vmem:[#allocation2 + $0x1c0] sm:$0xff]  ;;  %853 = vmatpush1.msra.mxu0 %v411_v30  ;;  %v229_v29 = vunpack.c.2.s8 %v2928_v61 }
  0x46   : > { %v660_v33 = vld [vmem:[#allocation2 + $0x9c8] sm:$0xff]  ;;  %v659_v35 = vld [vmem:[#allocation2 + $0x9c0] sm:$0xff]  ;;  %1014 = vmatpush1.msra.mxu1 %v667_v31  ;;  %854 = vmatprep.subr.mxu0 %v404_v32  ;;  %4434 = vst [vmem:[#allocation14_spill] sm:$0xff] %v2944_v27  ;;  %v453_v31 = vld [vmem:[#allocation2 + $0x350] sm:$0xff] }
  0x47   : > { %v396_v36 = vld [vmem:[#allocation2 + $0x188] sm:$0xff]  ;;  %1015 = vmatprep.subr.mxu1 %v660_v33  ;;  %v395_v38 = vld [vmem:[#allocation2 + $0x180] sm:$0xff]  ;;  %855 = vmatpush1.msra.mxu0 %v403_v34  ;;  %v446_v33 = vld [vmem:[#allocation2 + $0x318] sm:$0xff]  ;;  %v2949_v34 = vcvt.s32.f32 %v230_v24 }
  0x48   : > { %v652_v37 = vld [vmem:[#allocation2 + $0x988] sm:$0xff]  ;;  %v651_v39 = vld [vmem:[#allocation2 + $0x980] sm:$0xff]  ;;  %1016 = vmatpush1.msra.mxu1 %v659_v35  ;;  %856 = vmatprep.subr.mxu0 %v396_v36  ;;  %v234_v36 = vunpack.c.3.s8 %v2925_v58 }
  0x49   : > { %v388_v40 = vld [vmem:[#allocation2 + $0x148] sm:$0xff]  ;;  %1017 = vmatprep.subr.mxu1 %v652_v37  ;;  %v387_v42 = vld [vmem:[#allocation2 + $0x140] sm:$0xff]  ;;  %857 = vmatpush1.msra.mxu0 %v395_v38  ;;  %4435 = vst [vmem:[#allocation15_spill] sm:$0xff] %v2949_v34  ;;  %v445_v37 = vld [vmem:[#allocation2 + $0x310] sm:$0xff] }
  0x4a   : > { %v644_v41 = vld [vmem:[#allocation2 + $0x948] sm:$0xff]  ;;  %v643_v43 = vld [vmem:[#allocation2 + $0x940] sm:$0xff]  ;;  %1018 = vmatpush1.msra.mxu1 %v651_v39  ;;  %858 = vmatprep.subr.mxu0 %v388_v40  ;;  %v2953_v39 = vcvt.s32.f32 %v229_v29  ;;  %v438_v40 = vld [vmem:[#allocation2 + $0x2d8] sm:$0xff] }
  0x4b   : > { %v380_v44 = vld [vmem:[#allocation2 + $0x108] sm:$0xff]  ;;  %1019 = vmatprep.subr.mxu1 %v644_v41  ;;  %v379_v46 = vld [vmem:[#allocation2 + $0x100] sm:$0xff]  ;;  %859 = vmatpush1.msra.mxu0 %v387_v42  ;;  %v233_v41 = vunpack.c.3.s8 %v2928_v61  ;;  %v2957_v42 = vld [vmem:[%s2922_s25 + $0x38] sm:$0xff] }
  0x4c   : > { %v636_v45 = vld [vmem:[#allocation2 + $0x908] sm:$0xff]  ;;  %v635_v47 = vld [vmem:[#allocation2 + $0x900] sm:$0xff]  ;;  %1020 = vmatpush1.msra.mxu1 %v643_v43  ;;  %860 = vmatprep.subr.mxu0 %v380_v44  ;;  %4436 = vst [vmem:[#allocation16_spill] sm:$0xff] %v2953_v39  ;;  %v437_v44 = vld [vmem:[#allocation2 + $0x2d0] sm:$0xff] }
  0x4d   : > { %v372_v48 = vld [vmem:[#allocation2 + $0xc8] sm:$0xff]  ;;  %1021 = vmatprep.subr.mxu1 %v636_v45  ;;  %v371_v50 = vld [vmem:[#allocation2 + $0xc0] sm:$0xff]  ;;  %861 = vmatpush1.msra.mxu0 %v379_v46  ;;  %v430_v46 = vld [vmem:[#allocation2 + $0x298] sm:$0xff] }
  0x4e   : > { %v628_v49 = vld [vmem:[#allocation2 + $0x8c8] sm:$0xff]  ;;  %v627_v51 = vld [vmem:[#allocation2 + $0x8c0] sm:$0xff]  ;;  %1022 = vmatpush1.msra.mxu1 %v635_v47  ;;  %862 = vmatprep.subr.mxu0 %v372_v48  ;;  %v2961_v47 = vcvt.s32.f32 %v234_v36  ;;  %v2964_v48 = vld [vmem:[%s2922_s25 + $0x30] sm:$0xff] }
  0x4f   : > { %v364_v52 = vld [vmem:[#allocation2 + $0x88] sm:$0xff]  ;;  %1023 = vmatprep.subr.mxu1 %v628_v49  ;;  %v363_v54 = vld [vmem:[#allocation2 + $0x80] sm:$0xff]  ;;  %863 = vmatpush1.msra.mxu0 %v371_v50  ;;  %v238_v50 = vunpack.c.0.s8 %v2957_v42  ;;  %v245_v17 = vunpack.c.2.s8 %v2964_v48  ;;  %v381_v29 = vld [vmem:[#allocation2 + $0x110] sm:$0xff]  ;;  %v249_v36 = vunpack.c.3.s8 %v2964_v48 }
  0x50   : > { %v620_v53 = vld [vmem:[#allocation2 + $0x888] sm:$0xff]  ;;  %v619_v55 = vld [vmem:[#allocation2 + $0x880] sm:$0xff]  ;;  %1024 = vmatpush1.msra.mxu1 %v627_v51  ;;  %864 = vmatprep.subr.mxu0 %v364_v52  ;;  %4437 = vst [vmem:[#allocation17_spill] sm:$0xff] %v2961_v47  ;;  %v429_v51 = vld [vmem:[#allocation2 + $0x290] sm:$0xff] }
  0x51   : > { %v356_v56 = vld [vmem:[#allocation2 + $0x48] sm:$0xff]  ;;  %1025 = vmatprep.subr.mxu1 %v620_v53  ;;  %v355_v59 = vld [vmem:[#allocation2 + $0x40] sm:$0xff]  ;;  %865 = vmatpush1.msra.mxu0 %v363_v54  ;;  %v2968_v53 = vcvt.s32.f32 %v233_v41  ;;  %v422_v54 = vld [vmem:[#allocation2 + $0x258] sm:$0xff] }
  0x52   : > { %v612_v57 = vld [vmem:[#allocation2 + $0x848] sm:$0xff]  ;;  %v611_v60 = vld [vmem:[#allocation2 + $0x840] sm:$0xff]  ;;  %1026 = vmatpush1.msra.mxu1 %v619_v55  ;;  %866 = vmatprep.subr.mxu0 %v356_v56  ;;  %v237_v55 = vunpack.c.0.s8 %v2964_v48 }
  0x53   : > { %v348_v62 = vld [vmem:[#allocation2 + $0x8] sm:$0xff]  ;;  %1027 = vmatprep.subr.mxu1 %v612_v57  ;;  %v347_v0 = vld [vmem:[#allocation2] sm:$0xff]  ;;  %867 = vmatpush1.msra.mxu0 %v355_v59  ;;  %4438 = vst [vmem:[#allocation18_spill] sm:$0xff] %v2968_v53  ;;  %v421_v57 = vld [vmem:[#allocation2 + $0x250] sm:$0xff] }
  0x54   : > { %v604_v63 = vld [vmem:[#allocation2 + $0x808] sm:$0xff]  ;;  %v603_v1 = vld [vmem:[#allocation2 + $0x800] sm:$0xff]  ;;  %1028 = vmatpush1.msra.mxu1 %v611_v60  ;;  %868 = vmatprep.subr.mxu0 %v348_v62  ;;  %v414_v59 = vld [vmem:[#allocation2 + $0x218] sm:$0xff]  ;;  %v2973_v60 = vcvt.s32.f32 %v238_v50  ;;  %v242_v62 = vunpack.c.1.s8 %v2957_v42 }
  0x55   : > { %v596_v3 = vld [vmem:[#allocation2 + $0x7c8] sm:$0xff]  ;;  %1029 = vmatprep.subr.mxu1 %v604_v63  ;;  %v595_v6 = vld [vmem:[#allocation2 + $0x7c0] sm:$0xff]  ;;  %869 = vmatpush1.msra.mxu0 %v347_v0  ;;  %v413_v63 = vld [vmem:[#allocation2 + $0x210] sm:$0xff] }
  0x56   : > { %v740_v4 = vld [vmem:[#allocation2 + $0xc48] sm:$0xff]  ;;  %v739_v7 = vld [vmem:[#allocation2 + $0xc40] sm:$0xff]  ;;  %1030 = vmatpush1.msra.mxu1 %v603_v1  ;;  %870 = vmatprep.subr.mxu0 %v596_v3  ;;  %4439 = vst [vmem:[#allocation19_spill] sm:$0xff] %v2973_v60  ;;  %v2977_v1 = vcvt.s32.f32 %v237_v55  ;;  %v241_v3 = vunpack.c.1.s8 %v2964_v48 }
  0x57   : > { %v588_v8 = vld [vmem:[#allocation2 + $0x788] sm:$0xff]  ;;  %1059 = vmatprep.subr.mxu1 %v740_v4  ;;  %v587_v10 = vld [vmem:[#allocation2 + $0x780] sm:$0xff]  ;;  %871 = vmatpush2.msra.mxu0 %v595_v6 }
  0x58   : > { %v732_v9 = vld [vmem:[#allocation2 + $0xc08] sm:$0xff]  ;;  %v731_v11 = vld [vmem:[#allocation2 + $0xc00] sm:$0xff]  ;;  %1060 = vmatpush2.msra.mxu1 %v739_v7  ;;  %872 = vmatprep.subr.mxu0 %v588_v8  ;;  %4440 = vst [vmem:[#allocation20_spill] sm:$0xff] %v2977_v1  ;;  %v398_v7 = vld [vmem:[#allocation2 + $0x198] sm:$0xff]  ;;  %v2982_v8 = vcvt.s32.f32 %v242_v62 }
  0x59   : > { %v580_v14 = vld [vmem:[#allocation2 + $0x748] sm:$0xff]  ;;  %1061 = vmatprep.subr.mxu1 %v732_v9  ;;  %873 = vmatpush2.msra.mxu0 %v587_v10  ;;  %v579_v18 = vld [vmem:[#allocation2 + $0x740] sm:$0xff]  ;;  %v246_v10 = vunpack.c.2.s8 %v2957_v42  ;;  %v350_v62 = vld [vmem:[#allocation2 + $0x18] sm:$0xff] }
  0x5a   : > { %1062 = vmatpush2.msra.mxu1 %v731_v11  ;;  %2493 = vmatprep.mubr.msk.f32.mxu1 %vm789_vm0, %v2932_v12  ;;  %v572_v20 = vld [vmem:[#allocation2 + $0x708] sm:$0xff]  ;;  %v571_v23 = vld [vmem:[#allocation2 + $0x700] sm:$0xff]  ;;  %4441 = vst [vmem:[#allocation21_spill] sm:$0xff] %v2982_v8  ;;  %v397_v11 = vld [vmem:[#allocation2 + $0x190] sm:$0xff] }
  0x5b   : > { %874 = vmatprep.subr.mxu0 %v580_v14  ;;  %1064 = vmatmul.mubr.f32.vlgmr.msra.gmra.mxu1 %v2935_v15  ;;  %v564_v26 = vld [vmem:[#allocation2 + $0x6c8] sm:$0xff]  ;;  %v563_v30 = vld [vmem:[#allocation2 + $0x6c0] sm:$0xff]  ;;  %v2986_v14 = vcvt.s32.f32 %v241_v3  ;;  %v2994_v24 = vcvt.s32.f32 %v246_v10  ;;  %v718_v10 = vld [vmem:[#allocation2 + $0xb98] sm:$0xff] }
  0x5c   : > { %1160 = vmatprep.subr.mxu1 %v470_v16  ;;  %875 = vmatpush2.msra.mxu0 %v579_v18  ;;  %v556_v32 = vld [vmem:[#allocation2 + $0x688] sm:$0xff]  ;;  %v555_v35 = vld [vmem:[#allocation2 + $0x680] sm:$0xff]  ;;  %v390_v16 = vld [vmem:[#allocation2 + $0x158] sm:$0xff] }
  0x5d   : > { %1161 = vmatpush1.msra.mxu1 %v469_v19  ;;  %876 = vmatprep.subr.mxu0 %v572_v20  ;;  %v548_v38 = vld [vmem:[#allocation2 + $0x648] sm:$0xff]  ;;  %v547_v43 = vld [vmem:[#allocation2 + $0x640] sm:$0xff]  ;;  %4442 = vst [vmem:[#allocation22_spill] sm:$0xff] %v2986_v14  ;;  %v389_v20 = vld [vmem:[#allocation2 + $0x150] sm:$0xff] }
  0x5e   : > { %1162 = vmatprep.subr.mxu1 %v462_v21  ;;  %877 = vmatpush2.msra.mxu0 %v571_v23  ;;  %v540_v45 = vld [vmem:[#allocation2 + $0x608] sm:$0xff]  ;;  %v539_v49 = vld [vmem:[#allocation2 + $0x600] sm:$0xff]  ;;  %v382_v23 = vld [vmem:[#allocation2 + $0x118] sm:$0xff]  ;;  %4443 = vst [vmem:[#allocation23_spill] sm:$0xff] %v2994_v24 }
  0x5f   : > { %2494 = vmatprep.mubr.msk.f32.mxu1 %vm789_vm0, %v2940_v22  ;;  %1163 = vmatpush1.msra.mxu1 %v461_v25  ;;  %v532_v52 = vld [vmem:[#allocation2 + $0x5c8] sm:$0xff]  ;;  %v531_v56 = vld [vmem:[#allocation2 + $0x5c0] sm:$0xff] }
  0x60   : > { %878 = vmatprep.subr.mxu0 %v564_v26  ;;  %1070 = vmatmul.mubr.f32.gmra.mxu1 %v2944_v27  ;;  %v524_v58 = vld [vmem:[#allocation2 + $0x588] sm:$0xff]  ;;  %v523_v61 = vld [vmem:[#allocation2 + $0x580] sm:$0xff] }
  0x61   : > { %1164 = vmatprep.subr.mxu1 %v454_v28  ;;  %879 = vmatpush2.msra.mxu0 %v563_v30  ;;  %v516_v0 = vld [vmem:[#allocation2 + $0x548] sm:$0xff]  ;;  %v515_v4 = vld [vmem:[#allocation2 + $0x540] sm:$0xff] }
  0x62   : > { %1165 = vmatpush1.msra.mxu1 %v453_v31  ;;  %880 = vmatprep.subr.mxu0 %v556_v32  ;;  %v508_v6 = vld [vmem:[#allocation2 + $0x508] sm:$0xff]  ;;  %v507_v9 = vld [vmem:[#allocation2 + $0x500] sm:$0xff]  ;;  %v3001_v31 = vcvt.s32.f32 %v245_v17  ;;  %v250_v32 = vunpack.c.3.s8 %v2957_v42  ;;  %v366_v42 = vld [vmem:[#allocation2 + $0x98] sm:$0xff] }
  0x63   : > { %1166 = vmatprep.subr.mxu1 %v446_v33  ;;  %881 = vmatpush2.msra.mxu0 %v555_v35  ;;  %v500_v13 = vld [vmem:[#allocation2 + $0x4c8] sm:$0xff]  ;;  %v499_v19 = vld [vmem:[#allocation2 + $0x4c0] sm:$0xff]  ;;  %v374_v33 = vld [vmem:[#allocation2 + $0xd8] sm:$0xff] }
  0x64   : > { %2495 = vmatprep.mubr.msk.f32.mxu1 %vm789_vm0, %v2949_v34  ;;  %1167 = vmatpush1.msra.mxu1 %v445_v37  ;;  %v2990_v18 = vld [vmem:[%s2922_s25 + $0x8] sm:$0xff]  ;;  %v2997_v25 = vld [vmem:[%s2922_s25] sm:$0xff]  ;;  %v590_v17 = vld [vmem:[#allocation2 + $0x798] sm:$0xff] }
  0x65   : > { %882 = vmatprep.subr.mxu0 %v548_v38  ;;  %1076 = vmatmul.mubr.f32.gmra.mxu1 %v2953_v39  ;;  %v492_v21 = vld [vmem:[#allocation2 + $0x488] sm:$0xff]  ;;  %v491_v26 = vld [vmem:[#allocation2 + $0x480] sm:$0xff]  ;;  %v220_v28 = vunpack.c.0.s8 %v2990_v18  ;;  %v219_v35 = vunpack.c.0.s8 %v2997_v25  ;;  %v373_v38 = vld [vmem:[#allocation2 + $0xd0] sm:$0xff]  ;;  %v224_v48 = vunpack.c.1.s8 %v2990_v18 }
  0x66   : > { %1168 = vmatprep.subr.mxu1 %v438_v40  ;;  %883 = vmatpush2.msra.mxu0 %v547_v43  ;;  %v484_v30 = vld [vmem:[#allocation2 + $0x448] sm:$0xff]  ;;  %v483_v37 = vld [vmem:[#allocation2 + $0x440] sm:$0xff]  ;;  %v3009_v40 = vld [vmem:[%s2922_s25 + $0x58] sm:$0xff] }
  0x67   : > { %1169 = vmatpush1.msra.mxu1 %v437_v44  ;;  %884 = vmatprep.subr.mxu0 %v540_v45  ;;  %v476_v41 = vld [vmem:[#allocation2 + $0x408] sm:$0xff]  ;;  %v3011_v43 = vcvt.s32.f32 %v220_v28  ;;  %v3014_v44 = vld [vmem:[%s2922_s25 + $0x50] sm:$0xff]  ;;  %v475_v45 = vld [vmem:[#allocation2 + $0x400] sm:$0xff]  ;;  %v3020_v50 = vcvt.s32.f32 %v219_v35  ;;  %v262_v28 = vunpack.c.2.s8 %v3009_v40 }
  0x68   : > { %1170 = vmatprep.subr.mxu1 %v430_v46  ;;  %885 = vmatpush2.msra.mxu0 %v539_v49  ;;  %v3017_v46 = vcvt.s32.f32 %v250_v32  ;;  %v365_v49 = vld [vmem:[#allocation2 + $0x90] sm:$0xff]  ;;  %v253_v55 = vunpack.c.0.s8 %v3014_v44  ;;  %v710_v32 = vld [vmem:[#allocation2 + $0xb58] sm:$0xff] }
  0x69   : > { %2496 = vmatprep.mubr.msk.f32.mxu1 %vm789_vm0, %v2961_v47  ;;  %1171 = vmatpush1.msra.mxu1 %v429_v51  ;;  %v3022_v51 = vcvt.s32.f32 %v249_v36  ;;  %v581_v35 = vld [vmem:[#allocation2 + $0x750] sm:$0xff] }
  0x6a   : > { %886 = vmatprep.subr.mxu0 %v532_v52  ;;  %1082 = vmatmul.mubr.f32.gmra.mxu1 %v2968_v53  ;;  %4444 = vst [vmem:[#allocation24_spill] sm:$0xff] %v3017_v46  ;;  %v254_v52 = vunpack.c.0.s8 %v3009_v40  ;;  %v709_v36 = vld [vmem:[#allocation2 + $0xb50] sm:$0xff] }
  0x6b   : > { %1172 = vmatprep.subr.mxu1 %v422_v54  ;;  %887 = vmatpush2.msra.mxu0 %v531_v56  ;;  %v223_v54 = vunpack.c.1.s8 %v2997_v25  ;;  %v358_v56 = vld [vmem:[#allocation2 + $0x58] sm:$0xff] }
  0x6c   : > { %1173 = vmatpush1.msra.mxu1 %v421_v57  ;;  %888 = vmatprep.subr.mxu0 %v524_v58  ;;  %v726_v57 = vld [vmem:[#allocation2 + $0xbd8] sm:$0xff]  ;;  %v357_v58 = vld [vmem:[#allocation2 + $0x50] sm:$0xff] }
  0x6d   : > { %1174 = vmatprep.subr.mxu1 %v414_v59  ;;  %889 = vmatpush2.msra.mxu0 %v523_v61  ;;  %v725_v59 = vld [vmem:[#allocation2 + $0xbd0] sm:$0xff]  ;;  %v3030_v61 = vcvt.s32.f32 %v224_v48  ;;  %v3037_v3 = vcvt.s32.f32 %v223_v54 }
  0x6e   : > { %2497 = vmatprep.mubr.msk.f32.mxu1 %vm789_vm0, %v2973_v60  ;;  %1175 = vmatpush1.msra.mxu1 %v413_v63  ;;  %v3034_v63 = vcvt.s32.f32 %v254_v52  ;;  %v702_v52 = vld [vmem:[#allocation2 + $0xb18] sm:$0xff] }
  0x6f   : > { %890 = vmatprep.subr.mxu0 %v516_v0  ;;  %1088 = vmatmul.mubr.f32.gmra.mxu1 %v2977_v1  ;;  %v228_v0 = vunpack.c.2.s8 %v2990_v18 }
  0x70   : > { %1176 = vmatprep.subr.mxu1 %v406_v2  ;;  %891 = vmatpush2.msra.mxu0 %v515_v4  ;;  %v349_v2 = vld [vmem:[#allocation2 + $0x10] sm:$0xff]  ;;  %v3039_v4 = vcvt.s32.f32 %v253_v55 }
  0x71   : > { %1177 = vmatpush1.msra.mxu1 %v405_v5  ;;  %892 = vmatprep.subr.mxu0 %v508_v6  ;;  %v258_v5 = vunpack.c.1.s8 %v3009_v40  ;;  %v227_v6 = vunpack.c.2.s8 %v2997_v25 }
  0x72   : > { %1178 = vmatprep.subr.mxu1 %v398_v7  ;;  %893 = vmatpush2.msra.mxu0 %v507_v9  ;;  %v257_v7 = vunpack.c.1.s8 %v3014_v44  ;;  %v598_v9 = vld [vmem:[#allocation2 + $0x7d8] sm:$0xff] }
  0x73   : > { %2498 = vmatprep.mubr.msk.f32.mxu1 %vm789_vm0, %v2982_v8  ;;  %1179 = vmatpush1.msra.mxu1 %v397_v11  ;;  %v597_v11 = vld [vmem:[#allocation2 + $0x7d0] sm:$0xff] }
  0x74   : > { %894 = vmatprep.subr.mxu0 %v500_v13  ;;  %1094 = vmatmul.mubr.f32.gmra.mxu1 %v2986_v14  ;;  %v717_v13 = vld [vmem:[#allocation2 + $0xb90] sm:$0xff] }
  0x75   : > { %1180 = vmatprep.subr.mxu1 %v390_v16  ;;  %895 = vmatpush2.msra.mxu0 %v499_v19  ;;  %v3047_v16 = vcvt.s32.f32 %v228_v0  ;;  %v3051_v19 = vcvt.s32.f32 %v258_v5  ;;  %v558_v0 = vld [vmem:[#allocation2 + $0x698] sm:$0xff]  ;;  %v3096_v5 = vld [vmem:[%s2922_s25 + $0x70] sm:$0xff] }
  0x76   : > { %1181 = vmatpush1.msra.mxu1 %v389_v20  ;;  %896 = vmatprep.subr.mxu0 %v492_v21  ;;  %v232_v20 = vunpack.c.3.s8 %v2990_v18  ;;  %v589_v21 = vld [vmem:[#allocation2 + $0x790] sm:$0xff]  ;;  %v582_v18 = vld [vmem:[#allocation2 + $0x758] sm:$0xff] }
  0x77   : > { %1182 = vmatprep.subr.mxu1 %v382_v23  ;;  %897 = vmatpush2.msra.mxu0 %v491_v26  ;;  %4445 = vst [vmem:[#allocation25_spill] sm:$0xff] %v3047_v16  ;;  %v3054_v23 = vcvt.s32.f32 %v227_v6  ;;  %v3056_v26 = vcvt.s32.f32 %v257_v7 }
  0x78   : > { %2499 = vmatprep.mubr.msk.f32.mxu1 %vm789_vm0, %v2994_v24  ;;  %1183 = vmatpush1.msra.mxu1 %v381_v29  ;;  %v231_v29 = vunpack.c.3.s8 %v2997_v25  ;;  %v574_v25 = vld [vmem:[#allocation2 + $0x718] sm:$0xff] }
  0x79   : > { %898 = vmatprep.subr.mxu0 %v484_v30  ;;  %1100 = vmatmul.mubr.f32.gmra.mxu1 %v3001_v31  ;;  %4446 = vst [vmem:[#allocation26_spill] sm:$0xff] %v3054_v23  ;;  %v3061_v30 = vld [vmem:[%s2922_s25 + $0x28] sm:$0xff] }
  0x7a   : > { %1184 = vmatprep.subr.mxu1 %v374_v33  ;;  %899 = vmatpush2.msra.mxu0 %v483_v37  ;;  %v261_v33 = vunpack.c.2.s8 %v3014_v44  ;;  %v3067_v37 = vcvt.s32.f32 %v232_v20  ;;  %v3077_v48 = vcvt.s32.f32 %v231_v29  ;;  %v240_v7 = vunpack.c.1.s8 %v3061_v30  ;;  %v542_v29 = vld [vmem:[#allocation2 + $0x618] sm:$0xff] }
  0x7b   : > { %1185 = vmatpush1.msra.mxu1 %v373_v38  ;;  %900 = vmatprep.subr.mxu0 %v476_v41  ;;  %v3070_v38 = vld [vmem:[%s2922_s25 + $0x20] sm:$0xff]  ;;  %v3074_v41 = vcvt.s32.f32 %v262_v28  ;;  %v269_v20 = vunpack.c.0.s8 %v3096_v5  ;;  %v549_v28 = vld [vmem:[#allocation2 + $0x650] sm:$0xff] }
  0x7c   : > { %1186 = vmatprep.subr.mxu1 %v366_v42  ;;  %901 = vmatpush2.msra.mxu0 %v475_v45  ;;  %4447 = vst [vmem:[#allocation27_spill] sm:$0xff] %v3067_v37  ;;  %v236_v42 = vunpack.c.0.s8 %v3061_v30  ;;  %v573_v45 = vld [vmem:[#allocation2 + $0x710] sm:$0xff]  ;;  %4448 = vst [vmem:[#allocation28_spill] sm:$0xff] %v3077_v48  ;;  %v3080_v54 = vcvt.s32.f32 %v261_v33  ;;  %v235_v55 = vunpack.c.0.s8 %v3070_v38 }
  0x7d   : > { %902 = vmatprep.mubr.f32.mxu0 %v3011_v43  ;;  %2500 = vmatprep.mubr.msk.f32.mxu1 %vm789_vm0, %v3017_v46 }
  0x7e   : > { %1187 = vmatpush1.msra.mxu1 %v365_v49  ;;  %903 = vmatmul.mubr.f32.vlgmr.msra.gmra.mxu0 %v3020_v50  ;;  %v266_v49 = vunpack.c.3.s8 %v3009_v40  ;;  %v701_v40 = vld [vmem:[#allocation2 + $0xb10] sm:$0xff]  ;;  %v3099_v6 = vcvt.s32.f32 %v235_v55  ;;  %v273_v55 = vunpack.c.1.s8 %v3096_v5 }
  0x7f   : > { %1106 = vmatmul.mubr.f32.gmra.mxu1 %v3022_v51  ;;  %1188 = vmatprep.subr.mxu1 %v358_v56  ;;  %v566_v56 = vld [vmem:[#allocation2 + $0x6d8] sm:$0xff] }
  0x80   : > { %1321 = vmatprep.subr.mxu0 %v726_v57  ;;  %1189 = vmatpush1.msra.mxu1 %v357_v58  ;;  %v265_v57 = vunpack.c.3.s8 %v3014_v44  ;;  %v3086_v58 = vld [vmem:[%s2922_s25 + $0x78] sm:$0xff]  ;;  %v557_v44 = vld [vmem:[#allocation2 + $0x690] sm:$0xff]  ;;  %4451 = vst [vmem:[#allocation31_spill] sm:$0xff] %v3099_v6 }
  0x81   : > { %1322 = vmatpush1.msra.mxu0 %v725_v59  ;;  %1190 = vmatprep.subr.mxu1 %v350_v62  ;;  %v565_v59 = vld [vmem:[#allocation2 + $0x6d0] sm:$0xff]  ;;  %v3090_v62 = vcvt.s32.f32 %v236_v42 }
  0x82   : > { %908 = vmatprep.mubr.f32.mxu0 %v3030_v61  ;;  %2501 = vmatprep.mubr.msk.f32.mxu1 %vm789_vm0, %v3034_v63  ;;  %v685_v42 = vld [vmem:[#allocation2 + $0xa90] sm:$0xff] }
  0x83   : > { %1191 = vmatpush1.msra.mxu1 %v349_v2  ;;  %909 = vmatmul.mubr.f32.gmra.mxu0 %v3037_v3  ;;  %4449 = vst [vmem:[#allocation29_spill] sm:$0xff] %v3090_v62  ;;  %v3093_v2 = vcvt.s32.f32 %v266_v49  ;;  %v3120_v49 = vcvt.s32.f32 %v269_v20  ;;  %v278_v20 = vunpack.c.2.s8 %v3086_v58 }
  0x84   : > { %1112 = vmatmul.mubr.f32.gmra.mxu1 %v3039_v4  ;;  %1192 = vmatprep.subr.mxu1 %v598_v9  ;;  %v270_v9 = vunpack.c.0.s8 %v3086_v58 }
  0x85   : > { %1323 = vmatprep.subr.mxu0 %v718_v10  ;;  %1193 = vmatpush2.msra.mxu1 %v597_v11  ;;  %4450 = vst [vmem:[#allocation30_spill] sm:$0xff] %v3093_v2  ;;  %v694_v10 = vld [vmem:[#allocation2 + $0xad8] sm:$0xff]  ;;  %v3103_v11 = vcvt.s32.f32 %v265_v57  ;;  %4456 = vst [vmem:[#allocation36_spill] sm:$0xff] %v3120_v49 }
  0x86   : > { %1324 = vmatpush1.msra.mxu0 %v717_v13  ;;  %1194 = vmatprep.subr.mxu1 %v590_v17  ;;  %v550_v13 = vld [vmem:[#allocation2 + $0x658] sm:$0xff]  ;;  %v239_v17 = vunpack.c.1.s8 %v3070_v38  ;;  %v3113_v33 = vcvt.s32.f32 %v270_v9  ;;  %v525_v9 = vld [vmem:[#allocation2 + $0x590] sm:$0xff] }
  0x87   : > { %914 = vmatprep.mubr.f32.mxu0 %v3047_v16  ;;  %2502 = vmatprep.mubr.msk.f32.mxu1 %vm789_vm0, %v3051_v19  ;;  %4452 = vst [vmem:[#allocation32_spill] sm:$0xff] %v3103_v11  ;;  %v678_v57 = vld [vmem:[#allocation2 + $0xa58] sm:$0xff] }
  0x88   : > { %1195 = vmatpush2.msra.mxu1 %v589_v21  ;;  %915 = vmatmul.mubr.f32.gmra.mxu0 %v3054_v23  ;;  %v693_v21 = vld [vmem:[#allocation2 + $0xad0] sm:$0xff]  ;;  %4454 = vst [vmem:[#allocation34_spill] sm:$0xff] %v3113_v33 }
  0x89   : > { %1118 = vmatmul.mubr.f32.gmra.mxu1 %v3056_v26  ;;  %1196 = vmatprep.subr.mxu1 %v582_v18  ;;  %v686_v18 = vld [vmem:[#allocation2 + $0xa98] sm:$0xff] }
  0x8a   : > { %1325 = vmatprep.subr.mxu0 %v710_v32  ;;  %1197 = vmatpush2.msra.mxu1 %v581_v35  ;;  %v3111_v32 = vcvt.s32.f32 %v240_v7  ;;  %v244_v35 = vunpack.c.2.s8 %v3061_v30  ;;  %v248_v7 = vunpack.c.3.s8 %v3061_v30  ;;  %v518_v30 = vld [vmem:[#allocation2 + $0x558] sm:$0xff] }
  0x8b   : > { %1326 = vmatpush1.msra.mxu0 %v709_v36  ;;  %1198 = vmatprep.subr.mxu1 %v574_v25  ;;  %v274_v36 = vunpack.c.1.s8 %v3086_v58  ;;  %v541_v25 = vld [vmem:[#allocation2 + $0x610] sm:$0xff] }
  0x8c   : > { %920 = vmatprep.mubr.f32.mxu0 %v3067_v37  ;;  %2503 = vmatprep.mubr.msk.f32.mxu1 %vm789_vm0, %v3074_v41  ;;  %4453 = vst [vmem:[#allocation33_spill] sm:$0xff] %v3111_v32 }
  0x8d   : > { %1199 = vmatpush2.msra.mxu1 %v573_v45  ;;  %1327 = vmatprep.subr.mxu0 %v702_v52  ;;  %v3118_v45 = vcvt.s32.f32 %v239_v17  ;;  %v243_v52 = vunpack.c.2.s8 %v3070_v38  ;;  %v3136_v17 = vcvt.s32.f32 %v273_v55 }
  0x8e   : > { %921 = vmatmul.mubr.f32.gmra.mxu0 %v3077_v48  ;;  %1124 = vmatmul.mubr.f32.gmra.mxu1 %v3080_v54 }
  0x8f   : > { %1200 = vmatprep.subr.mxu1 %v566_v56  ;;  %1328 = vmatpush1.msra.mxu0 %v701_v40  ;;  %4455 = vst [vmem:[#allocation35_spill] sm:$0xff] %v3118_v45  ;;  %v534_v56 = vld [vmem:[#allocation2 + $0x5d8] sm:$0xff]  ;;  %v3127_v40 = vcvt.s32.f32 %v244_v35  ;;  %4460 = vst [vmem:[#allocation40_spill] sm:$0xff] %v3136_v17  ;;  %v517_v35 = vld [vmem:[#allocation2 + $0x550] sm:$0xff] }
  0x90   : > { %1201 = vmatpush2.msra.mxu1 %v565_v59  ;;  %926 = vmatprep.mubr.f32.mxu0 %v3090_v62  ;;  %v533_v59 = vld [vmem:[#allocation2 + $0x5d0] sm:$0xff] }
  0x91   : > { %1202 = vmatprep.subr.mxu1 %v558_v0  ;;  %2504 = vmatprep.mubr.msk.f32.mxu1 %vm789_vm0, %v3093_v2  ;;  %4457 = vst [vmem:[#allocation37_spill] sm:$0xff] %v3127_v40  ;;  %v3129_v0 = vcvt.s32.f32 %v274_v36  ;;  %v669_v36 = vld [vmem:[#allocation2 + $0xa10] sm:$0xff] }
  0x92   : > { %1203 = vmatpush2.msra.mxu1 %v557_v44  ;;  %1329 = vmatprep.subr.mxu0 %v694_v10  ;;  %v526_v44 = vld [vmem:[#allocation2 + $0x598] sm:$0xff]  ;;  %v677_v10 = vld [vmem:[#allocation2 + $0xa50] sm:$0xff] }
  0x93   : > { %927 = vmatmul.mubr.f32.gmra.mxu0 %v3099_v6  ;;  %1130 = vmatmul.mubr.f32.gmra.mxu1 %v3103_v11  ;;  %4458 = vst [vmem:[#allocation38_spill] sm:$0xff] %v3129_v0 }
  0x94   : > { %1204 = vmatprep.subr.mxu1 %v550_v13  ;;  %1330 = vmatpush1.msra.mxu0 %v693_v21  ;;  %v3134_v13 = vcvt.s32.f32 %v243_v52  ;;  %v247_v21 = vunpack.c.3.s8 %v3070_v38  ;;  %v510_v38 = vld [vmem:[#allocation2 + $0x518] sm:$0xff]  ;;  %v3154_v52 = vcvt.s32.f32 %v278_v20 }
  0x95   : > { %1205 = vmatpush2.msra.mxu1 %v549_v28  ;;  %1331 = vmatprep.subr.mxu0 %v686_v18  ;;  %v277_v28 = vunpack.c.2.s8 %v3096_v5  ;;  %v670_v18 = vld [vmem:[#allocation2 + $0xa18] sm:$0xff] }
  0x96   : > { %1206 = vmatprep.subr.mxu1 %v542_v29  ;;  %932 = vmatprep.mubr.f32.mxu0 %v3111_v32  ;;  %4459 = vst [vmem:[#allocation39_spill] sm:$0xff] %v3134_v13  ;;  %v3143_v29 = vld [vmem:[%s2922_s25 + $0x48] sm:$0xff]  ;;  %4462 = vst [vmem:[#allocation42_spill] sm:$0xff] %v3154_v52  ;;  %v662_v20 = vld [vmem:[#allocation2 + $0x9d8] sm:$0xff] }
  0x97   : > { %2505 = vmatprep.mubr.msk.f32.mxu1 %vm789_vm0, %v3113_v33  ;;  %1207 = vmatpush2.msra.mxu1 %v541_v25  ;;  %v3147_v25 = vcvt.s32.f32 %v248_v7  ;;  %v252_v55 = vunpack.c.0.s8 %v3143_v29  ;;  %v614_v33 = vld [vmem:[#allocation2 + $0x858] sm:$0xff] }
  0x98   : > { %1332 = vmatpush1.msra.mxu0 %v685_v42  ;;  %1136 = vmatmul.mubr.f32.gmra.mxu1 %v3120_v49  ;;  %v3150_v42 = vld [vmem:[%s2922_s25 + $0x40] sm:$0xff]  ;;  %v440_v49 = vld [vmem:[#allocation2 + $0x2e8] sm:$0xff] }
  0x99   : > { %933 = vmatmul.mubr.f32.gmra.mxu0 %v3118_v45  ;;  %1208 = vmatprep.subr.mxu1 %v534_v56  ;;  %4461 = vst [vmem:[#allocation41_spill] sm:$0xff] %v3147_v25  ;;  %v509_v56 = vld [vmem:[#allocation2 + $0x510] sm:$0xff]  ;;  %v251_v7 = vunpack.c.0.s8 %v3150_v42 }
  0x9a   : > { %1333 = vmatprep.subr.mxu0 %v678_v57  ;;  %1209 = vmatpush2.msra.mxu1 %v533_v59  ;;  %v3157_v57 = vcvt.s32.f32 %v247_v21  ;;  %v3159_v59 = vcvt.s32.f32 %v277_v28  ;;  %v501_v21 = vld [vmem:[#allocation2 + $0x4d0] sm:$0xff] }
  0x9b   : > { %938 = vmatprep.mubr.f32.mxu0 %v3127_v40  ;;  %1210 = vmatprep.subr.mxu1 %v526_v44  ;;  %v282_v44 = vunpack.c.3.s8 %v3086_v58  ;;  %v661_v28 = vld [vmem:[#allocation2 + $0x9d0] sm:$0xff]  ;;  %v494_v58 = vld [vmem:[#allocation2 + $0x498] sm:$0xff] }
  0x9c   : > { %2506 = vmatprep.mubr.msk.f32.mxu1 %vm789_vm0, %v3129_v0  ;;  %1211 = vmatpush2.msra.mxu1 %v525_v9  ;;  %4463 = vst [vmem:[#allocation43_spill] sm:$0xff] %v3157_v57  ;;  %4464 = vst [vmem:[#allocation44_spill] sm:$0xff] %v3159_v59  ;;  %v281_v9 = vunpack.c.3.s8 %v3096_v5  ;;  %v256_v5 = vunpack.c.1.s8 %v3143_v29 }
  0x9d   : > { %1334 = vmatpush1.msra.mxu0 %v677_v10  ;;  %1142 = vmatmul.mubr.f32.gmra.mxu1 %v3136_v17  ;;  %v502_v10 = vld [vmem:[#allocation2 + $0x4d8] sm:$0xff]  ;;  %v3209_v17 = vld [vmem:[%s2922_s25 + $0x60] sm:$0xff] }
  0x9e   : > { %939 = vmatmul.mubr.f32.gmra.mxu0 %v3134_v13  ;;  %1212 = vmatprep.subr.mxu1 %v518_v30  ;;  %v3167_v30 = vcvt.s32.f32 %v252_v55  ;;  %v255_v55 = vunpack.c.1.s8 %v3150_v42 }
  0x9f   : > { %1335 = vmatprep.subr.mxu0 %v670_v18  ;;  %1213 = vmatpush2.msra.mxu1 %v517_v35  ;;  %v3171_v18 = vcvt.s32.f32 %v282_v44  ;;  %v493_v35 = vld [vmem:[#allocation2 + $0x490] sm:$0xff] }
  0xa0   : > { %1336 = vmatpush1.msra.mxu0 %v669_v36  ;;  %1214 = vmatprep.subr.mxu1 %v510_v38  ;;  %4465 = vst [vmem:[#allocation45_spill] sm:$0xff] %v3167_v30  ;;  %v3174_v36 = vcvt.s32.f32 %v251_v7  ;;  %v3176_v38 = vcvt.s32.f32 %v281_v9  ;;  %v485_v44 = vld [vmem:[#allocation2 + $0x450] sm:$0xff]  ;;  %v478_v7 = vld [vmem:[#allocation2 + $0x418] sm:$0xff]  ;;  %v260_v9 = vunpack.c.2.s8 %v3143_v29 }
  0xa1   : > { %944 = vmatprep.mubr.f32.mxu0 %v3147_v25  ;;  %2507 = vmatprep.mubr.msk.f32.mxu1 %vm789_vm0, %v3154_v52  ;;  %4466 = vst [vmem:[#allocation46_spill] sm:$0xff] %v3171_v18  ;;  %v456_v52 = vld [vmem:[#allocation2 + $0x368] sm:$0xff] }
  0xa2   : > { %1215 = vmatpush2.msra.mxu1 %v509_v56  ;;  %945 = vmatmul.mubr.f32.gmra.mxu0 %v3157_v57  ;;  %4467 = vst [vmem:[#allocation47_spill] sm:$0xff] %v3174_v36  ;;  %4468 = vst [vmem:[#allocation48_spill] sm:$0xff] %v3176_v38  ;;  %v486_v56 = vld [vmem:[#allocation2 + $0x458] sm:$0xff] }
  0xa3   : > { %1148 = vmatmul.mubr.f32.gmra.mxu1 %v3159_v59  ;;  %1216 = vmatprep.subr.mxu1 %v502_v10  ;;  %v654_v59 = vld [vmem:[#allocation2 + $0x998] sm:$0xff]  ;;  %v653_v10 = vld [vmem:[#allocation2 + $0x990] sm:$0xff] }
  0xa4   : > { %1337 = vmatprep.subr.mxu0 %v662_v20  ;;  %1217 = vmatpush2.msra.mxu1 %v501_v21  ;;  %v3182_v20 = vcvt.s32.f32 %v256_v5  ;;  %v477_v21 = vld [vmem:[#allocation2 + $0x410] sm:$0xff]  ;;  %v646_v5 = vld [vmem:[#allocation2 + $0x958] sm:$0xff] }
  0xa5   : > { %1338 = vmatpush1.msra.mxu0 %v661_v28  ;;  %1218 = vmatprep.subr.mxu1 %v494_v58  ;;  %v3187_v28 = vcvt.s32.f32 %v255_v55  ;;  %v259_v58 = vunpack.c.2.s8 %v3150_v42  ;;  %v264_v55 = vunpack.c.3.s8 %v3143_v29  ;;  %v637_v29 = vld [vmem:[#allocation2 + $0x910] sm:$0xff] }
  0xa6   : > { %950 = vmatprep.mubr.f32.mxu0 %v3167_v30  ;;  %2508 = vmatprep.mubr.msk.f32.mxu1 %vm789_vm0, %v3171_v18  ;;  %4469 = vst [vmem:[#allocation49_spill] sm:$0xff] %v3182_v20  ;;  %v471_v18 = vld [vmem:[#allocation2 + $0x3e0] sm:$0xff] }
  0xa7   : > { %1219 = vmatpush2.msra.mxu1 %v493_v35  ;;  %951 = vmatmul.mubr.f32.gmra.mxu0 %v3174_v36  ;;  %4470 = vst [vmem:[#allocation50_spill] sm:$0xff] %v3187_v28  ;;  %v472_v35 = vld [vmem:[#allocation2 + $0x3e8] sm:$0xff] }
  0xa8   : > { %1154 = vmatmul.mubr.f32.gmra.mxu1 %v3176_v38  ;;  %1220 = vmatprep.subr.mxu1 %v486_v56  ;;  %v645_v38 = vld [vmem:[#allocation2 + $0x950] sm:$0xff]  ;;  %v3192_v56 = vcvt.s32.f32 %v260_v9  ;;  %v263_v9 = vunpack.c.3.s8 %v3150_v42  ;;  %v448_v42 = vld [vmem:[#allocation2 + $0x328] sm:$0xff] }
  0xa9   : > { %1339 = vmatprep.subr.mxu0 %v654_v59  ;;  %1221 = vmatpush2.msra.mxu1 %v485_v44  ;;  %v464_v59 = vld [vmem:[#allocation2 + $0x3a8] sm:$0xff]  ;;  %v463_v44 = vld [vmem:[#allocation2 + $0x3a0] sm:$0xff] }
  0xaa   : > { %1340 = vmatpush1.msra.mxu0 %v653_v10  ;;  %1222 = vmatprep.subr.mxu1 %v478_v7  ;;  %4471 = vst [vmem:[#allocation51_spill] sm:$0xff] %v3192_v56  ;;  %v3197_v10 = vcvt.s32.f32 %v259_v58  ;;  %v3200_v7 = vld [vmem:[%s2922_s25 + $0x68] sm:$0xff] }
  0xab   : > { %956 = vmatprep.mubr.f32.mxu0 %v3182_v20  ;;  %1223 = vmatpush2.msra.mxu1 %v477_v21  ;;  %v638_v21 = vld [vmem:[#allocation2 + $0x918] sm:$0xff]  ;;  %v268_v58 = vunpack.c.0.s8 %v3200_v7 }
  0xac   : > { %1224 = vmatprep.mubr.f32.mxu1 %v3011_v43  ;;  %957 = vmatmul.mubr.f32.gmra.mxu0 %v3187_v28  ;;  %4472 = vst [vmem:[#allocation52_spill] sm:$0xff] %v3197_v10 }
  0xad   : > { %1225 = vmatmul.mubr.f32.vlgmr.msra.gmra.mxu1 %v3020_v50  ;;  %1341 = vmatprep.subr.mxu0 %v646_v5  ;;  %v455_v5 = vld [vmem:[#allocation2 + $0x360] sm:$0xff]  ;;  %v3217_v0 = vcvt.s32.f32 %v268_v58 }
  0xae   : > { %1482 = vmatprep.subr.mxu1 %v472_v35  ;;  %1342 = vmatpush1.msra.mxu0 %v645_v38  ;;  %v3205_v35 = vcvt.s32.f32 %v264_v55  ;;  %v3213_v38 = vcvt.s32.f32 %v263_v9  ;;  %v267_v55 = vunpack.c.0.s8 %v3209_v17  ;;  %v272_v9 = vunpack.c.1.s8 %v3200_v7  ;;  %v431_v58 = vld [vmem:[#allocation2 + $0x2a0] sm:$0xff] }
  0xaf   : > { %1483 = vmatpush1.msra.mxu1 %v471_v18  ;;  %962 = vmatprep.mubr.f32.mxu0 %v3192_v56  ;;  %v630_v18 = vld [vmem:[#allocation2 + $0x8d8] sm:$0xff]  ;;  %4475 = vst [vmem:[#allocation55_spill] sm:$0xff] %v3217_v0 }
  0xb0   : > { %1484 = vmatprep.subr.mxu1 %v464_v59  ;;  %1230 = vmatprep.mubr.f32.mxu1 %v3030_v61  ;;  %4473 = vst [vmem:[#allocation53_spill] sm:$0xff] %v3205_v35  ;;  %4474 = vst [vmem:[#allocation54_spill] sm:$0xff] %v3213_v38  ;;  %v447_v59 = vld [vmem:[#allocation2 + $0x320] sm:$0xff] }
  0xb1   : > { %1485 = vmatpush1.msra.mxu1 %v463_v44  ;;  %963 = vmatmul.mubr.f32.gmra.mxu0 %v3197_v10  ;;  %v629_v44 = vld [vmem:[#allocation2 + $0x8d0] sm:$0xff] }
  0xb2   : > { %1231 = vmatmul.mubr.f32.gmra.mxu1 %v3037_v3  ;;  %1343 = vmatprep.subr.mxu0 %v638_v21  ;;  %v432_v21 = vld [vmem:[#allocation2 + $0x2a8] sm:$0xff] }
  0xb3   : > { %1486 = vmatprep.subr.mxu1 %v456_v52  ;;  %1344 = vmatpush1.msra.mxu0 %v637_v29  ;;  %v439_v52 = vld [vmem:[#allocation2 + $0x2e0] sm:$0xff]  ;;  %v622_v29 = vld [vmem:[#allocation2 + $0x898] sm:$0xff] }
  0xb4   : > { %1487 = vmatpush1.msra.mxu1 %v455_v5  ;;  %968 = vmatprep.mubr.f32.mxu0 %v3205_v35  ;;  %v3223_v5 = vcvt.s32.f32 %v267_v55  ;;  %v423_v55 = vld [vmem:[#allocation2 + $0x260] sm:$0xff] }
  0xb5   : > { %1488 = vmatprep.subr.mxu1 %v448_v42  ;;  %1236 = vmatprep.mubr.f32.mxu1 %v3047_v16  ;;  %v621_v42 = vld [vmem:[#allocation2 + $0x890] sm:$0xff] }
  0xb6   : > { %1345 = vmatprep.subr.mxu0 %v630_v18  ;;  %1489 = vmatpush1.msra.mxu1 %v447_v59  ;;  %4476 = vst [vmem:[#allocation56_spill] sm:$0xff] %v3223_v5  ;;  %v271_v18 = vunpack.c.1.s8 %v3209_v17  ;;  %v424_v59 = vld [vmem:[#allocation2 + $0x268] sm:$0xff] }
  0xb7   : > { %969 = vmatmul.mubr.f32.gmra.mxu0 %v3213_v38  ;;  %1237 = vmatmul.mubr.f32.gmra.mxu1 %v3054_v23  ;;  %v3228_v23 = vcvt.s32.f32 %v272_v9  ;;  %v275_v9 = vunpack.c.2.s8 %v3209_v17 }
  0xb8   : > { %1346 = vmatpush1.msra.mxu0 %v629_v44  ;;  %1490 = vmatprep.subr.mxu1 %v440_v49  ;;  %v276_v49 = vunpack.c.2.s8 %v3200_v7  ;;  %v416_v44 = vld [vmem:[#allocation2 + $0x228] sm:$0xff] }
  0xb9   : > { %974 = vmatprep.mubr.f32.mxu0 %v3217_v0  ;;  %1491 = vmatpush1.msra.mxu1 %v439_v52  ;;  %4477 = vst [vmem:[#allocation57_spill] sm:$0xff] %v3228_v23  ;;  %v613_v52 = vld [vmem:[#allocation2 + $0x850] sm:$0xff] }
  0xba   : > { %1242 = vmatprep.mubr.f32.mxu1 %v3067_v37  ;;  %1492 = vmatprep.subr.mxu1 %v432_v21  ;;  %v415_v37 = vld [vmem:[#allocation2 + $0x220] sm:$0xff]  ;;  %v3233_v21 = vcvt.s32.f32 %v271_v18  ;;  %v3238_v11 = vcvt.s32.f32 %v276_v49  ;;  %v280_v18 = vunpack.c.3.s8 %v3200_v7  ;;  %v279_v49 = vunpack.c.3.s8 %v3209_v17  ;;  %v741_v7 = vld [vmem:[#allocation2 + $0xc50] sm:$0xff] }
  0xbb   : > { %1347 = vmatprep.subr.mxu0 %v622_v29  ;;  %1493 = vmatpush1.msra.mxu1 %v431_v58  ;;  %v408_v29 = vld [vmem:[#allocation2 + $0x1e8] sm:$0xff]  ;;  %v606_v58 = vld [vmem:[#allocation2 + $0x818] sm:$0xff] }
  0xbc   : > { %975 = vmatmul.mubr.f32.gmra.mxu0 %v3223_v5  ;;  %1243 = vmatmul.mubr.f32.gmra.mxu1 %v3077_v48  ;;  %4478 = vst [vmem:[#allocation58_spill] sm:$0xff] %v3233_v21  ;;  %4479 = vst [vmem:[#allocation59_spill] sm:$0xff] %v3238_v11  ;;  %v3252_v17 = vcvt.s32.f32 %v279_v49  ;;  %v367_v49 = vld [vmem:[#allocation2 + $0xa0] sm:$0xff] }
  0xbd   : > { %1348 = vmatpush1.msra.mxu0 %v621_v42  ;;  %1494 = vmatprep.subr.mxu1 %v424_v59  ;;  %v407_v42 = vld [vmem:[#allocation2 + $0x1e0] sm:$0xff]  ;;  %v605_v59 = vld [vmem:[#allocation2 + $0x810] sm:$0xff] }
  0xbe   : > { %1349 = vmatprep.subr.mxu0 %v614_v33  ;;  %1495 = vmatpush1.msra.mxu1 %v423_v55  ;;  %v400_v33 = vld [vmem:[#allocation2 + $0x1a8] sm:$0xff]  ;;  %v399_v55 = vld [vmem:[#allocation2 + $0x1a0] sm:$0xff]  ;;  %4481 = vst [vmem:[#allocation61_spill] sm:$0xff] %v3252_v17 }
  0xbf   : > { %980 = vmatprep.mubr.f32.mxu0 %v3228_v23  ;;  %1496 = vmatprep.subr.mxu1 %v416_v44  ;;  %v3243_v44 = vcvt.s32.f32 %v275_v9  ;;  %v384_v9 = vld [vmem:[#allocation2 + $0x128] sm:$0xff] }
  0xc0   : > { %1248 = vmatprep.mubr.f32.mxu1 %v3090_v62  ;;  %1350 = vmatpush1.msra.mxu0 %v613_v52  ;;  %v742_v52 = vld [vmem:[#allocation2 + $0xc58] sm:$0xff] }
  0xc1   : > { %1497 = vmatpush1.msra.mxu1 %v415_v37  ;;  %981 = vmatmul.mubr.f32.gmra.mxu0 %v3233_v21  ;;  %4480 = vst [vmem:[#allocation60_spill] sm:$0xff] %v3243_v44  ;;  %v392_v37 = vld [vmem:[#allocation2 + $0x168] sm:$0xff] }
  0xc2   : > { %1249 = vmatmul.mubr.f32.gmra.mxu1 %v3099_v6  ;;  %1498 = vmatprep.subr.mxu1 %v408_v29  ;;  %v391_v6 = vld [vmem:[#allocation2 + $0x160] sm:$0xff]  ;;  %v3248_v29 = vcvt.s32.f32 %v280_v18 }
  0xc3   : > { %1351 = vmatprep.subr.mxu0 %v606_v58  ;;  %1499 = vmatpush1.msra.mxu1 %v407_v42  ;;  %v383_v58 = vld [vmem:[#allocation2 + $0x120] sm:$0xff]  ;;  %v376_v42 = vld [vmem:[#allocation2 + $0xe8] sm:$0xff] }
  0xc4   : > { %986 = vmatprep.mubr.f32.mxu0 %v3238_v11  ;;  %1500 = vmatprep.subr.mxu1 %v400_v33  ;;  %v734_v33 = vld [vmem:[#allocation2 + $0xc18] sm:$0xff]  ;;  %v375_v18 = vld [vmem:[#allocation2 + $0xe0] sm:$0xff] }
  0xc5   : > { %1254 = vmatprep.mubr.f32.mxu1 %v3111_v32  ;;  %1352 = vmatpush1.msra.mxu0 %v605_v59  ;;  %v733_v59 = vld [vmem:[#allocation2 + $0xc10] sm:$0xff] }
  0xc6   : > { %1501 = vmatpush1.msra.mxu1 %v399_v55  ;;  %987 = vmatmul.mubr.f32.gmra.mxu0 %v3243_v44  ;;  %v368_v55 = vld [vmem:[#allocation2 + $0xa8] sm:$0xff] }
  0xc7   : > { %1255 = vmatmul.mubr.f32.gmra.mxu1 %v3118_v45  ;;  %1502 = vmatprep.subr.mxu1 %v392_v37  ;;  %v728_v37 = vld [vmem:[#allocation2 + $0xbe8] sm:$0xff] }
  0xc8   : > { %1381 = vmatprep.subr.mxu0 %v742_v52  ;;  %1503 = vmatpush1.msra.mxu1 %v391_v6  ;;  %v360_v6 = vld [vmem:[#allocation2 + $0x68] sm:$0xff]  ;;  %v359_v52 = vld [vmem:[#allocation2 + $0x60] sm:$0xff] }
  0xc9   : > { %1382 = vmatpush2.msra.mxu0 %v741_v7  ;;  %1504 = vmatprep.subr.mxu1 %v384_v9  ;;  %v727_v7 = vld [vmem:[#allocation2 + $0xbe0] sm:$0xff]  ;;  %v352_v9 = vld [vmem:[#allocation2 + $0x28] sm:$0xff] }
  0xca   : > { %992 = vmatprep.mubr.f32.mxu0 %v3248_v29  ;;  %1260 = vmatprep.mubr.f32.mxu1 %v3127_v40 }
  0xcb   : > { %1505 = vmatpush1.msra.mxu1 %v383_v58  ;;  %993 = vmatmul.mubr.f32.gmra.mxu0 %v3252_v17  ;;  %v351_v58 = vld [vmem:[#allocation2 + $0x20] sm:$0xff] }
  0xcc   : > { %1261 = vmatmul.mubr.f32.gmra.mxu1 %v3134_v13  ;;  %1506 = vmatprep.subr.mxu1 %v376_v42  ;;  %v600_v42 = vld [vmem:[#allocation2 + $0x7e8] sm:$0xff] }
  0xcd   : > { %1383 = vmatprep.subr.mxu0 %v734_v33  ;;  %1507 = vmatpush1.msra.mxu1 %v375_v18  ;;  %v720_v33 = vld [vmem:[#allocation2 + $0xba8] sm:$0xff]  ;;  %v599_v18 = vld [vmem:[#allocation2 + $0x7e0] sm:$0xff] }
  0xce   : > { %1384 = vmatpush2.msra.mxu0 %v733_v59  ;;  %1508 = vmatprep.subr.mxu1 %v368_v55  ;;  %v719_v59 = vld [vmem:[#allocation2 + $0xba0] sm:$0xff]  ;;  %v592_v55 = vld [vmem:[#allocation2 + $0x7a8] sm:$0xff] }
  0xcf   : > { %1266 = vmatprep.mubr.f32.mxu1 %v3147_v25  ;;  %2509 = vmatprep.mubr.msk.f32.mxu0 %vm789_vm0, %v2932_v12 }
  0xd0   : > { %1509 = vmatpush1.msra.mxu1 %v367_v49  ;;  %1386 = vmatmul.mubr.f32.vlgmr.msra.gmra.mxu0 %v2935_v15  ;;  %v591_v49 = vld [vmem:[#allocation2 + $0x7a0] sm:$0xff] }
  0xd1   : > { %1267 = vmatmul.mubr.f32.gmra.mxu1 %v3157_v57  ;;  %1510 = vmatprep.subr.mxu1 %v360_v6  ;;  %v584_v6 = vld [vmem:[#allocation2 + $0x768] sm:$0xff] }
  0xd2   : > { %1643 = vmatprep.subr.mxu0 %v728_v37  ;;  %1511 = vmatpush1.msra.mxu1 %v359_v52  ;;  %v712_v37 = vld [vmem:[#allocation2 + $0xb68] sm:$0xff]  ;;  %v583_v52 = vld [vmem:[#allocation2 + $0x760] sm:$0xff] }
  0xd3   : > { %1644 = vmatpush1.msra.mxu0 %v727_v7  ;;  %1512 = vmatprep.subr.mxu1 %v352_v9  ;;  %v711_v7 = vld [vmem:[#allocation2 + $0xb60] sm:$0xff]  ;;  %v576_v9 = vld [vmem:[#allocation2 + $0x728] sm:$0xff] }
  0xd4   : > { %1272 = vmatprep.mubr.f32.mxu1 %v3167_v30  ;;  %2510 = vmatprep.mubr.msk.f32.mxu0 %vm789_vm0, %v2940_v22 }
  0xd5   : > { %1513 = vmatpush1.msra.mxu1 %v351_v58  ;;  %1392 = vmatmul.mubr.f32.gmra.mxu0 %v2944_v27  ;;  %v575_v58 = vld [vmem:[#allocation2 + $0x720] sm:$0xff] }
  0xd6   : > { %1273 = vmatmul.mubr.f32.gmra.mxu1 %v3174_v36  ;;  %1514 = vmatprep.subr.mxu1 %v600_v42  ;;  %v704_v42 = vld [vmem:[#allocation2 + $0xb28] sm:$0xff] }
  0xd7   : > { %1645 = vmatprep.subr.mxu0 %v720_v33  ;;  %1515 = vmatpush2.msra.mxu1 %v599_v18  ;;  %v568_v33 = vld [vmem:[#allocation2 + $0x6e8] sm:$0xff]  ;;  %v703_v18 = vld [vmem:[#allocation2 + $0xb20] sm:$0xff] }
  0xd8   : > { %1646 = vmatpush1.msra.mxu0 %v719_v59  ;;  %1516 = vmatprep.subr.mxu1 %v592_v55  ;;  %v567_v59 = vld [vmem:[#allocation2 + $0x6e0] sm:$0xff]  ;;  %v560_v55 = vld [vmem:[#allocation2 + $0x6a8] sm:$0xff] }
  0xd9   : > { %1278 = vmatprep.mubr.f32.mxu1 %v3182_v20  ;;  %2511 = vmatprep.mubr.msk.f32.mxu0 %vm789_vm0, %v2949_v34 }
  0xda   : > { %1517 = vmatpush2.msra.mxu1 %v591_v49  ;;  %1398 = vmatmul.mubr.f32.gmra.mxu0 %v2953_v39  ;;  %v559_v49 = vld [vmem:[#allocation2 + $0x6a0] sm:$0xff] }
  0xdb   : > { %1279 = vmatmul.mubr.f32.gmra.mxu1 %v3187_v28  ;;  %1518 = vmatprep.subr.mxu1 %v584_v6  ;;  %v696_v6 = vld [vmem:[#allocation2 + $0xae8] sm:$0xff] }
  0xdc   : > { %1647 = vmatprep.subr.mxu0 %v712_v37  ;;  %1519 = vmatpush2.msra.mxu1 %v583_v52  ;;  %v552_v37 = vld [vmem:[#allocation2 + $0x668] sm:$0xff]  ;;  %v695_v52 = vld [vmem:[#allocation2 + $0xae0] sm:$0xff] }
  0xdd   : > { %1648 = vmatpush1.msra.mxu0 %v711_v7  ;;  %1520 = vmatprep.subr.mxu1 %v576_v9  ;;  %v551_v7 = vld [vmem:[#allocation2 + $0x660] sm:$0xff]  ;;  %v544_v9 = vld [vmem:[#allocation2 + $0x628] sm:$0xff] }
  0xde   : > { %1284 = vmatprep.mubr.f32.mxu1 %v3192_v56  ;;  %2512 = vmatprep.mubr.msk.f32.mxu0 %vm789_vm0, %v2961_v47 }
  0xdf   : > { %1521 = vmatpush2.msra.mxu1 %v575_v58  ;;  %1649 = vmatprep.subr.mxu0 %v704_v42  ;;  %v688_v58 = vld [vmem:[#allocation2 + $0xaa8] sm:$0xff]  ;;  %v543_v42 = vld [vmem:[#allocation2 + $0x620] sm:$0xff] }
  0xe0   : > { %1285 = vmatmul.mubr.f32.gmra.mxu1 %v3197_v10  ;;  %1404 = vmatmul.mubr.f32.gmra.mxu0 %v2968_v53 }
  0xe1   : > { %1522 = vmatprep.subr.mxu1 %v568_v33  ;;  %1650 = vmatpush1.msra.mxu0 %v703_v18  ;;  %v687_v33 = vld [vmem:[#allocation2 + $0xaa0] sm:$0xff]  ;;  %v536_v18 = vld [vmem:[#allocation2 + $0x5e8] sm:$0xff] }
  0xe2   : > { %1523 = vmatpush2.msra.mxu1 %v567_v59  ;;  %1290 = vmatprep.mubr.f32.mxu1 %v3205_v35  ;;  %v680_v59 = vld [vmem:[#allocation2 + $0xa68] sm:$0xff] }
  0xe3   : > { %1524 = vmatprep.subr.mxu1 %v560_v55  ;;  %2513 = vmatprep.mubr.msk.f32.mxu0 %vm789_vm0, %v2973_v60  ;;  %v535_v55 = vld [vmem:[#allocation2 + $0x5e0] sm:$0xff] }
  0xe4   : > { %1525 = vmatpush2.msra.mxu1 %v559_v49  ;;  %1651 = vmatprep.subr.mxu0 %v696_v6  ;;  %v528_v49 = vld [vmem:[#allocation2 + $0x5a8] sm:$0xff]  ;;  %v527_v6 = vld [vmem:[#allocation2 + $0x5a0] sm:$0xff] }
  0xe5   : > { %1291 = vmatmul.mubr.f32.gmra.mxu1 %v3213_v38  ;;  %1410 = vmatmul.mubr.f32.gmra.mxu0 %v2977_v1 }
  0xe6   : > { %1526 = vmatprep.subr.mxu1 %v552_v37  ;;  %1652 = vmatpush1.msra.mxu0 %v695_v52  ;;  %v679_v37 = vld [vmem:[#allocation2 + $0xa60] sm:$0xff]  ;;  %v520_v52 = vld [vmem:[#allocation2 + $0x568] sm:$0xff] }
  0xe7   : > { %1527 = vmatpush2.msra.mxu1 %v551_v7  ;;  %1653 = vmatprep.subr.mxu0 %v688_v58  ;;  %v672_v7 = vld [vmem:[#allocation2 + $0xa28] sm:$0xff]  ;;  %v671_v58 = vld [vmem:[#allocation2 + $0xa20] sm:$0xff] }
  0xe8   : > { %1528 = vmatprep.subr.mxu1 %v544_v9  ;;  %1296 = vmatprep.mubr.f32.mxu1 %v3217_v0  ;;  %v519_v9 = vld [vmem:[#allocation2 + $0x560] sm:$0xff] }
  0xe9   : > { %2514 = vmatprep.mubr.msk.f32.mxu0 %vm789_vm0, %v2982_v8  ;;  %1529 = vmatpush2.msra.mxu1 %v543_v42  ;;  %v512_v42 = vld [vmem:[#allocation2 + $0x528] sm:$0xff] }
  0xea   : > { %1654 = vmatpush1.msra.mxu0 %v687_v33  ;;  %1297 = vmatmul.mubr.f32.gmra.mxu1 %v3223_v5  ;;  %v511_v33 = vld [vmem:[#allocation2 + $0x520] sm:$0xff] }
  0xeb   : > { %1416 = vmatmul.mubr.f32.gmra.mxu0 %v2986_v14  ;;  %1530 = vmatprep.subr.mxu1 %v536_v18  ;;  %v504_v18 = vld [vmem:[#allocation2 + $0x4e8] sm:$0xff] }
  0xec   : > { %1655 = vmatprep.subr.mxu0 %v680_v59  ;;  %1531 = vmatpush2.msra.mxu1 %v535_v55  ;;  %v664_v59 = vld [vmem:[#allocation2 + $0x9e8] sm:$0xff]  ;;  %v503_v55 = vld [vmem:[#allocation2 + $0x4e0] sm:$0xff] }
  0xed   : > { %1302 = vmatprep.mubr.f32.mxu1 %v3228_v23  ;;  %1532 = vmatprep.subr.mxu1 %v528_v49  ;;  %v663_v49 = vld [vmem:[#allocation2 + $0x9e0] sm:$0xff] }
  0xee   : > { %2515 = vmatprep.mubr.msk.f32.mxu0 %vm789_vm0, %v2994_v24  ;;  %1533 = vmatpush2.msra.mxu1 %v527_v6  ;;  %v496_v6 = vld [vmem:[#allocation2 + $0x4a8] sm:$0xff] }
  0xef   : > { %1656 = vmatpush1.msra.mxu0 %v679_v37  ;;  %1303 = vmatmul.mubr.f32.gmra.mxu1 %v3233_v21  ;;  %v495_v37 = vld [vmem:[#allocation2 + $0x4a0] sm:$0xff] }
  0xf0   : > { %1422 = vmatmul.mubr.f32.gmra.mxu0 %v3001_v31  ;;  %1534 = vmatprep.subr.mxu1 %v520_v52  ;;  %v488_v52 = vld [vmem:[#allocation2 + $0x468] sm:$0xff] }
  0xf1   : > { %1657 = vmatprep.subr.mxu0 %v672_v7  ;;  %1535 = vmatpush2.msra.mxu1 %v519_v9  ;;  %v656_v7 = vld [vmem:[#allocation2 + $0x9a8] sm:$0xff]  ;;  %v487_v9 = vld [vmem:[#allocation2 + $0x460] sm:$0xff] }
  0xf2   : > { %1658 = vmatpush1.msra.mxu0 %v671_v58  ;;  %1536 = vmatprep.subr.mxu1 %v512_v42  ;;  %v655_v58 = vld [vmem:[#allocation2 + $0x9a0] sm:$0xff]  ;;  %v480_v42 = vld [vmem:[#allocation2 + $0x428] sm:$0xff] }
  0xf3   : > { %1308 = vmatprep.mubr.f32.mxu1 %v3238_v11  ;;  %2516 = vmatprep.mubr.msk.f32.mxu0 %vm789_vm0, %v3017_v46 }
  0xf4   : > { %1537 = vmatpush2.msra.mxu1 %v511_v33  ;;  %1428 = vmatmul.mubr.f32.gmra.mxu0 %v3022_v51  ;;  %v479_v33 = vld [vmem:[#allocation2 + $0x420] sm:$0xff] }
  0xf5   : > { %1309 = vmatmul.mubr.f32.gmra.mxu1 %v3243_v44  ;;  %1538 = vmatprep.subr.mxu1 %v504_v18  ;;  %v648_v18 = vld [vmem:[#allocation2 + $0x968] sm:$0xff] }
  0xf6   : > { %1659 = vmatprep.subr.mxu0 %v664_v59  ;;  %1539 = vmatpush2.msra.mxu1 %v503_v55  ;;  %v474_v59 = vld [vmem:[#allocation2 + $0x3f8] sm:$0xff]  ;;  %v647_v55 = vld [vmem:[#allocation2 + $0x960] sm:$0xff] }
  0xf7   : > { %1660 = vmatpush1.msra.mxu0 %v663_v49  ;;  %1540 = vmatprep.subr.mxu1 %v496_v6  ;;  %v473_v49 = vld [vmem:[#allocation2 + $0x3f0] sm:$0xff]  ;;  %v466_v6 = vld [vmem:[#allocation2 + $0x3b8] sm:$0xff] }
  0xf8   : > { %1314 = vmatprep.mubr.f32.mxu1 %v3248_v29  ;;  %2517 = vmatprep.mubr.msk.f32.mxu0 %vm789_vm0, %v3034_v63 }
  0xf9   : > { %1541 = vmatpush2.msra.mxu1 %v495_v37  ;;  %1434 = vmatmul.mubr.f32.gmra.mxu0 %v3039_v4  ;;  %v465_v37 = vld [vmem:[#allocation2 + $0x3b0] sm:$0xff] }
  0xfa   : > { %1315 = vmatmul.mubr.f32.gmra.mxu1 %v3252_v17  ;;  %1542 = vmatprep.subr.mxu1 %v488_v52  ;;  %v640_v52 = vld [vmem:[#allocation2 + $0x928] sm:$0xff] }
  0xfb   : > { %1661 = vmatprep.subr.mxu0 %v656_v7  ;;  %1543 = vmatpush2.msra.mxu1 %v487_v9  ;;  %v458_v7 = vld [vmem:[#allocation2 + $0x378] sm:$0xff]  ;;  %v639_v9 = vld [vmem:[#allocation2 + $0x920] sm:$0xff] }
  0xfc   : > { %1662 = vmatpush1.msra.mxu0 %v655_v58  ;;  %1544 = vmatprep.subr.mxu1 %v480_v42  ;;  %v457_v58 = vld [vmem:[#allocation2 + $0x370] sm:$0xff]  ;;  %v450_v42 = vld [vmem:[#allocation2 + $0x338] sm:$0xff] }
  0xfd   : > { %2518 = vmatprep.mubr.msk.f32.mxu0 %vm789_vm0, %v3051_v19  ;;  %1545 = vmatpush2.msra.mxu1 %v479_v33  ;;  %v632_v33 = vld [vmem:[#allocation2 + $0x8e8] sm:$0xff] }
  0xfe   : > { %1546 = vmatprep.mubr.f32.mxu1 %v3011_v43  ;;  %1440 = vmatmul.mubr.f32.gmra.mxu0 %v3056_v26 }
  0xff   : > { %1547 = vmatmul.mubr.f32.vlgmr.msra.gmra.mxu1 %v3020_v50  ;;  %1663 = vmatprep.subr.mxu0 %v648_v18  ;;  %v449_v18 = vld [vmem:[#allocation2 + $0x330] sm:$0xff] }
 0x100   : > { %1804 = vmatprep.subr.mxu1 %v474_v59  ;;  %1664 = vmatpush1.msra.mxu0 %v647_v55  ;;  %v631_v59 = vld [vmem:[#allocation2 + $0x8e0] sm:$0xff]  ;;  %v442_v55 = vld [vmem:[#allocation2 + $0x2f8] sm:$0xff] }
 0x101   : > { %1805 = vmatpush1.msra.mxu1 %v473_v49  ;;  %2519 = vmatprep.mubr.msk.f32.mxu0 %vm789_vm0, %v3074_v41  ;;  %v4482_v49 = vld [vmem:[#allocation32_spill] sm:$0xff] }
 0x102   : > { %1806 = vmatprep.subr.mxu1 %v466_v6  ;;  %1552 = vmatprep.mubr.f32.mxu1 %v3030_v61  ;;  %v441_v6 = vld [vmem:[#allocation2 + $0x2f0] sm:$0xff] }
 0x103   : > { %1807 = vmatpush1.msra.mxu1 %v465_v37  ;;  %1446 = vmatmul.mubr.f32.gmra.mxu0 %v3080_v54  ;;  %v4483_v37 = vld [vmem:[#allocation26_spill] sm:$0xff] }
 0x104   : > { %1553 = vmatmul.mubr.f32.gmra.mxu1 %v3037_v3  ;;  %1665 = vmatprep.subr.mxu0 %v640_v52  ;;  %v434_v52 = vld [vmem:[#allocation2 + $0x2b8] sm:$0xff] }
 0x105   : > { %1808 = vmatprep.subr.mxu1 %v458_v7  ;;  %1666 = vmatpush1.msra.mxu0 %v639_v9  ;;  %v624_v7 = vld [vmem:[#allocation2 + $0x8a8] sm:$0xff]  ;;  %v4484_v9 = vld [vmem:[#allocation34_spill] sm:$0xff] }
 0x106   : > { %1809 = vmatpush1.msra.mxu1 %v457_v58  ;;  %2520 = vmatprep.mubr.msk.f32.mxu0 %vm789_vm0, %v3093_v2  ;;  %v433_v58 = vld [vmem:[#allocation2 + $0x2b0] sm:$0xff] }
 0x107   : > { %1810 = vmatprep.subr.mxu1 %v450_v42  ;;  %1558 = vmatprep.mubr.f32.mxu1 %v3047_v16  ;;  %v4485_v42 = vld [vmem:[#allocation27_spill] sm:$0xff]  ;;  %v623_v16 = vld [vmem:[#allocation2 + $0x8a0] sm:$0xff] }
 0x108   : > { %1667 = vmatprep.subr.mxu0 %v632_v33  ;;  %1811 = vmatpush1.msra.mxu1 %v449_v18  ;;  %v426_v33 = vld [vmem:[#allocation2 + $0x278] sm:$0xff]  ;;  %v616_v18 = vld [vmem:[#allocation2 + $0x868] sm:$0xff] }
 0x109   : > { %1452 = vmatmul.mubr.f32.gmra.mxu0 %v4482_v49  ;;  %1559 = vmatmul.mubr.f32.gmra.mxu1 %v4483_v37  ;;  %v4486_v49 = vld [vmem:[#allocation36_spill] sm:$0xff] }
 0x10a   : > { %1668 = vmatpush1.msra.mxu0 %v631_v59  ;;  %1812 = vmatprep.subr.mxu1 %v442_v55  ;;  %v425_v37 = vld [vmem:[#allocation2 + $0x270] sm:$0xff]  ;;  %v418_v59 = vld [vmem:[#allocation2 + $0x238] sm:$0xff]  ;;  %v615_v55 = vld [vmem:[#allocation2 + $0x860] sm:$0xff] }
 0x10b   : > { %2521 = vmatprep.mubr.msk.f32.mxu0 %vm789_vm0, %v4484_v9  ;;  %1813 = vmatpush1.msra.mxu1 %v441_v6  ;;  %v417_v9 = vld [vmem:[#allocation2 + $0x230] sm:$0xff]  ;;  %v4487_v6 = vld [vmem:[#allocation38_spill] sm:$0xff] }
 0x10c   : > { %1564 = vmatprep.mubr.f32.mxu1 %v4485_v42  ;;  %1814 = vmatprep.subr.mxu1 %v434_v52  ;;  %v410_v52 = vld [vmem:[#allocation2 + $0x1f8] sm:$0xff] }
 0x10d   : > { %1669 = vmatprep.subr.mxu0 %v624_v7  ;;  %1815 = vmatpush1.msra.mxu1 %v433_v58  ;;  %v608_v7 = vld [vmem:[#allocation2 + $0x828] sm:$0xff]  ;;  %v409_v58 = vld [vmem:[#allocation2 + $0x1f0] sm:$0xff] }
 0x10e   : > { %1458 = vmatmul.mubr.f32.gmra.mxu0 %v4486_v49  ;;  %1565 = vmatmul.mubr.f32.gmra.mxu1 %v3077_v48  ;;  %v4488_v49 = vld [vmem:[#allocation40_spill] sm:$0xff]  ;;  %v4490_v48 = vld [vmem:[#allocation42_spill] sm:$0xff] }
 0x10f   : > { %1670 = vmatpush1.msra.mxu0 %v623_v16  ;;  %1816 = vmatprep.subr.mxu1 %v426_v33  ;;  %v4489_v16 = vld [vmem:[#allocation31_spill] sm:$0xff]  ;;  %v402_v33 = vld [vmem:[#allocation2 + $0x1b8] sm:$0xff] }
 0x110   : > { %1671 = vmatprep.subr.mxu0 %v616_v18  ;;  %1817 = vmatpush1.msra.mxu1 %v425_v37  ;;  %v607_v18 = vld [vmem:[#allocation2 + $0x820] sm:$0xff]  ;;  %v401_v37 = vld [vmem:[#allocation2 + $0x1b0] sm:$0xff] }
 0x111   : > { %2522 = vmatprep.mubr.msk.f32.mxu0 %vm789_vm0, %v4487_v6  ;;  %1818 = vmatprep.subr.mxu1 %v418_v59  ;;  %v394_v59 = vld [vmem:[#allocation2 + $0x178] sm:$0xff] }
 0x112   : > { %1570 = vmatprep.mubr.f32.mxu1 %v3090_v62  ;;  %1672 = vmatpush1.msra.mxu0 %v615_v55  ;;  %v744_v55 = vld [vmem:[#allocation2 + $0xc68] sm:$0xff]  ;;  %v4491_v62 = vld [vmem:[#allocation44_spill] sm:$0xff] }
 0x113   : > { %1819 = vmatpush1.msra.mxu1 %v417_v9  ;;  %1464 = vmatmul.mubr.f32.gmra.mxu0 %v4488_v49  ;;  %v393_v9 = vld [vmem:[#allocation2 + $0x170] sm:$0xff]  ;;  %v743_v49 = vld [vmem:[#allocation2 + $0xc60] sm:$0xff] }
 0x114   : > { %1571 = vmatmul.mubr.f32.gmra.mxu1 %v4489_v16  ;;  %1820 = vmatprep.subr.mxu1 %v410_v52  ;;  %v386_v52 = vld [vmem:[#allocation2 + $0x138] sm:$0xff] }
 0x115   : > { %1673 = vmatprep.subr.mxu0 %v608_v7  ;;  %1821 = vmatpush1.msra.mxu1 %v409_v58  ;;  %v385_v7 = vld [vmem:[#allocation2 + $0x130] sm:$0xff]  ;;  %v4492_v58 = vld [vmem:[#allocation46_spill] sm:$0xff] }
 0x116   : > { %2523 = vmatprep.mubr.msk.f32.mxu0 %vm789_vm0, %v4490_v48  ;;  %1822 = vmatprep.subr.mxu1 %v402_v33  ;;  %v378_v33 = vld [vmem:[#allocation2 + $0xf8] sm:$0xff] }
 0x117   : > { %1576 = vmatprep.mubr.f32.mxu1 %v3111_v32  ;;  %1674 = vmatpush1.msra.mxu0 %v607_v18  ;;  %v736_v32 = vld [vmem:[#allocation2 + $0xc28] sm:$0xff] }
 0x118   : > { %1823 = vmatpush1.msra.mxu1 %v401_v37  ;;  %1470 = vmatmul.mubr.f32.gmra.mxu0 %v4491_v62  ;;  %v377_v37 = vld [vmem:[#allocation2 + $0xf0] sm:$0xff]  ;;  %v735_v62 = vld [vmem:[#allocation2 + $0xc20] sm:$0xff] }
 0x119   : > { %1577 = vmatmul.mubr.f32.gmra.mxu1 %v3118_v45  ;;  %1824 = vmatprep.subr.mxu1 %v394_v59  ;;  %v4493_v45 = vld [vmem:[#allocation48_spill] sm:$0xff]  ;;  %v370_v59 = vld [vmem:[#allocation2 + $0xb8] sm:$0xff] }
 0x11a   : > { %1703 = vmatprep.subr.mxu0 %v744_v55  ;;  %1825 = vmatpush1.msra.mxu1 %v393_v9  ;;  %v362_v9 = vld [vmem:[#allocation2 + $0x78] sm:$0xff] }
 0x11b   : > { %1704 = vmatpush2.msra.mxu0 %v743_v49  ;;  %1826 = vmatprep.subr.mxu1 %v386_v52  ;;  %v3335_v18 = vpop.f32.mrf.mxu1  ;;  %v369_v49 = vld [vmem:[#allocation2 + $0xb0] sm:$0xff]  ;;  %v3343_v52 = vld [vmem:[#allocation2 + $0xbf8] sm:$0xff] }
 0x11c   : > { %2524 = vmatprep.mubr.msk.f32.mxu0 %vm789_vm0, %v4492_v58  ;;  %1582 = vmatprep.mubr.f32.mxu1 %v3127_v40 }
 0x11d   : > { %1827 = vmatpush1.msra.mxu1 %v385_v7  ;;  %1476 = vmatmul.mubr.f32.gmra.mxu0 %v4493_v45  ;;  %v3340_v55 = vpop.f32.mrf.mxu1  ;;  %v3349_v45 = vld [vmem:[#allocation2 + $0xbf0] sm:$0xff] }
 0x11e   : > { %1583 = vmatmul.mubr.f32.gmra.mxu1 %v3134_v13  ;;  %1828 = vmatprep.subr.mxu1 %v378_v33  ;;  %v361_v13 = vld [vmem:[#allocation2 + $0x70] sm:$0xff] }
 0x11f   : > { %1705 = vmatprep.subr.mxu0 %v736_v32  ;;  %1829 = vmatpush1.msra.mxu1 %v377_v37  ;;  %v353_v33 = vld [vmem:[#allocation2 + $0x30] sm:$0xff]  ;;  %v602_v37 = vld [vmem:[#allocation2 + $0x7f8] sm:$0xff] }
 0x120   : > { %1706 = vmatpush2.msra.mxu0 %v735_v62  ;;  %1830 = vmatprep.subr.mxu1 %v370_v59  ;;  %v3345_v7 = vpop.f32.mrf.mxu1  ;;  %v354_v62 = vld [vmem:[#allocation2 + $0x38] sm:$0xff] }
 0x121   : > { %1588 = vmatprep.mubr.f32.mxu1 %v3147_v25  ;;  %2525 = vmatprep.mubr.msk.f32.mxu0 %vm789_vm0, %v2932_v12  ;;  %v3358_v59 = vld [vmem:[#allocation2 + $0xbb8] sm:$0xff] }
 0x122   : > { %1831 = vmatpush1.msra.mxu1 %v369_v49  ;;  %1708 = vmatmul.mubr.f32.vlgmr.msra.gmra.mxu0 %v2935_v15  ;;  %v3353_v32 = vpop.f32.mrf.mxu1  ;;  %v601_v15 = vld [vmem:[#allocation2 + $0x7f0] sm:$0xff] }
 0x123   : > { %1589 = vmatmul.mubr.f32.gmra.mxu1 %v3157_v57  ;;  %1832 = vmatprep.subr.mxu1 %v362_v9  ;;  %v3364_v9 = vld [vmem:[#allocation2 + $0xbb0] sm:$0xff] }
 0x124   : > { %1965 = vmatprep.subr.mxu0 %v3343_v52  ;;  %1833 = vmatpush1.msra.mxu1 %v361_v13  ;;  %v594_v13 = vld [vmem:[#allocation2 + $0x7b8] sm:$0xff] }
 0x125   : > { %1966 = vmatpush1.msra.mxu0 %v3349_v45  ;;  %1834 = vmatprep.subr.mxu1 %v354_v62  ;;  %v3360_v49 = vpop.f32.mrf.mxu1 }
 0x126   : > { %1594 = vmatprep.mubr.f32.mxu1 %v3167_v30  ;;  %2526 = vmatprep.mubr.msk.f32.mxu0 %vm789_vm0, %v2940_v22  ;;  %v593_v30 = vld [vmem:[#allocation2 + $0x7b0] sm:$0xff]  ;;  %v3373_v22 = vld [vmem:[#allocation2 + $0xb78] sm:$0xff] }
 0x127   : > { %1835 = vmatpush1.msra.mxu1 %v353_v33  ;;  %1714 = vmatmul.mubr.f32.gmra.mxu0 %v2944_v27  ;;  %v3368_v62 = vpop.f32.mrf.mxu1  ;;  %v586_v33 = vld [vmem:[#allocation2 + $0x778] sm:$0xff]  ;;  %v585_v27 = vld [vmem:[#allocation2 + $0x770] sm:$0xff] }
 0x128   : > { %1595 = vmatmul.mubr.f32.gmra.mxu1 %v3174_v36  ;;  %1836 = vmatprep.subr.mxu1 %v602_v37  ;;  %v3379_v37 = vld [vmem:[#allocation2 + $0xb70] sm:$0xff]  ;;  %v3387_v36 = vld [vmem:[#allocation2 + $0xb38] sm:$0xff] }
 0x129   : > { %1967 = vmatprep.subr.mxu0 %v3358_v59  ;;  %1837 = vmatpush2.msra.mxu1 %v601_v15  ;;  %v578_v15 = vld [vmem:[#allocation2 + $0x738] sm:$0xff] }
 0x12a   : > { %1968 = vmatpush1.msra.mxu0 %v3364_v9  ;;  %1838 = vmatprep.subr.mxu1 %v594_v13  ;;  %v3375_v57 = vpop.f32.mrf.mxu1 }
 0x12b   : > { %1600 = vmatprep.mubr.f32.mxu1 %v3182_v20  ;;  %2527 = vmatprep.mubr.msk.f32.mxu0 %vm789_vm0, %v2949_v34  ;;  %v577_v20 = vld [vmem:[#allocation2 + $0x730] sm:$0xff] }
 0x12c   : > { %1839 = vmatpush2.msra.mxu1 %v593_v30  ;;  %1720 = vmatmul.mubr.f32.gmra.mxu0 %v2953_v39  ;;  %v3383_v13 = vpop.f32.mrf.mxu1  ;;  %v570_v30 = vld [vmem:[#allocation2 + $0x6f8] sm:$0xff]  ;;  %v569_v39 = vld [vmem:[#allocation2 + $0x6f0] sm:$0xff] }
 0x12d   : > { %1601 = vmatmul.mubr.f32.gmra.mxu1 %v3187_v28  ;;  %1840 = vmatprep.subr.mxu1 %v586_v33  ;;  %v749_v28 = vlaneseq  ;;  %v3394_v33 = vld [vmem:[#allocation2 + $0xb30] sm:$0xff] }
 0x12e   : > { %1969 = vmatprep.subr.mxu0 %v3373_v22  ;;  %1841 = vmatpush2.msra.mxu1 %v585_v27  ;;  %v562_v27 = vld [vmem:[#allocation2 + $0x6b8] sm:$0xff] }
 0x12f   : > { %1970 = vmatpush1.msra.mxu0 %v3379_v37  ;;  %1842 = vmatprep.subr.mxu1 %v578_v15  ;;  %v3390_v34 = vpop.f32.mrf.mxu1  ;;  %v561_v15 = vld [vmem:[#allocation2 + $0x6b0] sm:$0xff] }
 0x130   : > { %1606 = vmatprep.mubr.f32.mxu1 %v3192_v56  ;;  %2528 = vmatprep.mubr.msk.f32.mxu0 %vm789_vm0, %v2961_v47  ;;  %v3402_v56 = vld [vmem:[#allocation2 + $0xaf8] sm:$0xff] }
 0x131   : > { %1843 = vmatpush2.msra.mxu1 %v577_v20  ;;  %1971 = vmatprep.subr.mxu0 %v3387_v36  ;;  %v3398_v12 = vpop.f32.mrf.mxu1  ;;  %v3404_v20 = vshrl.u32 %v749_v28, 7  ;;  %v554_v47 = vld [vmem:[#allocation2 + $0x678] sm:$0xff] }
 0x132   : > { %1607 = vmatmul.mubr.f32.gmra.mxu1 %v3197_v10  ;;  %1726 = vmatmul.mubr.f32.gmra.mxu0 %v2968_v53  ;;  %v3411_v53 = vld [vmem:[#allocation2 + $0xaf0] sm:$0xff]  ;;  %v3415_v28 = vld [vmem:[#allocation2 + $0xab8] sm:$0xff]  ;;  %v3424_v10 = vld [vmem:[#allocation5] sm:$0xff] }
 0x133   : > { %1844 = vmatprep.subr.mxu1 %v570_v30  ;;  %1972 = vmatpush1.msra.mxu0 %v3394_v33  ;;  %4494 = vst [vmem:[#allocation27_spill] sm:$0xff] %v3404_v20  ;;  %v553_v30 = vld [vmem:[#allocation2 + $0x670] sm:$0xff]  ;;  %4496 = vst [vmem:[#allocation31_spill] sm:$0xff] %v3424_v10  ;;  %v755_v40 = vsub.s32 1, %v3404_v20 }
 0x134   : > { %1845 = vmatpush2.msra.mxu1 %v569_v39  ;;  %1612 = vmatprep.mubr.f32.mxu1 %v3205_v35  ;;  %v3407_v25 = vpop.f32.mrf.mxu1  ;;  %v546_v39 = vld [vmem:[#allocation2 + $0x638] sm:$0xff]  ;;  %v751_v35 = vsub.s32 0, %v3404_v20 }
 0x135   : > { %1846 = vmatprep.subr.mxu1 %v562_v27  ;;  %2529 = vmatprep.mubr.msk.f32.mxu0 %vm789_vm0, %v2973_v60  ;;  %v3422_v60 = vld [vmem:[#allocation2 + $0xab0] sm:$0xff]  ;;  %v530_v20 = vld [vmem:[#allocation2 + $0x5b8] sm:$0xff] }
 0x136   : > { %1847 = vmatpush2.msra.mxu1 %v561_v15  ;;  %1973 = vmatprep.subr.mxu0 %v3402_v56  ;;  %v3417_v27 = vpop.f32.mrf.mxu1  ;;  %v545_v15 = vld [vmem:[#allocation2 + $0x630] sm:$0xff]  ;;  %4495 = vst [vmem:[#allocation38_spill] sm:$0xff] %v3422_v60  ;;  %v3439_v58 = vrot.slane %v3424_v10, %v751_v35 }
 0x137   : > { %1613 = vmatmul.mubr.f32.gmra.mxu1 %v3213_v38  ;;  %1732 = vmatmul.mubr.f32.gmra.mxu0 %v2977_v1  ;;  %v537_v1 = vld [vmem:[#allocation2 + $0x5f0] sm:$0xff] }
 0x138   : > { %1848 = vmatprep.subr.mxu1 %v554_v47  ;;  %1974 = vmatpush1.msra.mxu0 %v3411_v53  ;;  %v538_v47 = vld [vmem:[#allocation2 + $0x5f8] sm:$0xff] }
 0x139   : > { %1849 = vmatpush2.msra.mxu1 %v553_v30  ;;  %1975 = vmatprep.subr.mxu0 %v3415_v28  ;;  %v3427_v38 = vpop.f32.mrf.mxu1  ;;  %v3433_v30 = vld [vmem:[#allocation2 + $0xa78] sm:$0xff] }
 0x13a   : > { %1850 = vmatprep.subr.mxu1 %v546_v39  ;;  %1618 = vmatprep.mubr.f32.mxu1 %v3217_v0  ;;  %4497 = vst [vmem:[#allocation42_spill] sm:$0xff] %v3433_v30  ;;  %v3448_v0 = vrot.slane %v3424_v10, %v755_v40  ;;  %v3463_v40 = vld [vmem:[#allocation2 + $0xa30] sm:$0xff] }
 0x13b   : > { %2530 = vmatprep.mubr.msk.f32.mxu0 %vm789_vm0, %v2982_v8  ;;  %1851 = vmatpush2.msra.mxu1 %v545_v15  ;;  %v3436_v39 = vpop.f32.mrf.mxu1  ;;  %v529_v8 = vld [vmem:[#allocation2 + $0x5b0] sm:$0xff] }
 0x13c   : > { %1976 = vmatpush1.msra.mxu0 %v3422_v60  ;;  %1619 = vmatmul.mubr.f32.gmra.mxu1 %v3223_v5  ;;  %v3445_v15 = vld [vmem:[#allocation2 + $0xa70] sm:$0xff] }
 0x13d   : > { %1738 = vmatmul.mubr.f32.gmra.mxu0 %v2986_v14  ;;  %1852 = vmatprep.subr.mxu1 %v538_v47  ;;  %4498 = vst [vmem:[#allocation62_spill] sm:$0xff] %v3445_v15  ;;  %v522_v14 = vld [vmem:[#allocation2 + $0x578] sm:$0xff] }
 0x13e   : > { %1977 = vmatprep.subr.mxu0 %v3433_v30  ;;  %1853 = vmatpush2.msra.mxu1 %v537_v1  ;;  %v904_v35 = vpop.f32.mrf.mxu0  ;;  %v3455_v47 = vld [vmem:[#allocation2 + $0xa38] sm:$0xff]  ;;  %v521_v1 = vld [vmem:[#allocation2 + $0x570] sm:$0xff] }
 0x13f   : > { %1624 = vmatprep.mubr.f32.mxu1 %v3228_v23  ;;  %v3451_v60 = vpop.f32.mrf.mxu1  ;;  %1854 = vmatprep.subr.mxu1 %v530_v20  ;;  %v905_v5 = vadd.f32 %v904_v35, %v3439_v58  ;;  %v514_v20 = vld [vmem:[#allocation2 + $0x538] sm:$0xff] }
 0x140   : > { %2531 = vmatprep.mubr.msk.f32.mxu0 %vm789_vm0, %v2994_v24  ;;  %1855 = vmatpush2.msra.mxu1 %v529_v8  ;;  %v906_v10 = vpop.f32.mrf.mxu0  ;;  %v513_v8 = vld [vmem:[#allocation2 + $0x530] sm:$0xff] }
 0x141   : > { %1978 = vmatpush1.msra.mxu0 %v3445_v15  ;;  %v3465_v23 = vpop.f32.mrf.mxu1  ;;  %1625 = vmatmul.mubr.f32.gmra.mxu1 %v3233_v21  ;;  %v1066_v24 = vadd.f32 %v3335_v18, %v905_v5  ;;  %v907_v30 = vadd.f32 %v906_v10, %v3448_v0  ;;  %v506_v5 = vld [vmem:[#allocation2 + $0x4f8] sm:$0xff]  ;;  %v505_v10 = vld [vmem:[#allocation2 + $0x4f0] sm:$0xff] }
 0x142   : > { %4499 = vst [vmem:[#allocation63_spill] sm:$0xff] %v3465_v23  ;;  %1744 = vmatmul.mubr.f32.gmra.mxu0 %v3001_v31  ;;  %1856 = vmatprep.subr.mxu1 %v522_v14  ;;  %v3477_v18 = vld [vmem:[#allocation2 + $0x9f8] sm:$0xff] }
 0x143   : > { %1979 = vmatprep.subr.mxu0 %v3455_v47  ;;  %1857 = vmatpush2.msra.mxu1 %v521_v1  ;;  %v2126_v35 = vmax.f32 %v1066_v24, 0.0  ;;  %v1068_v15 = vadd.f32 %v3340_v55, %v907_v30  ;;  %v910_v23 = vpop.f32.mrf.mxu0  ;;  %v3482_v1 = vld [vmem:[#allocation2 + $0x9f0] sm:$0xff] }
 0x144   : > { %1980 = vmatpush1.msra.mxu0 %v3463_v40  ;;  %v3474_v21 = vpop.f32.mrf.mxu1  ;;  %1858 = vmatprep.subr.mxu1 %v514_v20  ;;  %v911_v14 = vadd.f32 %v910_v23, %v3439_v58  ;;  %v498_v23 = vld [vmem:[#allocation2 + $0x4b8] sm:$0xff] }
 0x145   : > { %1630 = vmatprep.mubr.f32.mxu1 %v3238_v11  ;;  %2532 = vmatprep.mubr.msk.f32.mxu0 %vm789_vm0, %v3017_v46  ;;  %2254 = vst [vmem:[%s3485_s28] sm:$0xff] %v2126_v35  ;;  %v2127_v24 = vmax.f32 %v1068_v15, 0.0  ;;  %v912_v55 = vpop.f32.mrf.mxu0  ;;  %v497_v46 = vld [vmem:[#allocation2 + $0x4b0] sm:$0xff] }
 0x146   : > { %1859 = vmatpush2.msra.mxu1 %v513_v8  ;;  %v3488_v30 = vpop.f32.mrf.mxu1  ;;  %1750 = vmatmul.mubr.f32.gmra.mxu0 %v3022_v51  ;;  %v1072_v20 = vadd.f32 %v3345_v7, %v911_v14  ;;  %v913_v8 = vadd.f32 %v912_v55, %v3448_v0  ;;  %v490_v7 = vld [vmem:[#allocation2 + $0x478] sm:$0xff] }
 0x147   : > { %1631 = vmatmul.mubr.f32.gmra.mxu1 %v3243_v44  ;;  %1860 = vmatprep.subr.mxu1 %v506_v5  ;;  %2255 = vst [vmem:[%s3485_s28 + $0x8] sm:$0xff] %v2127_v24  ;;  %v3501_v14 = vld [vmem:[#allocation2 + $0x9b8] sm:$0xff]  ;;  %v3506_v24 = vld [vmem:[#allocation2 + $0x9b0] sm:$0xff] }
 0x148   : > { %1981 = vmatprep.subr.mxu0 %v3477_v18  ;;  %1861 = vmatpush2.msra.mxu1 %v505_v10  ;;  %v2134_v15 = vmax.f32 %v1072_v20, 0.0  ;;  %v1074_v35 = vadd.f32 %v3353_v32, %v913_v8  ;;  %v916_v44 = vpop.f32.mrf.mxu0  ;;  %v489_v10 = vld [vmem:[#allocation2 + $0x470] sm:$0xff] }
 0x149   : > { %1982 = vmatpush1.msra.mxu0 %v3482_v1  ;;  %v3498_v11 = vpop.f32.mrf.mxu1  ;;  %1862 = vmatprep.subr.mxu1 %v498_v23  ;;  %v917_v5 = vadd.f32 %v916_v44, %v3439_v58  ;;  %v482_v23 = vld [vmem:[#allocation2 + $0x438] sm:$0xff] }
 0x14a   : > { %1636 = vmatprep.mubr.f32.mxu1 %v3248_v29  ;;  %2533 = vmatprep.mubr.msk.f32.mxu0 %vm789_vm0, %v3034_v63  ;;  %2262 = vst [vmem:[%s3485_s28 + $0x40] sm:$0xff] %v2134_v15  ;;  %v2135_v32 = vmax.f32 %v1074_v35, 0.0  ;;  %v918_v55 = vpop.f32.mrf.mxu0 }
 0x14b   : > { %1863 = vmatpush2.msra.mxu1 %v497_v46  ;;  %v3509_v20 = vpop.f32.mrf.mxu1  ;;  %1756 = vmatmul.mubr.f32.gmra.mxu0 %v3039_v4  ;;  %v1078_v44 = vadd.f32 %v3360_v49, %v917_v5  ;;  %v919_v8 = vadd.f32 %v918_v55, %v3448_v0  ;;  %v481_v46 = vld [vmem:[#allocation2 + $0x430] sm:$0xff]  ;;  %v3521_v49 = vld [vmem:[#allocation2 + $0x978] sm:$0xff] }
 0x14c   : > { %1637 = vmatmul.mubr.f32.gmra.mxu1 %v3252_v17  ;;  %1864 = vmatprep.subr.mxu1 %v490_v7  ;;  %2263 = vst [vmem:[%s3485_s28 + $0x48] sm:$0xff] %v2135_v32  ;;  %v3532_v55 = vld [vmem:[#allocation2 + $0x938] sm:$0xff] }
 0x14d   : > { %1983 = vmatprep.subr.mxu0 %v3501_v14  ;;  %1865 = vmatpush2.msra.mxu1 %v489_v10  ;;  %v2142_v15 = vmax.f32 %v1078_v44, 0.0  ;;  %v1080_v35 = vadd.f32 %v3368_v62, %v919_v8  ;;  %v3527_v10 = vld [vmem:[#allocation2 + $0x970] sm:$0xff] }
 0x14e   : > { %1984 = vmatpush1.msra.mxu0 %v3506_v24  ;;  %v922_v17 = vpop.f32.mrf.mxu0  ;;  %1866 = vmatprep.subr.mxu1 %v482_v23  ;;  %v3524_v5 = vpop.f32.mrf.mxu1 }
 0x14f   : > { %2534 = vmatprep.mubr.msk.f32.mxu0 %vm789_vm0, %v3051_v19  ;;  %v923_v7 = vadd.f32 %v922_v17, %v3439_v58  ;;  %1867 = vmatpush2.msra.mxu1 %v481_v46  ;;  %2270 = vst [vmem:[%s3485_s28 + $0x80] sm:$0xff] %v2142_v15  ;;  %v2143_v32 = vmax.f32 %v1080_v35, 0.0 }
 0x150   : > { %1868 = vmatprep.mubr.f32.mxu1 %v3011_v43  ;;  %v924_v62 = vpop.f32.mrf.mxu0  ;;  %1762 = vmatmul.mubr.f32.gmra.mxu0 %v3056_v26  ;;  %v3536_v44 = vpop.f32.mrf.mxu1  ;;  %v3544_v43 = vld [vmem:[#allocation2 + $0x930] sm:$0xff] }
 0x151   : > { %1869 = vmatmul.mubr.f32.vlgmr.msra.gmra.mxu1 %v3020_v50  ;;  %v1084_v23 = vadd.f32 %v3375_v57, %v923_v7  ;;  %v925_v17 = vadd.f32 %v924_v62, %v3448_v0  ;;  %1985 = vmatprep.subr.mxu0 %v3521_v49  ;;  %2271 = vst [vmem:[%s3485_s28 + $0x88] sm:$0xff] %v2143_v32  ;;  %v3566_v62 = vld [vmem:[#allocation2 + $0x8f0] sm:$0xff] }
 0x152   : > { %2535 = vmatprep.mubr.msk.f32.mxu0 %vm789_vm0, %v3074_v41  ;;  %1986 = vmatpush1.msra.mxu0 %v3527_v10 }
 0x153   : > { %1874 = vmatprep.mubr.f32.mxu1 %v3030_v61  ;;  %v2150_v50 = vmax.f32 %v1084_v23, 0.0  ;;  %v1086_v57 = vadd.f32 %v3383_v13, %v925_v17  ;;  %v928_v8 = vpop.f32.mrf.mxu0  ;;  %2566 = vmatprep.subr.mxu1 %v3343_v52  ;;  %v3550_v15 = vpop.f32.mrf.mxu1  ;;  %v3554_v61 = vld [vmem:[#allocation2 + $0x8f8] sm:$0xff]  ;;  %v4501_v23 = vld [vmem:[#allocation32_spill] sm:$0xff]  ;;  %v4502_v17 = vld [vmem:[#allocation26_spill] sm:$0xff] }
 0x154   : > { %1987 = vmatprep.subr.mxu0 %v3532_v55  ;;  %v929_v46 = vadd.f32 %v928_v8, %v3439_v58  ;;  %1768 = vmatmul.mubr.f32.gmra.mxu0 %v3080_v54 }
 0x155   : > { %1875 = vmatmul.mubr.f32.gmra.mxu1 %v3037_v3  ;;  %2278 = vst [vmem:[%s3485_s28 + $0xc0] sm:$0xff] %v2150_v50  ;;  %v2151_v35 = vmax.f32 %v1086_v57, 0.0  ;;  %v930_v7 = vpop.f32.mrf.mxu0  ;;  %1988 = vmatpush1.msra.mxu0 %v3544_v43  ;;  %v3561_v32 = vpop.f32.mrf.mxu1  ;;  %v4500_v3 = vld [vmem:[#allocation25_spill] sm:$0xff] }
 0x156   : > { %2584 = vmatpush1.msra.mxu1 %v3349_v45  ;;  %v1090_v52 = vadd.f32 %v3390_v34, %v929_v46  ;;  %v931_v13 = vadd.f32 %v930_v7, %v3448_v0  ;;  %2536 = vmatprep.mubr.msk.f32.mxu0 %vm789_vm0, %v3093_v2  ;;  %v3574_v50 = vld [vmem:[#allocation2 + $0x8b8] sm:$0xff] }
 0x157   : > { %1880 = vmatprep.mubr.f32.mxu1 %v4500_v3  ;;  %2279 = vst [vmem:[%s3485_s28 + $0xc8] sm:$0xff] %v2151_v35  ;;  %1989 = vmatprep.subr.mxu0 %v3554_v61  ;;  %v4503_v35 = vld [vmem:[#allocation34_spill] sm:$0xff] }
 0x158   : > { %2567 = vmatprep.subr.mxu1 %v3358_v59  ;;  %v2158_v45 = vmax.f32 %v1090_v52, 0.0  ;;  %v1092_v34 = vadd.f32 %v3398_v12, %v931_v13  ;;  %1774 = vmatmul.mubr.f32.gmra.mxu0 %v4501_v23  ;;  %v3576_v8 = vpop.f32.mrf.mxu1  ;;  %v3585_v12 = vld [vmem:[#allocation2 + $0x8b0] sm:$0xff]  ;;  %v3591_v13 = vld [vmem:[#allocation2 + $0x878] sm:$0xff] }
 0x159   : > { %1881 = vmatmul.mubr.f32.gmra.mxu1 %v4502_v17  ;;  %v934_v57 = vpop.f32.mrf.mxu0  ;;  %1990 = vmatpush1.msra.mxu0 %v3566_v62  ;;  %v4515_v23 = vld [vmem:[#allocation48_spill] sm:$0xff] }
 0x15a   : > { %2585 = vmatpush1.msra.mxu1 %v3364_v9  ;;  %2286 = vst [vmem:[%s3485_s28 + $0x100] sm:$0xff] %v2158_v45  ;;  %v2159_v46 = vmax.f32 %v1092_v34, 0.0  ;;  %v935_v59 = vadd.f32 %v934_v57, %v3439_v58  ;;  %2537 = vmatprep.mubr.msk.f32.mxu0 %vm789_vm0, %v4503_v35  ;;  %v3587_v52 = vpop.f32.mrf.mxu1  ;;  %v4504_v45 = vld [vmem:[#allocation36_spill] sm:$0xff] }
 0x15b   : > { %1886 = vmatprep.mubr.f32.mxu1 %v4485_v42  ;;  %v936_v7 = vpop.f32.mrf.mxu0  ;;  %1991 = vmatprep.subr.mxu0 %v3574_v50  ;;  %v4505_v42 = vld [vmem:[#allocation28_spill] sm:$0xff] }
 0x15c   : > { %2568 = vmatprep.subr.mxu1 %v3373_v22  ;;  %2287 = vst [vmem:[%s3485_s28 + $0x108] sm:$0xff] %v2159_v46  ;;  %v1096_v9 = vadd.f32 %v3407_v25, %v935_v59  ;;  %v937_v3 = vadd.f32 %v936_v7, %v3448_v0  ;;  %1780 = vmatmul.mubr.f32.gmra.mxu0 %v4504_v45  ;;  %v3600_v34 = vld [vmem:[#allocation2 + $0x870] sm:$0xff]  ;;  %v4506_v59 = vld [vmem:[#allocation29_spill] sm:$0xff] }
 0x15d   : > { %1887 = vmatmul.mubr.f32.gmra.mxu1 %v4505_v42  ;;  %1992 = vmatpush1.msra.mxu0 %v3585_v12  ;;  %v3603_v46 = vpop.f32.mrf.mxu1  ;;  %v4510_v45 = vld [vmem:[#allocation44_spill] sm:$0xff] }
 0x15e   : > { %2586 = vmatpush1.msra.mxu1 %v3379_v37  ;;  %v2166_v17 = vmax.f32 %v1096_v9, 0.0  ;;  %v1098_v22 = vadd.f32 %v3417_v27, %v937_v3  ;;  %v940_v57 = vpop.f32.mrf.mxu0  ;;  %1993 = vmatprep.subr.mxu0 %v3591_v13  ;;  %v3611_v37 = vld [vmem:[#allocation2 + $0x838] sm:$0xff] }
 0x15f   : > { %2538 = vmatprep.mubr.msk.f32.mxu0 %vm789_vm0, %v4487_v6  ;;  %v941_v25 = vadd.f32 %v940_v57, %v3439_v58  ;;  %1892 = vmatprep.mubr.f32.mxu1 %v4506_v59  ;;  %v3614_v9 = vpop.f32.mrf.mxu1  ;;  %v4507_v57 = vld [vmem:[#allocation40_spill] sm:$0xff] }
 0x160   : > { %2569 = vmatprep.subr.mxu1 %v3387_v36  ;;  %2294 = vst [vmem:[%s3485_s28 + $0x140] sm:$0xff] %v2166_v17  ;;  %v2167_v7 = vmax.f32 %v1098_v22, 0.0  ;;  %v942_v27 = vpop.f32.mrf.mxu0  ;;  %1994 = vmatpush1.msra.mxu0 %v3600_v34  ;;  %v3622_v36 = vld [vmem:[#allocation2 + $0x830] sm:$0xff] }
 0x161   : > { %1893 = vmatmul.mubr.f32.gmra.mxu1 %v4489_v16  ;;  %v1102_v3 = vadd.f32 %v3427_v38, %v941_v25  ;;  %v943_v42 = vadd.f32 %v942_v27, %v3448_v0  ;;  %1786 = vmatmul.mubr.f32.gmra.mxu0 %v4507_v57  ;;  %v4508_v25 = vld [vmem:[#allocation33_spill] sm:$0xff]  ;;  %v3638_v27 = vld [vmem:[#allocation2 + $0xc70] sm:$0xff] }
 0x162   : > { %2587 = vmatpush1.msra.mxu1 %v3394_v33  ;;  %2295 = vst [vmem:[%s3485_s28 + $0x148] sm:$0xff] %v2167_v7  ;;  %1995 = vmatprep.subr.mxu0 %v3611_v37  ;;  %v946_v22 = vpop.f32.mrf.mxu0  ;;  %v3633_v33 = vld [vmem:[#allocation2 + $0xc78] sm:$0xff]  ;;  %v4509_v7 = vld [vmem:[#allocation35_spill] sm:$0xff] }
 0x163   : > { %2539 = vmatprep.mubr.msk.f32.mxu0 %vm789_vm0, %v4490_v48  ;;  %v2174_v17 = vmax.f32 %v1102_v3, 0.0  ;;  %v1104_v16 = vadd.f32 %v3436_v39, %v943_v42  ;;  %v3629_v38 = vpop.f32.mrf.mxu1  ;;  %1898 = vmatprep.mubr.f32.mxu1 %v4508_v25  ;;  %v947_v59 = vadd.f32 %v946_v22, %v3439_v58 }
 0x164   : > { %2570 = vmatprep.subr.mxu1 %v3402_v56  ;;  %1996 = vmatpush1.msra.mxu0 %v3622_v36  ;;  %v948_v3 = vpop.f32.mrf.mxu0 }
 0x165   : > { %1899 = vmatmul.mubr.f32.gmra.mxu1 %v4509_v7  ;;  %2302 = vst [vmem:[%s3485_s28 + $0x180] sm:$0xff] %v2174_v17  ;;  %v2175_v39 = vmax.f32 %v1104_v16, 0.0  ;;  %v3641_v42 = vpop.f32.mrf.mxu1  ;;  %1792 = vmatmul.mubr.f32.gmra.mxu0 %v4510_v45  ;;  %v1108_v56 = vadd.f32 %v3451_v60, %v947_v59  ;;  %v949_v25 = vadd.f32 %v948_v3, %v3448_v0  ;;  %v4511_v17 = vld [vmem:[#allocation46_spill] sm:$0xff]  ;;  %v3653_v16 = vld [vmem:[#allocation2 + $0xc38] sm:$0xff]  ;;  %v4512_v7 = vld [vmem:[#allocation63_spill] sm:$0xff] }
 0x166   : > { %2588 = vmatpush1.msra.mxu1 %v3411_v53  ;;  %2025 = vmatprep.subr.mxu0 %v3633_v33  ;;  %v4513_v59 = vld [vmem:[#allocation37_spill] sm:$0xff]  ;;  %v4514_v3 = vld [vmem:[#allocation38_spill] sm:$0xff] }
 0x167   : > { %2571 = vmatprep.subr.mxu1 %v3415_v28  ;;  %2303 = vst [vmem:[%s3485_s28 + $0x188] sm:$0xff] %v2175_v39  ;;  %2026 = vmatpush2.msra.mxu0 %v3638_v27  ;;  %v2182_v22 = vmax.f32 %v1108_v56, 0.0  ;;  %v1110_v53 = vadd.f32 %v4512_v7, %v949_v25  ;;  %v952_v35 = vpop.f32.mrf.mxu0  ;;  %v3660_v28 = vld [vmem:[#allocation2 + $0xc30] sm:$0xff]  ;;  %v4517_v7 = vld [vmem:[#allocation42_spill] sm:$0xff] }
 0x168   : > { %2540 = vmatprep.mubr.msk.f32.mxu0 %vm789_vm0, %v4511_v17  ;;  %v3656_v60 = vpop.f32.mrf.mxu1  ;;  %1904 = vmatprep.mubr.f32.mxu1 %v4513_v59  ;;  %v953_v39 = vadd.f32 %v952_v35, %v3439_v58  ;;  %v4516_v17 = vld [vmem:[#allocation39_spill] sm:$0xff]  ;;  %v4518_v35 = vld [vmem:[#allocation41_spill] sm:$0xff] }
 0x169   : > { %2589 = vmatpush1.msra.mxu1 %v4514_v3  ;;  %1798 = vmatmul.mubr.f32.gmra.mxu0 %v4515_v23  ;;  %2310 = vst [vmem:[%s3485_s28 + $0x1c0] sm:$0xff] %v2182_v22  ;;  %v2183_v56 = vmax.f32 %v1110_v53, 0.0  ;;  %v954_v2 = vpop.f32.mrf.mxu0  ;;  %v4520_v22 = vld [vmem:[#allocation11_spill] sm:$0xff] }
 0x16a   : > { %1905 = vmatmul.mubr.f32.gmra.mxu1 %v4516_v17  ;;  %v3666_v25 = vpop.f32.mrf.mxu1  ;;  %2027 = vmatprep.subr.mxu0 %v3653_v16  ;;  %v1114_v59 = vadd.f32 %v3474_v21, %v953_v39  ;;  %v955_v3 = vadd.f32 %v954_v2, %v3448_v0  ;;  %v4519_v17 = vld [vmem:[#allocation62_spill] sm:$0xff]  ;;  %v4521_v21 = vld [vmem:[#allocation43_spill] sm:$0xff]  ;;  %v4522_v2 = vld [vmem:[#allocation12_spill] sm:$0xff] }
 0x16b   : > { %2572 = vmatprep.subr.mxu1 %v4517_v7  ;;  %2028 = vmatpush2.msra.mxu0 %v3660_v28  ;;  %2311 = vst [vmem:[%s3485_s28 + $0x1c8] sm:$0xff] %v2183_v56  ;;  %v4523_v56 = vld [vmem:[#allocation45_spill] sm:$0xff] }
 0x16c   : > { %1910 = vmatprep.mubr.f32.mxu1 %v4518_v35  ;;  %2590 = vmatpush1.msra.mxu1 %v4519_v17  ;;  %v2190_v53 = vmax.f32 %v1114_v59, 0.0  ;;  %v1116_v23 = vadd.f32 %v3488_v30, %v955_v3  ;;  %v958_v45 = vpop.f32.mrf.mxu0  ;;  %v4524_v30 = vld [vmem:[#allocation13_spill] sm:$0xff] }
 0x16d   : > { %2541 = vmatprep.mubr.msk.f32.mxu0 %vm789_vm0, %v4520_v22  ;;  %v3679_v7 = vpop.f32.mrf.mxu1  ;;  %v959_v39 = vadd.f32 %v958_v45, %v3439_v58  ;;  %2573 = vmatprep.subr.mxu1 %v3455_v47  ;;  %v4525_v47 = vld [vmem:[#allocation47_spill] sm:$0xff]  ;;  %v4526_v45 = vld [vmem:[#allocation14_spill] sm:$0xff] }
 0x16e   : > { %1911 = vmatmul.mubr.f32.gmra.mxu1 %v4521_v21  ;;  %2030 = vmatmul.mubr.f32.vlgmr.msra.gmra.mxu0 %v4522_v2  ;;  %2318 = vst [vmem:[%s3485_s28 + $0x200] sm:$0xff] %v2190_v53  ;;  %v2191_v35 = vmax.f32 %v1116_v23, 0.0  ;;  %v960_v17 = vpop.f32.mrf.mxu0  ;;  %v4527_v2 = vld [vmem:[#allocation49_spill] sm:$0xff] }
 0x16f   : > { %1916 = vmatprep.mubr.f32.mxu1 %v4523_v56  ;;  %v3687_v59 = vpop.f32.mrf.mxu1  ;;  %2591 = vmatpush1.msra.mxu1 %v3463_v40  ;;  %v1120_v3 = vadd.f32 %v3498_v11, %v959_v39  ;;  %v961_v22 = vadd.f32 %v960_v17, %v3448_v0  ;;  %v4528_v39 = vld [vmem:[#allocation15_spill] sm:$0xff]  ;;  %v4529_v17 = vld [vmem:[#allocation50_spill] sm:$0xff] }
 0x170   : > { %2542 = vmatprep.mubr.msk.f32.mxu0 %vm789_vm0, %v4524_v30  ;;  %2574 = vmatprep.subr.mxu1 %v3477_v18  ;;  %2319 = vst [vmem:[%s3485_s28 + $0x208] sm:$0xff] %v2191_v35  ;;  %v4530_v30 = vld [vmem:[#allocation16_spill] sm:$0xff] }
 0x171   : > { %v2198_v23 = vmax.f32 %v1120_v3, 0.0  ;;  %v1122_v53 = vadd.f32 %v3509_v20, %v961_v22  ;;  %v964_v21 = vpop.f32.mrf.mxu0  ;;  %2592 = vmatpush1.msra.mxu1 %v3482_v1  ;;  %v4531_v3 = vld [vmem:[#allocation51_spill] sm:$0xff] }
 0x172   : > { %1917 = vmatmul.mubr.f32.gmra.mxu1 %v4525_v47  ;;  %2036 = vmatmul.mubr.f32.gmra.mxu0 %v4526_v45  ;;  %v3699_v40 = vpop.f32.mrf.mxu1  ;;  %v965_v11 = vadd.f32 %v964_v21, %v3439_v58  ;;  %v4533_v21 = vld [vmem:[#allocation52_spill] sm:$0xff] }
 0x173   : > { %1922 = vmatprep.mubr.f32.mxu1 %v4527_v2  ;;  %2543 = vmatprep.mubr.msk.f32.mxu0 %vm789_vm0, %v4528_v39  ;;  %2326 = vst [vmem:[%s3485_s28 + $0x240] sm:$0xff] %v2198_v23  ;;  %v2199_v18 = vmax.f32 %v1122_v53, 0.0  ;;  %v966_v56 = vpop.f32.mrf.mxu0  ;;  %v4534_v2 = vld [vmem:[#allocation18_spill] sm:$0xff] }
 0x174   : > { %2575 = vmatprep.subr.mxu1 %v3501_v14  ;;  %v3708_v35 = vpop.f32.mrf.mxu1  ;;  %v1126_v20 = vadd.f32 %v3524_v5, %v965_v11  ;;  %v967_v1 = vadd.f32 %v966_v56, %v3448_v0  ;;  %v4532_v14 = vld [vmem:[#allocation17_spill] sm:$0xff] }
 0x175   : > { %2593 = vmatpush1.msra.mxu1 %v3506_v24  ;;  %2327 = vst [vmem:[%s3485_s28 + $0x248] sm:$0xff] %v2199_v18  ;;  %v4536_v18 = vld [vmem:[#allocation19_spill] sm:$0xff] }
 0x176   : > { %1923 = vmatmul.mubr.f32.gmra.mxu1 %v4529_v17  ;;  %2042 = vmatmul.mubr.f32.gmra.mxu0 %v4530_v30  ;;  %v2206_v22 = vmax.f32 %v1126_v20, 0.0  ;;  %v1128_v47 = vadd.f32 %v3536_v44, %v967_v1  ;;  %v4537_v17 = vld [vmem:[#allocation54_spill] sm:$0xff]  ;;  %v4538_v30 = vld [vmem:[#allocation20_spill] sm:$0xff] }
 0x177   : > { %1928 = vmatprep.mubr.f32.mxu1 %v4531_v3  ;;  %2544 = vmatprep.mubr.msk.f32.mxu0 %vm789_vm0, %v4532_v14  ;;  %v970_v45 = vpop.f32.mrf.mxu0  ;;  %v3722_v5 = vpop.f32.mrf.mxu1 }
 0x178   : > { %2576 = vmatprep.subr.mxu1 %v3521_v49  ;;  %v971_v24 = vadd.f32 %v970_v45, %v3439_v58  ;;  %2334 = vst [vmem:[%s3485_s28 + $0x280] sm:$0xff] %v2206_v22  ;;  %v2207_v23 = vmax.f32 %v1128_v47, 0.0  ;;  %v4535_v49 = vld [vmem:[#allocation53_spill] sm:$0xff]  ;;  %v4539_v22 = vld [vmem:[#allocation55_spill] sm:$0xff] }
 0x179   : > { %2594 = vmatpush1.msra.mxu1 %v3527_v10  ;;  %v972_v53 = vpop.f32.mrf.mxu0  ;;  %v3730_v39 = vpop.f32.mrf.mxu1  ;;  %v4540_v47 = vld [vmem:[#allocation21_spill] sm:$0xff] }
 0x17a   : > { %1929 = vmatmul.mubr.f32.gmra.mxu1 %v4533_v21  ;;  %2048 = vmatmul.mubr.f32.gmra.mxu0 %v4534_v2  ;;  %v1132_v44 = vadd.f32 %v3550_v15, %v971_v24  ;;  %v973_v11 = vadd.f32 %v972_v53, %v3448_v0  ;;  %2335 = vst [vmem:[%s3485_s28 + $0x288] sm:$0xff] %v2207_v23  ;;  %v4542_v23 = vld [vmem:[#allocation22_spill] sm:$0xff]  ;;  %v4543_v21 = vld [vmem:[#allocation57_spill] sm:$0xff]  ;;  %v4544_v2 = vld [vmem:[#allocation23_spill] sm:$0xff] }
 0x17b   : > { %1934 = vmatprep.mubr.f32.mxu1 %v4535_v49  ;;  %2545 = vmatprep.mubr.msk.f32.mxu0 %vm789_vm0, %v4536_v18  ;;  %v4545_v18 = vld [vmem:[#allocation58_spill] sm:$0xff] }
 0x17c   : > { %2577 = vmatprep.subr.mxu1 %v3532_v55  ;;  %v2214_v10 = vmax.f32 %v1132_v44, 0.0  ;;  %v1134_v56 = vadd.f32 %v3561_v32, %v973_v11  ;;  %v976_v20 = vpop.f32.mrf.mxu0  ;;  %v3740_v1 = vpop.f32.mrf.mxu1 }
 0x17d   : > { %2595 = vmatpush1.msra.mxu1 %v3544_v43  ;;  %v977_v15 = vadd.f32 %v976_v20, %v3439_v58 }
 0x17e   : > { %1935 = vmatmul.mubr.f32.gmra.mxu1 %v4537_v17  ;;  %2054 = vmatmul.mubr.f32.gmra.mxu0 %v4538_v30  ;;  %2342 = vst [vmem:[%s3485_s28 + $0x2c0] sm:$0xff] %v2214_v10  ;;  %v2215_v3 = vmax.f32 %v1134_v56, 0.0  ;;  %v978_v14 = vpop.f32.mrf.mxu0  ;;  %v3749_v32 = vpop.f32.mrf.mxu1  ;;  %v4546_v10 = vld [vmem:[#allocation59_spill] sm:$0xff] }
 0x17f   : > { %1940 = vmatprep.mubr.f32.mxu1 %v4539_v22  ;;  %2578 = vmatprep.subr.mxu1 %v3554_v61  ;;  %v1138_v55 = vadd.f32 %v3576_v8, %v977_v15  ;;  %v979_v43 = vadd.f32 %v978_v14, %v3448_v0  ;;  %v4541_v61 = vld [vmem:[#allocation56_spill] sm:$0xff] }
 0x180   : > { %2546 = vmatprep.mubr.msk.f32.mxu0 %vm789_vm0, %v4540_v47  ;;  %2596 = vmatpush1.msra.mxu1 %v3566_v62  ;;  %2343 = vst [vmem:[%s3485_s28 + $0x2c8] sm:$0xff] %v2215_v3 }
 0x181   : > { %2579 = vmatprep.subr.mxu1 %v3574_v50  ;;  %v2222_v45 = vmax.f32 %v1138_v55, 0.0  ;;  %v1140_v24 = vadd.f32 %v3587_v52, %v979_v43  ;;  %v982_v8 = vpop.f32.mrf.mxu0 }
 0x182   : > { %1941 = vmatmul.mubr.f32.gmra.mxu1 %v4541_v61  ;;  %2060 = vmatmul.mubr.f32.gmra.mxu0 %v4542_v23  ;;  %v3759_v53 = vpop.f32.mrf.mxu1  ;;  %v983_v50 = vadd.f32 %v982_v8, %v3439_v58 }
 0x183   : > { %1946 = vmatprep.mubr.f32.mxu1 %v4543_v21  ;;  %2547 = vmatprep.mubr.msk.f32.mxu0 %vm789_vm0, %v4544_v2  ;;  %2350 = vst [vmem:[%s3485_s28 + $0x300] sm:$0xff] %v2222_v45  ;;  %v2223_v62 = vmax.f32 %v1140_v24, 0.0  ;;  %v984_v44 = vpop.f32.mrf.mxu0  ;;  %v4553_v2 = vld [vmem:[#allocation30_spill] sm:$0xff] }
 0x184   : > { %2597 = vmatpush1.msra.mxu1 %v3585_v12  ;;  %v3767_v52 = vpop.f32.mrf.mxu1  ;;  %v1144_v11 = vadd.f32 %v3603_v46, %v983_v50  ;;  %v985_v49 = vadd.f32 %v984_v44, %v3448_v0  ;;  %v4548_v46 = vld [vmem:[#allocation27_spill] sm:$0xff] }
 0x185   : > { %2580 = vmatprep.subr.mxu1 %v3591_v13  ;;  %2351 = vst [vmem:[%s3485_s28 + $0x308] sm:$0xff] %v2223_v62  ;;  %v4547_v13 = vld [vmem:[#allocation24_spill] sm:$0xff]  ;;  %v759_v17 = vsub.s32 2, %v4548_v46  ;;  %v763_v14 = vsub.s32 3, %v4548_v46  ;;  %v4554_v62 = vld [vmem:[#allocation46_spill] sm:$0xff] }
 0x186   : > { %1947 = vmatmul.mubr.f32.gmra.mxu1 %v4545_v18  ;;  %2066 = vmatmul.mubr.f32.gmra.mxu0 %v3001_v31  ;;  %v2230_v12 = vmax.f32 %v1144_v11, 0.0  ;;  %v1146_v56 = vadd.f32 %v3614_v9, %v985_v49  ;;  %v988_v20 = vpop.f32.mrf.mxu0  ;;  %v4549_v9 = vld [vmem:[#allocation60_spill] sm:$0xff] }
 0x187   : > { %1952 = vmatprep.mubr.f32.mxu1 %v4546_v10  ;;  %2598 = vmatpush1.msra.mxu1 %v3600_v34  ;;  %v3778_v15 = vpop.f32.mrf.mxu1  ;;  %v989_v31 = vadd.f32 %v988_v20, %v3439_v58  ;;  %v4555_v18 = vld [vmem:[#allocation32_spill] sm:$0xff]  ;;  %v4557_v10 = vld [vmem:[#allocation34_spill] sm:$0xff] }
 0x188   : > { %2548 = vmatprep.mubr.msk.f32.mxu0 %vm789_vm0, %v4547_v13  ;;  %2581 = vmatprep.subr.mxu1 %v3611_v37  ;;  %2358 = vst [vmem:[%s3485_s28 + $0x340] sm:$0xff] %v2230_v12  ;;  %v2231_v34 = vmax.f32 %v1146_v56, 0.0  ;;  %v990_v30 = vpop.f32.mrf.mxu0 }
 0x189   : > { %2599 = vmatpush1.msra.mxu1 %v3622_v36  ;;  %v3787_v3 = vpop.f32.mrf.mxu1  ;;  %v1150_v22 = vadd.f32 %v3629_v38, %v989_v31  ;;  %v991_v37 = vadd.f32 %v990_v30, %v3448_v0  ;;  %v4550_v36 = vld [vmem:[#allocation31_spill] sm:$0xff]  ;;  %v4551_v38 = vld [vmem:[#allocation61_spill] sm:$0xff] }
 0x18a   : > { %1953 = vmatmul.mubr.f32.gmra.mxu1 %v4549_v9  ;;  %2072 = vmatmul.mubr.f32.gmra.mxu0 %v3022_v51  ;;  %2359 = vst [vmem:[%s3485_s28 + $0x348] sm:$0xff] %v2231_v34  ;;  %v3800_v55 = vrot.slane %v4550_v36, %v759_v17  ;;  %v4558_v34 = vld [vmem:[#allocation36_spill] sm:$0xff] }
 0x18b   : > { %1958 = vmatprep.mubr.f32.mxu1 %v3248_v29  ;;  %2549 = vmatprep.mubr.msk.f32.mxu0 %vm789_vm0, %v3034_v63  ;;  %v2238_v43 = vmax.f32 %v1150_v22, 0.0  ;;  %v1152_v51 = vadd.f32 %v3641_v42, %v991_v37  ;;  %v994_v47 = vpop.f32.mrf.mxu0  ;;  %v3810_v63 = vrot.slane %v4550_v36, %v763_v14 }
 0x18c   : > { %2582 = vmatprep.subr.mxu1 %v3633_v33  ;;  %v3803_v45 = vpop.f32.mrf.mxu1  ;;  %v995_v29 = vadd.f32 %v994_v47, %v3439_v58  ;;  %v1239_v49 = vadd.f32 %v3722_v5, %v3800_v55  ;;  %v1245_v14 = vadd.f32 %v3740_v1, %v3800_v55  ;;  %v1251_v1 = vadd.f32 %v3759_v53, %v3800_v55 }
 0x18d   : > { %2600 = vmatpush2.msra.mxu1 %v3638_v27  ;;  %2366 = vst [vmem:[%s3485_s28 + $0x380] sm:$0xff] %v2238_v43  ;;  %v2239_v33 = vmax.f32 %v1152_v51, 0.0  ;;  %v996_v24 = vpop.f32.mrf.mxu0  ;;  %v1235_v21 = vadd.f32 %v3708_v35, %v3810_v63  ;;  %v4556_v35 = vld [vmem:[#allocation48_spill] sm:$0xff]  ;;  %v1241_v13 = vadd.f32 %v3730_v39, %v3810_v63  ;;  %v1247_v39 = vadd.f32 %v3749_v32, %v3810_v63 }
 0x18e   : > { %1959 = vmatmul.mubr.f32.gmra.mxu1 %v4551_v38  ;;  %2078 = vmatmul.mubr.f32.gmra.mxu0 %v3039_v4  ;;  %v3813_v61 = vpop.f32.mrf.mxu1  ;;  %v1156_v27 = vadd.f32 %v3656_v60, %v995_v29  ;;  %v997_v58 = vadd.f32 %v996_v24, %v3448_v0  ;;  %v1227_v4 = vadd.f32 %v3679_v7, %v3800_v55 }
 0x18f   : > { %2583 = vmatprep.subr.mxu1 %v3653_v16  ;;  %2550 = vmatprep.mubr.msk.f32.mxu0 %vm789_vm0, %v3051_v19  ;;  %2367 = vst [vmem:[%s3485_s28 + $0x388] sm:$0xff] %v2239_v33  ;;  %v1229_v0 = vadd.f32 %v3687_v59, %v3810_v63  ;;  %v4552_v59 = vld [vmem:[#allocation44_spill] sm:$0xff]  ;;  %v1253_v32 = vadd.f32 %v3767_v52, %v3810_v63 }
 0x190   : > { %2601 = vmatpush2.msra.mxu1 %v3660_v28  ;;  %2554 = vmatprep.mubr.msk.f32.mxu1 %vm789_vm0, %v4487_v6  ;;  %v2246_v42 = vmax.f32 %v1156_v27, 0.0  ;;  %v1158_v16 = vadd.f32 %v3666_v25, %v997_v58  ;;  %v1387_v19 = vpop.f32.mrf.mxu0  ;;  %v1257_v53 = vadd.f32 %v3778_v15, %v3800_v55  ;;  %v1259_v52 = vadd.f32 %v3787_v3, %v3810_v63 }
 0x191   : > { %v3827_v23 = vpop.f32.mrf.mxu1  ;;  %v1388_v6 = vadd.f32 %v1387_v19, %v1227_v4  ;;  %v1263_v15 = vadd.f32 %v3803_v45, %v3800_v55  ;;  %v1265_v3 = vadd.f32 %v3813_v61, %v3810_v63 }
 0x192   : > { %2084 = vmatmul.mubr.f32.gmra.mxu0 %v3056_v26  ;;  %2108 = vmatmul.mubr.f32.vlgmr.msra.gmra.mxu1 %v4507_v57  ;;  %2374 = vst [vmem:[%s3485_s28 + $0x3c0] sm:$0xff] %v2246_v42  ;;  %v2247_v60 = vmax.f32 %v1158_v16, 0.0  ;;  %v1389_v25 = vpop.f32.mrf.mxu0  ;;  %v1233_v57 = vadd.f32 %v3699_v40, %v3800_v55  ;;  %v1269_v45 = vadd.f32 %v3827_v23, %v3800_v55 }
 0x193   : > { %2551 = vmatprep.mubr.msk.f32.mxu0 %vm789_vm0, %v3074_v41  ;;  %2555 = vmatprep.mubr.msk.f32.mxu1 %vm789_vm0, %v4490_v48  ;;  %v3838_v28 = vpop.f32.mrf.mxu1  ;;  %v2128_v26 = vmax.f32 %v1388_v6, 0.0  ;;  %v1390_v7 = vadd.f32 %v1389_v25, %v1229_v0 }
 0x194   : > { %2375 = vst [vmem:[%s3485_s28 + $0x3c8] sm:$0xff] %v2247_v60  ;;  %v1271_v61 = vadd.f32 %v3838_v28, %v3810_v63 }
 0x195   : > { %2256 = vst [vmem:[%s3485_s28 + $0x10] sm:$0xff] %v2128_v26  ;;  %v2129_v41 = vmax.f32 %v1390_v7, 0.0  ;;  %v1393_v8 = vpop.f32.mrf.mxu0 }
 0x196   : > { %2090 = vmatmul.mubr.f32.gmra.mxu0 %v3080_v54  ;;  %2114 = vmatmul.mubr.f32.gmra.mxu1 %v4552_v59  ;;  %v3846_v48 = vpop.f32.mrf.mxu1  ;;  %v1394_v40 = vadd.f32 %v1393_v8, %v1233_v57 }
 0x197   : > { %2552 = vmatprep.mubr.msk.f32.mxu0 %vm789_vm0, %v4553_v2  ;;  %2556 = vmatprep.mubr.msk.f32.mxu1 %vm789_vm0, %v4554_v62  ;;  %2257 = vst [vmem:[%s3485_s28 + $0x18] sm:$0xff] %v2129_v41  ;;  %v1395_v50 = vpop.f32.mrf.mxu0  ;;  %v1275_v23 = vadd.f32 %v3846_v48, %v3800_v55 }
 0x198   : > { %v3855_v54 = vpop.f32.mrf.mxu1  ;;  %v2136_v44 = vmax.f32 %v1394_v40, 0.0  ;;  %v1396_v11 = vadd.f32 %v1395_v50, %v1235_v21 }
 0x199   : > { %v1277_v28 = vadd.f32 %v3855_v54, %v3810_v63 }
 0x19a   : > { %2096 = vmatmul.mubr.f32.gmra.mxu0 %v4555_v18  ;;  %2120 = vmatmul.mubr.f32.gmra.mxu1 %v4556_v35  ;;  %2264 = vst [vmem:[%s3485_s28 + $0x50] sm:$0xff] %v2136_v44  ;;  %v2137_v12 = vmax.f32 %v1396_v11, 0.0  ;;  %v1399_v20 = vpop.f32.mrf.mxu0 }
 0x19b   : > { %2553 = vmatprep.mubr.msk.f32.mxu0 %vm789_vm0, %v4557_v10  ;;  %v3864_v56 = vpop.f32.mrf.mxu1  ;;  %v1400_v17 = vadd.f32 %v1399_v20, %v1239_v49 }
 0x19c   : > { %2265 = vst [vmem:[%s3485_s28 + $0x58] sm:$0xff] %v2137_v12  ;;  %v1401_v31 = vpop.f32.mrf.mxu0  ;;  %v1281_v48 = vadd.f32 %v3864_v56, %v3800_v55 }
 0x19d   : > { %v3869_v5 = vpop.f32.mrf.mxu1  ;;  %v2144_v30 = vmax.f32 %v1400_v17, 0.0  ;;  %v1402_v9 = vadd.f32 %v1401_v31, %v1241_v13 }
 0x19e   : > { %2102 = vmatmul.mubr.f32.gmra.mxu0 %v4558_v34  ;;  %v1283_v54 = vadd.f32 %v3869_v5, %v3810_v63 }
 0x19f   : > { %2272 = vst [vmem:[%s3485_s28 + $0x90] sm:$0xff] %v2144_v30  ;;  %v2145_v22 = vmax.f32 %v1402_v9, 0.0 }
 0x1a0   : > { %v3875_v37 = vpop.f32.mrf.mxu1  ;;  %v1405_v36 = vpop.f32.mrf.mxu0 }
 0x1a1   : > { %2273 = vst [vmem:[%s3485_s28 + $0x98] sm:$0xff] %v2145_v22  ;;  %v1406_v43 = vadd.f32 %v1405_v36, %v1245_v14  ;;  %v1287_v56 = vadd.f32 %v3875_v37, %v3800_v55 }
 0x1a2   : > { %v3880_v51 = vpop.f32.mrf.mxu1  ;;  %v1407_v47 = vpop.f32.mrf.mxu0 }
 0x1a3   : > { %v2152_v29 = vmax.f32 %v1406_v43, 0.0  ;;  %v1408_v38 = vadd.f32 %v1407_v47, %v1247_v39  ;;  %v1289_v5 = vadd.f32 %v3880_v51, %v3810_v63 }
 0x1a5   : > { %v3884_v33 = vpop.f32.mrf.mxu1  ;;  %2280 = vst [vmem:[%s3485_s28 + $0xd0] sm:$0xff] %v2152_v29  ;;  %v2153_v24 = vmax.f32 %v1408_v38, 0.0  ;;  %v1411_v27 = vpop.f32.mrf.mxu0 }
 0x1a6   : > { %v1412_v58 = vadd.f32 %v1411_v27, %v1251_v1  ;;  %v1293_v37 = vadd.f32 %v3884_v33, %v3800_v55 }
 0x1a7   : > { %v3889_v4 = vpop.f32.mrf.mxu1  ;;  %2281 = vst [vmem:[%s3485_s28 + $0xd8] sm:$0xff] %v2153_v24  ;;  %v1413_v42 = vpop.f32.mrf.mxu0 }
 0x1a8   : > { %v2160_v16 = vmax.f32 %v1412_v58, 0.0  ;;  %v1414_v19 = vadd.f32 %v1413_v42, %v1253_v32 }
 0x1aa   : > { %2288 = vst [vmem:[%s3485_s28 + $0x110] sm:$0xff] %v2160_v16  ;;  %v2161_v0 = vmax.f32 %v1414_v19, 0.0  ;;  %v3895_v6 = vpop.f32.mrf.mxu1 }
 0x1ab   : > { %v1417_v60 = vpop.f32.mrf.mxu0  ;;  %v1299_v33 = vadd.f32 %v3895_v6, %v3800_v55 }
 0x1ac   : > { %v1418_v25 = vadd.f32 %v1417_v60, %v1257_v53  ;;  %2289 = vst [vmem:[%s3485_s28 + $0x118] sm:$0xff] %v2161_v0  ;;  %v3900_v26 = vpop.f32.mrf.mxu1 }
 0x1ad   : > { %v1419_v7 = vpop.f32.mrf.mxu0 }
 0x1ae   : > { %v2168_v57 = vmax.f32 %v1418_v25, 0.0  ;;  %v1420_v59 = vadd.f32 %v1419_v7, %v1259_v52  ;;  %v1295_v7 = vadd.f32 %v3889_v4, %v3810_v63  ;;  %v1301_v4 = vadd.f32 %v3900_v26, %v3810_v63 }
 0x1af   : > { %v3905_v8 = vpop.f32.mrf.mxu1 }
 0x1b0   : > { %2296 = vst [vmem:[%s3485_s28 + $0x150] sm:$0xff] %v2168_v57  ;;  %v2169_v41 = vmax.f32 %v1420_v59, 0.0  ;;  %v1423_v21 = vpop.f32.mrf.mxu0  ;;  %v1305_v6 = vadd.f32 %v3905_v8, %v3800_v55 }
 0x1b1   : > { %v1424_v2 = vadd.f32 %v1423_v21, %v1263_v15  ;;  %v3910_v62 = vpop.f32.mrf.mxu1 }
 0x1b2   : > { %2297 = vst [vmem:[%s3485_s28 + $0x158] sm:$0xff] %v2169_v41  ;;  %v1425_v40 = vpop.f32.mrf.mxu0  ;;  %v1307_v26 = vadd.f32 %v3910_v62, %v3810_v63  ;;  %v767_v62 = vsub.s32 4, %v4548_v46 }
 0x1b3   : > { %v2176_v50 = vmax.f32 %v1424_v2, 0.0  ;;  %v1426_v44 = vadd.f32 %v1425_v40, %v1265_v3 }
 0x1b4   : > { %v1429_v18 = vpop.f32.mrf.mxu0 }
 0x1b5   : > { %2304 = vst [vmem:[%s3485_s28 + $0x190] sm:$0xff] %v2176_v50  ;;  %v2177_v11 = vmax.f32 %v1426_v44, 0.0  ;;  %v3915_v49 = vpop.f32.mrf.mxu1  ;;  %v1430_v35 = vadd.f32 %v1429_v18, %v1269_v45 }
 0x1b6   : > { %v1431_v12 = vpop.f32.mrf.mxu0 }
 0x1b7   : > { %2305 = vst [vmem:[%s3485_s28 + $0x198] sm:$0xff] %v2177_v11  ;;  %v3920_v10 = vpop.f32.mrf.mxu1  ;;  %v2184_v20 = vmax.f32 %v1430_v35, 0.0  ;;  %v1432_v13 = vadd.f32 %v1431_v12, %v1271_v61 }
 0x1b9   : > { %2312 = vst [vmem:[%s3485_s28 + $0x1d0] sm:$0xff] %v2184_v20  ;;  %v2185_v17 = vmax.f32 %v1432_v13, 0.0  ;;  %v1435_v34 = vpop.f32.mrf.mxu0 }
 0x1ba   : > { %v3925_v31 = vpop.f32.mrf.mxu1  ;;  %v1436_v30 = vadd.f32 %v1435_v34, %v1275_v23 }
 0x1bb   : > { %2313 = vst [vmem:[%s3485_s28 + $0x1d8] sm:$0xff] %v2185_v17  ;;  %v1437_v14 = vpop.f32.mrf.mxu0 }
 0x1bc   : > { %v3930_v9 = vpop.f32.mrf.mxu1  ;;  %v2192_v22 = vmax.f32 %v1436_v30, 0.0  ;;  %v1438_v36 = vadd.f32 %v1437_v14, %v1277_v28  ;;  %v1311_v28 = vadd.f32 %v3915_v49, %v3800_v55 }
 0x1be   : > { %2320 = vst [vmem:[%s3485_s28 + $0x210] sm:$0xff] %v2192_v22  ;;  %v2193_v39 = vmax.f32 %v1438_v36, 0.0  ;;  %v1441_v43 = vpop.f32.mrf.mxu0  ;;  %v1313_v22 = vadd.f32 %v3920_v10, %v3810_v63 }
 0x1bf   : > { %v3935_v47 = vpop.f32.mrf.mxu1  ;;  %v1442_v29 = vadd.f32 %v1441_v43, %v1281_v48  ;;  %v771_v43 = vsub.s32 5, %v4548_v46 }
 0x1c0   : > { %2321 = vst [vmem:[%s3485_s28 + $0x218] sm:$0xff] %v2193_v39  ;;  %v1443_v38 = vpop.f32.mrf.mxu0 }
 0x1c1   : > { %v3940_v1 = vpop.f32.mrf.mxu1  ;;  %v2200_v24 = vmax.f32 %v1442_v29, 0.0  ;;  %v1444_v27 = vadd.f32 %v1443_v38, %v1283_v54  ;;  %v1317_v29 = vadd.f32 %v3925_v31, %v3800_v55  ;;  %v3996_v38 = vld [vmem:[#allocation5] sm:$0xff] }
 0x1c2   : > { %v3999_v10 = vrot.slane %v3996_v38, %v767_v62 }
 0x1c3   : > { %2328 = vst [vmem:[%s3485_s28 + $0x250] sm:$0xff] %v2200_v24  ;;  %v2201_v32 = vmax.f32 %v1444_v27, 0.0  ;;  %v1447_v58 = vpop.f32.mrf.mxu0 }
 0x1c4   : > { %v3945_v42 = vpop.f32.mrf.mxu1  ;;  %v1448_v16 = vadd.f32 %v1447_v58, %v1287_v56 }
 0x1c5   : > { %2329 = vst [vmem:[%s3485_s28 + $0x258] sm:$0xff] %v2201_v32  ;;  %v1449_v19 = vpop.f32.mrf.mxu0  ;;  %v1319_v32 = vadd.f32 %v3930_v9, %v3810_v63 }
 0x1c6   : > { %v3950_v53 = vpop.f32.mrf.mxu1  ;;  %v2208_v0 = vmax.f32 %v1448_v16, 0.0  ;;  %v1450_v60 = vadd.f32 %v1449_v19, %v1289_v5  ;;  %v4007_v5 = vrot.slane %v3996_v38, %v771_v43 }
 0x1c8   : > { %2336 = vst [vmem:[%s3485_s28 + $0x290] sm:$0xff] %v2208_v0  ;;  %v2209_v52 = vmax.f32 %v1450_v60, 0.0  ;;  %v1549_v0 = vadd.f32 %v3935_v47, %v3999_v10  ;;  %v1551_v9 = vadd.f32 %v3940_v1, %v4007_v5  ;;  %v1555_v47 = vadd.f32 %v3945_v42, %v3999_v10 }
 0x1c9   : > { %v1453_v25 = vpop.f32.mrf.mxu0  ;;  %v3957_v51 = vpop.f32.mrf.mxu1  ;;  %v1557_v1 = vadd.f32 %v3950_v53, %v4007_v5 }
 0x1ca   : > { %v1454_v57 = vadd.f32 %v1453_v25, %v1293_v37  ;;  %2337 = vst [vmem:[%s3485_s28 + $0x298] sm:$0xff] %v2209_v52  ;;  %v1561_v42 = vadd.f32 %v3957_v51, %v3999_v10 }
 0x1cb   : > { %v1455_v59 = vpop.f32.mrf.mxu0  ;;  %v3960_v21 = vpop.f32.mrf.mxu1 }
 0x1cc   : > { %v2216_v15 = vmax.f32 %v1454_v57, 0.0  ;;  %v1456_v41 = vadd.f32 %v1455_v59, %v1295_v7  ;;  %v1563_v53 = vadd.f32 %v3960_v21, %v4007_v5 }
 0x1ce   : > { %2344 = vst [vmem:[%s3485_s28 + $0x2d0] sm:$0xff] %v2216_v15  ;;  %v2217_v3 = vmax.f32 %v1456_v41, 0.0  ;;  %v1459_v2 = vpop.f32.mrf.mxu0  ;;  %v3967_v50 = vpop.f32.mrf.mxu1 }
 0x1cf   : > { %v1460_v40 = vadd.f32 %v1459_v2, %v1299_v33  ;;  %v1567_v51 = vadd.f32 %v3967_v50, %v3999_v10 }
 0x1d0   : > { %2345 = vst [vmem:[%s3485_s28 + $0x2d8] sm:$0xff] %v2217_v3  ;;  %v1461_v44 = vpop.f32.mrf.mxu0  ;;  %v3970_v18 = vpop.f32.mrf.mxu1 }
 0x1d1   : > { %v2224_v45 = vmax.f32 %v1460_v40, 0.0  ;;  %v1462_v11 = vadd.f32 %v1461_v44, %v1301_v4  ;;  %v1569_v21 = vadd.f32 %v3970_v18, %v4007_v5 }
 0x1d3   : > { %2352 = vst [vmem:[%s3485_s28 + $0x310] sm:$0xff] %v2224_v45  ;;  %v2225_v61 = vmax.f32 %v1462_v11, 0.0  ;;  %v1465_v35 = vpop.f32.mrf.mxu0 }
 0x1d4   : > { %v3975_v12 = vpop.f32.mrf.mxu1  ;;  %v1466_v20 = vadd.f32 %v1465_v35, %v1305_v6 }
 0x1d5   : > { %2353 = vst [vmem:[%s3485_s28 + $0x318] sm:$0xff] %v2225_v61  ;;  %v1467_v13 = vpop.f32.mrf.mxu0  ;;  %v1573_v50 = vadd.f32 %v3975_v12, %v3999_v10 }
 0x1d6   : > { %v3980_v23 = vpop.f32.mrf.mxu1  ;;  %v2232_v17 = vmax.f32 %v1466_v20, 0.0  ;;  %v1468_v34 = vadd.f32 %v1467_v13, %v1307_v26 }
 0x1d7   : > { %v1575_v18 = vadd.f32 %v3980_v23, %v4007_v5 }
 0x1d8   : > { %2360 = vst [vmem:[%s3485_s28 + $0x350] sm:$0xff] %v2232_v17  ;;  %v2233_v8 = vmax.f32 %v1468_v34, 0.0  ;;  %v1471_v30 = vpop.f32.mrf.mxu0 }
 0x1d9   : > { %v3985_v14 = vpop.f32.mrf.mxu1  ;;  %v1472_v36 = vadd.f32 %v1471_v30, %v1311_v28 }
 0x1da   : > { %2361 = vst [vmem:[%s3485_s28 + $0x358] sm:$0xff] %v2233_v8  ;;  %v1473_v48 = vpop.f32.mrf.mxu0  ;;  %v1579_v12 = vadd.f32 %v3985_v14, %v3999_v10 }
 0x1db   : > { %v3991_v39 = vpop.f32.mrf.mxu1  ;;  %v2240_v49 = vmax.f32 %v1472_v36, 0.0  ;;  %v1474_v54 = vadd.f32 %v1473_v48, %v1313_v22 }
 0x1dc   : > { %v1581_v23 = vadd.f32 %v3991_v39, %v4007_v5 }
 0x1dd   : > { %2368 = vst [vmem:[%s3485_s28 + $0x390] sm:$0xff] %v2240_v49  ;;  %v2241_v24 = vmax.f32 %v1474_v54, 0.0  ;;  %v1477_v27 = vpop.f32.mrf.mxu0 }
 0x1de   : > { %v4002_v56 = vpop.f32.mrf.mxu1  ;;  %v1478_v58 = vadd.f32 %v1477_v27, %v1317_v29 }
 0x1df   : > { %2369 = vst [vmem:[%s3485_s28 + $0x398] sm:$0xff] %v2241_v24  ;;  %v1479_v55 = vpop.f32.mrf.mxu0  ;;  %v1585_v14 = vadd.f32 %v4002_v56, %v3999_v10 }
 0x1e0   : > { %v4010_v31 = vpop.f32.mrf.mxu1  ;;  %v2248_v16 = vmax.f32 %v1478_v58, 0.0  ;;  %v1480_v19 = vadd.f32 %v1479_v55, %v1319_v32 }
 0x1e1   : > { %v1587_v39 = vadd.f32 %v4010_v31, %v4007_v5 }
 0x1e2   : > { %2376 = vst [vmem:[%s3485_s28 + $0x3d0] sm:$0xff] %v2248_v16  ;;  %v2249_v60 = vmax.f32 %v1480_v19, 0.0  ;;  %v1709_v63 = vpop.f32.mrf.mxu0 }
 0x1e3   : > { %v4015_v37 = vpop.f32.mrf.mxu1  ;;  %v1710_v52 = vadd.f32 %v1709_v63, %v1549_v0 }
 0x1e4   : > { %2377 = vst [vmem:[%s3485_s28 + $0x3d8] sm:$0xff] %v2249_v60  ;;  %v1711_v7 = vpop.f32.mrf.mxu0  ;;  %v1591_v56 = vadd.f32 %v4015_v37, %v3999_v10 }
 0x1e5   : > { %v4020_v25 = vpop.f32.mrf.mxu1  ;;  %v2130_v57 = vmax.f32 %v1710_v52, 0.0  ;;  %v1712_v59 = vadd.f32 %v1711_v7, %v1551_v9 }
 0x1e6   : > { %v1593_v31 = vadd.f32 %v4020_v25, %v4007_v5 }
 0x1e7   : > { %2258 = vst [vmem:[%s3485_s28 + $0x20] sm:$0xff] %v2130_v57  ;;  %v2131_v15 = vmax.f32 %v1712_v59, 0.0  ;;  %v1715_v33 = vpop.f32.mrf.mxu0 }
 0x1e8   : > { %v4025_v41 = vpop.f32.mrf.mxu1  ;;  %v1716_v3 = vadd.f32 %v1715_v33, %v1555_v47 }
 0x1e9   : > { %2259 = vst [vmem:[%s3485_s28 + $0x28] sm:$0xff] %v2131_v15  ;;  %v1717_v4 = vpop.f32.mrf.mxu0  ;;  %v1597_v37 = vadd.f32 %v4025_v41, %v3999_v10 }
 0x1ea   : > { %v4030_v2 = vpop.f32.mrf.mxu1  ;;  %v2138_v40 = vmax.f32 %v1716_v3, 0.0  ;;  %v1718_v44 = vadd.f32 %v1717_v4, %v1557_v1 }
 0x1eb   : > { %v1599_v25 = vadd.f32 %v4030_v2, %v4007_v5 }
 0x1ec   : > { %2266 = vst [vmem:[%s3485_s28 + $0x60] sm:$0xff] %v2138_v40  ;;  %v2139_v45 = vmax.f32 %v1718_v44, 0.0  ;;  %v1721_v6 = vpop.f32.mrf.mxu0 }
 0x1ed   : > { %v4035_v11 = vpop.f32.mrf.mxu1  ;;  %v1722_v61 = vadd.f32 %v1721_v6, %v1561_v42 }
 0x1ee   : > { %2267 = vst [vmem:[%s3485_s28 + $0x68] sm:$0xff] %v2139_v45  ;;  %v1723_v26 = vpop.f32.mrf.mxu0 }
 0x1ef   : > { %v4040_v35 = vpop.f32.mrf.mxu1  ;;  %v2146_v20 = vmax.f32 %v1722_v61, 0.0  ;;  %v1724_v13 = vadd.f32 %v1723_v26, %v1563_v53 }
 0x1f1   : > { %2274 = vst [vmem:[%s3485_s28 + $0xa0] sm:$0xff] %v2146_v20  ;;  %v2147_v17 = vmax.f32 %v1724_v13, 0.0 }
 0x1f2   : > { %v4045_v34 = vpop.f32.mrf.mxu1  ;;  %v1727_v28 = vpop.f32.mrf.mxu0 }
 0x1f3   : > { %2275 = vst [vmem:[%s3485_s28 + $0xa8] sm:$0xff] %v2147_v17  ;;  %v1728_v8 = vadd.f32 %v1727_v28, %v1567_v51 }
 0x1f4   : > { %v4050_v30 = vpop.f32.mrf.mxu1  ;;  %v1729_v22 = vpop.f32.mrf.mxu0 }
 0x1f5   : > { %v2154_v62 = vmax.f32 %v1728_v8, 0.0  ;;  %v1730_v36 = vadd.f32 %v1729_v22, %v1569_v21  ;;  %v1603_v8 = vadd.f32 %v4035_v11, %v3999_v10 }
 0x1f7   : > { %v4054_v48 = vpop.f32.mrf.mxu1  ;;  %2282 = vst [vmem:[%s3485_s28 + $0xe0] sm:$0xff] %v2154_v62  ;;  %v2155_v43 = vmax.f32 %v1730_v36, 0.0  ;;  %v1733_v49 = vpop.f32.mrf.mxu0  ;;  %v1605_v36 = vadd.f32 %v4040_v35, %v4007_v5 }
 0x1f8   : > { %v1734_v54 = vadd.f32 %v1733_v49, %v1573_v50  ;;  %v1609_v49 = vadd.f32 %v4045_v34, %v3999_v10 }
 0x1f9   : > { %v4059_v29 = vpop.f32.mrf.mxu1  ;;  %2283 = vst [vmem:[%s3485_s28 + $0xe8] sm:$0xff] %v2155_v43  ;;  %v1735_v24 = vpop.f32.mrf.mxu0 }
 0x1fa   : > { %v2162_v27 = vmax.f32 %v1734_v54, 0.0  ;;  %v1736_v32 = vadd.f32 %v1735_v24, %v1575_v18 }
 0x1fc   : > { %2290 = vst [vmem:[%s3485_s28 + $0x120] sm:$0xff] %v2162_v27  ;;  %v2163_v58 = vmax.f32 %v1736_v32, 0.0  ;;  %v4065_v55 = vpop.f32.mrf.mxu1  ;;  %v1611_v27 = vadd.f32 %v4050_v30, %v4007_v5  ;;  %v1617_v30 = vadd.f32 %v4059_v29, %v4007_v5 }
 0x1fd   : > { %v1739_v16 = vpop.f32.mrf.mxu0 }
 0x1fe   : > { %v1740_v19 = vadd.f32 %v1739_v16, %v1579_v12  ;;  %2291 = vst [vmem:[%s3485_s28 + $0x128] sm:$0xff] %v2163_v58  ;;  %v4070_v0 = vpop.f32.mrf.mxu1  ;;  %v1615_v16 = vadd.f32 %v4054_v48, %v3999_v10  ;;  %v1621_v48 = vadd.f32 %v4065_v55, %v3999_v10 }
 0x1ff   : > { %v1741_v60 = vpop.f32.mrf.mxu0  ;;  %v1623_v29 = vadd.f32 %v4070_v0, %v4007_v5 }
 0x200   : > { %v2170_v63 = vmax.f32 %v1740_v19, 0.0  ;;  %v1742_v9 = vadd.f32 %v1741_v60, %v1581_v23 }
 0x201   : > { %v4075_v7 = vpop.f32.mrf.mxu1 }
 0x202   : > { %2298 = vst [vmem:[%s3485_s28 + $0x160] sm:$0xff] %v2170_v63  ;;  %v2171_v52 = vmax.f32 %v1742_v9, 0.0  ;;  %v1745_v57 = vpop.f32.mrf.mxu0 }
 0x203   : > { %v1746_v59 = vadd.f32 %v1745_v57, %v1585_v14  ;;  %v4080_v47 = vpop.f32.mrf.mxu1 }
 0x204   : > { %2299 = vst [vmem:[%s3485_s28 + $0x168] sm:$0xff] %v2171_v52  ;;  %v1747_v15 = vpop.f32.mrf.mxu0  ;;  %v1629_v0 = vadd.f32 %v4080_v47, %v4007_v5  ;;  %v779_v47 = vsub.s32 7, %v4548_v46 }
 0x205   : > { %v2178_v33 = vmax.f32 %v1746_v59, 0.0  ;;  %v1748_v1 = vadd.f32 %v1747_v15, %v1587_v39 }
 0x206   : > { %v1751_v40 = vpop.f32.mrf.mxu0 }
 0x207   : > { %2306 = vst [vmem:[%s3485_s28 + $0x1a0] sm:$0xff] %v2178_v33  ;;  %v2179_v3 = vmax.f32 %v1748_v1, 0.0  ;;  %v4085_v4 = vpop.f32.mrf.mxu1  ;;  %v1752_v44 = vadd.f32 %v1751_v40, %v1591_v56 }
 0x208   : > { %v1753_v45 = vpop.f32.mrf.mxu0 }
 0x209   : > { %2307 = vst [vmem:[%s3485_s28 + $0x1a8] sm:$0xff] %v2179_v3  ;;  %v4090_v42 = vpop.f32.mrf.mxu1  ;;  %v2186_v6 = vmax.f32 %v1752_v44, 0.0  ;;  %v1754_v53 = vadd.f32 %v1753_v45, %v1593_v31  ;;  %v1627_v31 = vadd.f32 %v4075_v7, %v3999_v10  ;;  %v775_v7 = vsub.s32 6, %v4548_v46 }
 0x20b   : > { %2314 = vst [vmem:[%s3485_s28 + $0x1e0] sm:$0xff] %v2186_v6  ;;  %v2187_v61 = vmax.f32 %v1754_v53, 0.0  ;;  %v1757_v20 = vpop.f32.mrf.mxu0 }
 0x20c   : > { %v4095_v26 = vpop.f32.mrf.mxu1  ;;  %v1758_v13 = vadd.f32 %v1757_v20, %v1597_v37  ;;  %v1633_v20 = vadd.f32 %v4085_v4, %v3999_v10 }
 0x20d   : > { %2315 = vst [vmem:[%s3485_s28 + $0x1e8] sm:$0xff] %v2187_v61  ;;  %v1759_v17 = vpop.f32.mrf.mxu0  ;;  %v1639_v4 = vadd.f32 %v4095_v26, %v3999_v10 }
 0x20e   : > { %v4100_v51 = vpop.f32.mrf.mxu1  ;;  %v2194_v28 = vmax.f32 %v1758_v13, 0.0  ;;  %v1760_v21 = vadd.f32 %v1759_v17, %v1599_v25 }
 0x20f   : > { %v1641_v46 = vadd.f32 %v4100_v51, %v4007_v5 }
 0x210   : > { %2322 = vst [vmem:[%s3485_s28 + $0x220] sm:$0xff] %v2194_v28  ;;  %v2195_v41 = vmax.f32 %v1760_v21, 0.0  ;;  %v1763_v22 = vpop.f32.mrf.mxu0  ;;  %v1635_v21 = vadd.f32 %v4090_v42, %v4007_v5 }
 0x211   : > { %v4105_v62 = vpop.f32.mrf.mxu1  ;;  %v1764_v2 = vadd.f32 %v1763_v22, %v1603_v8 }
 0x212   : > { %2323 = vst [vmem:[%s3485_s28 + $0x228] sm:$0xff] %v2195_v41  ;;  %v1765_v50 = vpop.f32.mrf.mxu0 }
 0x213   : > { %v4110_v43 = vpop.f32.mrf.mxu1  ;;  %v2202_v18 = vmax.f32 %v1764_v2, 0.0  ;;  %v1766_v11 = vadd.f32 %v1765_v50, %v1605_v36  ;;  %v4166_v2 = vrot.slane %v3996_v38, %v775_v7 }
 0x214   : > { %v1769_v54 = vpop.f32.mrf.mxu0 }
 0x215   : > { %v4114_v24 = vpop.f32.mrf.mxu1  ;;  %2330 = vst [vmem:[%s3485_s28 + $0x260] sm:$0xff] %v2202_v18  ;;  %v2203_v35 = vmax.f32 %v1766_v11, 0.0  ;;  %v1770_v32 = vadd.f32 %v1769_v54, %v1609_v49  ;;  %v4174_v11 = vrot.slane %v3996_v38, %v779_v47 }
 0x216   : > { %v1771_v12 = vpop.f32.mrf.mxu0 }
 0x217   : > { %v4119_v58 = vpop.f32.mrf.mxu1  ;;  %2331 = vst [vmem:[%s3485_s28 + $0x268] sm:$0xff] %v2203_v35  ;;  %v2210_v34 = vmax.f32 %v1770_v32, 0.0  ;;  %v1772_v23 = vadd.f32 %v1771_v12, %v1611_v27  ;;  %v1871_v35 = vadd.f32 %v4105_v62, %v4166_v2  ;;  %v1873_v38 = vadd.f32 %v4110_v43, %v4174_v11 }
 0x218   : > { %v1775_v19 = vpop.f32.mrf.mxu0  ;;  %v1877_v62 = vadd.f32 %v4114_v24, %v4166_v2  ;;  %v1879_v43 = vadd.f32 %v4119_v58, %v4174_v11 }
 0x219   : > { %v4124_v60 = vpop.f32.mrf.mxu1  ;;  %2338 = vst [vmem:[%s3485_s28 + $0x2a0] sm:$0xff] %v2210_v34  ;;  %v2211_v63 = vmax.f32 %v1772_v23, 0.0  ;;  %v1776_v9 = vadd.f32 %v1775_v19, %v1615_v16 }
 0x21a   : > { %v1777_v14 = vpop.f32.mrf.mxu0  ;;  %v1883_v24 = vadd.f32 %v4124_v60, %v4166_v2 }
 0x21b   : > { %v4129_v52 = vpop.f32.mrf.mxu1  ;;  %2339 = vst [vmem:[%s3485_s28 + $0x2a8] sm:$0xff] %v2211_v63  ;;  %v2218_v57 = vmax.f32 %v1776_v9, 0.0  ;;  %v1778_v39 = vadd.f32 %v1777_v14, %v1617_v30 }
 0x21c   : > { %v1781_v59 = vpop.f32.mrf.mxu0  ;;  %v1885_v58 = vadd.f32 %v4129_v52, %v4174_v11 }
 0x21d   : > { %v4134_v15 = vpop.f32.mrf.mxu1  ;;  %2346 = vst [vmem:[%s3485_s28 + $0x2e0] sm:$0xff] %v2218_v57  ;;  %v2219_v33 = vmax.f32 %v1778_v39, 0.0  ;;  %v1782_v1 = vadd.f32 %v1781_v59, %v1621_v48 }
 0x21e   : > { %v1783_v56 = vpop.f32.mrf.mxu0  ;;  %v1889_v60 = vadd.f32 %v4134_v15, %v4166_v2 }
 0x21f   : > { %v4139_v3 = vpop.f32.mrf.mxu1  ;;  %2347 = vst [vmem:[%s3485_s28 + $0x2e8] sm:$0xff] %v2219_v33  ;;  %v2226_v40 = vmax.f32 %v1782_v1, 0.0  ;;  %v1784_v55 = vadd.f32 %v1783_v56, %v1623_v29 }
 0x220   : > { %v1891_v52 = vadd.f32 %v4139_v3, %v4174_v11 }
 0x221   : > { %v4144_v44 = vpop.f32.mrf.mxu1  ;;  %2354 = vst [vmem:[%s3485_s28 + $0x320] sm:$0xff] %v2226_v40  ;;  %v2227_v45 = vmax.f32 %v1784_v55, 0.0  ;;  %v1787_v6 = vpop.f32.mrf.mxu0 }
 0x222   : > { %v1788_v53 = vadd.f32 %v1787_v6, %v1627_v31  ;;  %v1895_v15 = vadd.f32 %v4144_v44, %v4166_v2 }
 0x223   : > { %v4149_v37 = vpop.f32.mrf.mxu1  ;;  %2355 = vst [vmem:[%s3485_s28 + $0x328] sm:$0xff] %v2227_v45  ;;  %v1789_v61 = vpop.f32.mrf.mxu0 }
 0x224   : > { %v2234_v25 = vmax.f32 %v1788_v53, 0.0  ;;  %v1790_v13 = vadd.f32 %v1789_v61, %v1629_v0  ;;  %v1897_v3 = vadd.f32 %v4149_v37, %v4174_v11 }
 0x225   : > { %v4155_v17 = vpop.f32.mrf.mxu1  ;;  %v1793_v28 = vpop.f32.mrf.mxu0 }
 0x226   : > { %2362 = vst [vmem:[%s3485_s28 + $0x360] sm:$0xff] %v2234_v25  ;;  %v2235_v8 = vmax.f32 %v1790_v13, 0.0  ;;  %v1794_v41 = vadd.f32 %v1793_v28, %v1633_v20  ;;  %v1901_v44 = vadd.f32 %v4155_v17, %v4166_v2 }
 0x227   : > { %v4161_v22 = vpop.f32.mrf.mxu1  ;;  %v1795_v36 = vpop.f32.mrf.mxu0 }
 0x228   : > { %2363 = vst [vmem:[%s3485_s28 + $0x368] sm:$0xff] %v2235_v8  ;;  %v2242_v50 = vmax.f32 %v1794_v41, 0.0  ;;  %v1796_v49 = vadd.f32 %v1795_v36, %v1635_v21  ;;  %v1903_v37 = vadd.f32 %v4161_v22, %v4174_v11 }
 0x229   : > { %v1799_v42 = vpop.f32.mrf.mxu0 }
 0x22a   : > { %v4169_v18 = vpop.f32.mrf.mxu1  ;;  %2370 = vst [vmem:[%s3485_s28 + $0x3a0] sm:$0xff] %v2242_v50  ;;  %v2243_v54 = vmax.f32 %v1796_v49, 0.0  ;;  %v1800_v27 = vadd.f32 %v1799_v42, %v1639_v4 }
 0x22b   : > { %v1801_v10 = vpop.f32.mrf.mxu0  ;;  %v1907_v17 = vadd.f32 %v4169_v18, %v4166_v2 }
 0x22c   : > { %v4177_v26 = vpop.f32.mrf.mxu1  ;;  %2371 = vst [vmem:[%s3485_s28 + $0x3a8] sm:$0xff] %v2243_v54  ;;  %v2250_v32 = vmax.f32 %v1800_v27, 0.0  ;;  %v1802_v12 = vadd.f32 %v1801_v10, %v1641_v46 }
 0x22e   : > { %v4182_v16 = vpop.f32.mrf.mxu1  ;;  %v2031_v5 = vpop.f32.mrf.mxu0  ;;  %2378 = vst [vmem:[%s3485_s28 + $0x3e0] sm:$0xff] %v2250_v32  ;;  %v2251_v51 = vmax.f32 %v1802_v12, 0.0 }
 0x22f   : > { %v2032_v34 = vadd.f32 %v2031_v5, %v1871_v35 }
 0x230   : > { %v4187_v23 = vpop.f32.mrf.mxu1  ;;  %v2033_v19 = vpop.f32.mrf.mxu0  ;;  %2379 = vst [vmem:[%s3485_s28 + $0x3e8] sm:$0xff] %v2251_v51 }
 0x231   : > { %v2132_v30 = vmax.f32 %v2032_v34, 0.0  ;;  %v2034_v63 = vadd.f32 %v2033_v19, %v1873_v38  ;;  %v1909_v34 = vadd.f32 %v4177_v26, %v4174_v11 }
 0x232   : > { %v4192_v9 = vpop.f32.mrf.mxu1  ;;  %v2037_v14 = vpop.f32.mrf.mxu0 }
 0x233   : > { %2260 = vst [vmem:[%s3485_s28 + $0x30] sm:$0xff] %v2132_v30  ;;  %v2133_v48 = vmax.f32 %v2034_v63, 0.0  ;;  %v2038_v57 = vadd.f32 %v2037_v14, %v1877_v62  ;;  %v1913_v63 = vadd.f32 %v4182_v16, %v4166_v2 }
 0x234   : > { %v4197_v39 = vpop.f32.mrf.mxu1  ;;  %v2039_v59 = vpop.f32.mrf.mxu0 }
 0x235   : > { %2261 = vst [vmem:[%s3485_s28 + $0x38] sm:$0xff] %v2133_v48  ;;  %v2140_v29 = vmax.f32 %v2038_v57, 0.0  ;;  %v2040_v33 = vadd.f32 %v2039_v59, %v1879_v43  ;;  %v1915_v57 = vadd.f32 %v4187_v23, %v4174_v11 }
 0x236   : > { %v4202_v1 = vpop.f32.mrf.mxu1  ;;  %v2043_v56 = vpop.f32.mrf.mxu0 }
 0x237   : > { %2268 = vst [vmem:[%s3485_s28 + $0x70] sm:$0xff] %v2140_v29  ;;  %v2141_v40 = vmax.f32 %v2040_v33, 0.0  ;;  %v2044_v55 = vadd.f32 %v2043_v56, %v1883_v24  ;;  %v1919_v33 = vadd.f32 %v4192_v9, %v4166_v2 }
 0x238   : > { %v4207_v31 = vpop.f32.mrf.mxu1  ;;  %v2045_v45 = vpop.f32.mrf.mxu0 }
 0x239   : > { %2269 = vst [vmem:[%s3485_s28 + $0x78] sm:$0xff] %v2141_v40  ;;  %v2148_v6 = vmax.f32 %v2044_v55, 0.0  ;;  %v2046_v0 = vadd.f32 %v2045_v45, %v1885_v58  ;;  %v1921_v55 = vadd.f32 %v4197_v39, %v4174_v11 }
 0x23a   : > { %v4212_v53 = vpop.f32.mrf.mxu1  ;;  %v2049_v61 = vpop.f32.mrf.mxu0 }
 0x23b   : > { %2276 = vst [vmem:[%s3485_s28 + $0xb0] sm:$0xff] %v2148_v6  ;;  %v2149_v20 = vmax.f32 %v2046_v0, 0.0  ;;  %v2050_v7 = vadd.f32 %v2049_v61, %v1889_v60  ;;  %v1925_v0 = vadd.f32 %v4202_v1, %v4166_v2  ;;  %v1931_v1 = vadd.f32 %v4212_v53, %v4166_v2 }
 0x23c   : > { %v4217_v25 = vpop.f32.mrf.mxu1  ;;  %v2051_v13 = vpop.f32.mrf.mxu0 }
 0x23d   : > { %2277 = vst [vmem:[%s3485_s28 + $0xb8] sm:$0xff] %v2149_v20  ;;  %v2156_v28 = vmax.f32 %v2050_v7, 0.0  ;;  %v2052_v21 = vadd.f32 %v2051_v13, %v1891_v52  ;;  %v1927_v20 = vadd.f32 %v4207_v31, %v4174_v11 }
 0x23e   : > { %v4222_v47 = vpop.f32.mrf.mxu1  ;;  %v2055_v8 = vpop.f32.mrf.mxu0 }
 0x23f   : > { %2284 = vst [vmem:[%s3485_s28 + $0xf0] sm:$0xff] %v2156_v28  ;;  %v2157_v41 = vmax.f32 %v2052_v21, 0.0  ;;  %v2056_v36 = vadd.f32 %v2055_v8, %v1895_v15 }
 0x240   : > { %v4227_v4 = vpop.f32.mrf.mxu1  ;;  %v2057_v50 = vpop.f32.mrf.mxu0 }
 0x241   : > { %2285 = vst [vmem:[%s3485_s28 + $0xf8] sm:$0xff] %v2157_v41  ;;  %v2164_v49 = vmax.f32 %v2056_v36, 0.0  ;;  %v2058_v42 = vadd.f32 %v2057_v50, %v1897_v3 }
 0x242   : > { %v4232_v46 = vpop.f32.mrf.mxu1  ;;  %v2061_v54 = vpop.f32.mrf.mxu0 }
 0x243   : > { %2292 = vst [vmem:[%s3485_s28 + $0x130] sm:$0xff] %v2164_v49  ;;  %v2165_v27 = vmax.f32 %v2058_v42, 0.0  ;;  %v2062_v10 = vadd.f32 %v2061_v54, %v1901_v44  ;;  %v1933_v49 = vadd.f32 %v4217_v25, %v4174_v11 }
 0x244   : > { %v4237_v35 = vpop.f32.mrf.mxu1  ;;  %v2063_v32 = vpop.f32.mrf.mxu0 }
 0x245   : > { %2293 = vst [vmem:[%s3485_s28 + $0x138] sm:$0xff] %v2165_v27  ;;  %v2172_v12 = vmax.f32 %v2062_v10, 0.0  ;;  %v2064_v5 = vadd.f32 %v2063_v32, %v1903_v37 }
 0x246   : > { %v1948_v38 = vpop.f32.mrf.mxu1  ;;  %v2067_v51 = vpop.f32.mrf.mxu0 }
 0x247   : > { %2300 = vst [vmem:[%s3485_s28 + $0x170] sm:$0xff] %v2172_v12  ;;  %v2173_v22 = vmax.f32 %v2064_v5, 0.0  ;;  %v2068_v19 = vadd.f32 %v2067_v51, %v1907_v17  ;;  %v1949_v61 = vadd.f32 %v1948_v38, %v4166_v2  ;;  %v1937_v17 = vadd.f32 %v4222_v47, %v4166_v2 }
 0x248   : > { %v1950_v62 = vpop.f32.mrf.mxu1  ;;  %v2069_v30 = vpop.f32.mrf.mxu0 }
 0x249   : > { %2301 = vst [vmem:[%s3485_s28 + $0x178] sm:$0xff] %v2173_v22  ;;  %v2180_v18 = vmax.f32 %v2068_v19, 0.0  ;;  %v2070_v14 = vadd.f32 %v2069_v30, %v1909_v34  ;;  %v1951_v39 = vadd.f32 %v1950_v62, %v4174_v11  ;;  %v1939_v19 = vadd.f32 %v4227_v4, %v4174_v11 }
 0x24a   : > { %v1954_v43 = vpop.f32.mrf.mxu1  ;;  %v2073_v48 = vpop.f32.mrf.mxu0 }
 0x24b   : > { %2308 = vst [vmem:[%s3485_s28 + $0x1b0] sm:$0xff] %v2180_v18  ;;  %v2181_v26 = vmax.f32 %v2070_v14, 0.0  ;;  %v2074_v59 = vadd.f32 %v2073_v48, %v1913_v63  ;;  %v1955_v8 = vadd.f32 %v1954_v43, %v4166_v2  ;;  %v1943_v48 = vadd.f32 %v4232_v46, %v4166_v2 }
 0x24c   : > { %v1956_v24 = vpop.f32.mrf.mxu1  ;;  %v2075_v29 = vpop.f32.mrf.mxu0 }
 0x24d   : > { %2309 = vst [vmem:[%s3485_s28 + $0x1b8] sm:$0xff] %v2181_v26  ;;  %v2188_v16 = vmax.f32 %v2074_v59, 0.0  ;;  %v2076_v56 = vadd.f32 %v2075_v29, %v1915_v57  ;;  %v1957_v42 = vadd.f32 %v1956_v24, %v4174_v11 }
 0x24e   : > { %v1960_v58 = vpop.f32.mrf.mxu1  ;;  %v2079_v40 = vpop.f32.mrf.mxu0 }
 0x24f   : > { %2316 = vst [vmem:[%s3485_s28 + $0x1f0] sm:$0xff] %v2188_v16  ;;  %v2189_v23 = vmax.f32 %v2076_v56, 0.0  ;;  %v2080_v45 = vadd.f32 %v2079_v40, %v1919_v33  ;;  %v1961_v12 = vadd.f32 %v1960_v58, %v4166_v2  ;;  %v1945_v16 = vadd.f32 %v4237_v35, %v4174_v11 }
 0x250   : > { %v1962_v60 = vpop.f32.mrf.mxu1  ;;  %v2081_v6 = vpop.f32.mrf.mxu0 }
 0x251   : > { %2317 = vst [vmem:[%s3485_s28 + $0x1f8] sm:$0xff] %v2189_v23  ;;  %v2196_v9 = vmax.f32 %v2080_v45, 0.0  ;;  %v2082_v52 = vadd.f32 %v2081_v6, %v1921_v55  ;;  %v1963_v62 = vadd.f32 %v1962_v60, %v4174_v11 }
 0x252   : > { %v2085_v7 = vpop.f32.mrf.mxu0  ;;  %v2109_v13 = vpop.f32.mrf.mxu1 }
 0x253   : > { %2324 = vst [vmem:[%s3485_s28 + $0x230] sm:$0xff] %v2196_v9  ;;  %v2197_v15 = vmax.f32 %v2082_v52, 0.0  ;;  %v2086_v28 = vadd.f32 %v2085_v7, %v1925_v0  ;;  %v2110_v21 = vadd.f32 %v2109_v13, %v1949_v61 }
 0x254   : > { %v2087_v3 = vpop.f32.mrf.mxu0  ;;  %v2111_v41 = vpop.f32.mrf.mxu1 }
 0x255   : > { %2325 = vst [vmem:[%s3485_s28 + $0x238] sm:$0xff] %v2197_v15  ;;  %v2204_v36 = vmax.f32 %v2086_v28, 0.0  ;;  %v2236_v31 = vmax.f32 %v2110_v21, 0.0  ;;  %v2088_v50 = vadd.f32 %v2087_v3, %v1927_v20  ;;  %v2112_v44 = vadd.f32 %v2111_v41, %v1951_v39 }
 0x256   : > { %v2091_v54 = vpop.f32.mrf.mxu0  ;;  %v2115_v37 = vpop.f32.mrf.mxu1 }
 0x257   : > { %2332 = vst [vmem:[%s3485_s28 + $0x270] sm:$0xff] %v2204_v36  ;;  %2364 = vst [vmem:[%s3485_s28 + $0x370] sm:$0xff] %v2236_v31  ;;  %v2205_v53 = vmax.f32 %v2088_v50, 0.0  ;;  %v2237_v27 = vmax.f32 %v2112_v44, 0.0  ;;  %v2092_v10 = vadd.f32 %v2091_v54, %v1931_v1  ;;  %v2116_v32 = vadd.f32 %v2115_v37, %v1955_v8 }
 0x258   : > { %v2093_v5 = vpop.f32.mrf.mxu0  ;;  %v2117_v38 = vpop.f32.mrf.mxu1 }
 0x259   : > { %2333 = vst [vmem:[%s3485_s28 + $0x278] sm:$0xff] %v2205_v53  ;;  %2365 = vst [vmem:[%s3485_s28 + $0x378] sm:$0xff] %v2237_v27  ;;  %v2212_v25 = vmax.f32 %v2092_v10, 0.0  ;;  %v2244_v51 = vmax.f32 %v2116_v32, 0.0  ;;  %v2094_v34 = vadd.f32 %v2093_v5, %v1933_v49  ;;  %v2118_v22 = vadd.f32 %v2117_v38, %v1957_v42 }
 0x25a   : > { %v2097_v30 = vpop.f32.mrf.mxu0  ;;  %v2121_v63 = vpop.f32.mrf.mxu1 }
 0x25b   : > { %2340 = vst [vmem:[%s3485_s28 + $0x2b0] sm:$0xff] %v2212_v25  ;;  %2372 = vst [vmem:[%s3485_s28 + $0x3b0] sm:$0xff] %v2244_v51  ;;  %v2213_v47 = vmax.f32 %v2094_v34, 0.0  ;;  %v2245_v18 = vmax.f32 %v2118_v22, 0.0  ;;  %v2098_v14 = vadd.f32 %v2097_v30, %v1937_v17  ;;  %v2122_v43 = vadd.f32 %v2121_v63, %v1961_v12 }
 0x25c   : > { %v2099_v57 = vpop.f32.mrf.mxu0  ;;  %v2123_v26 = vpop.f32.mrf.mxu1 }
 0x25d   : > { %2341 = vst [vmem:[%s3485_s28 + $0x2b8] sm:$0xff] %v2213_v47  ;;  %2373 = vst [vmem:[%s3485_s28 + $0x3b8] sm:$0xff] %v2245_v18  ;;  %v2220_v4 = vmax.f32 %v2098_v14, 0.0  ;;  %v2252_v59 = vmax.f32 %v2122_v43, 0.0  ;;  %v2100_v24 = vadd.f32 %v2099_v57, %v1939_v19  ;;  %v2124_v29 = vadd.f32 %v2123_v26, %v1963_v62 }
 0x25e   : > { %v2103_v33 = vpop.f32.mrf.mxu0 }
 0x25f   : > { %2348 = vst [vmem:[%s3485_s28 + $0x2f0] sm:$0xff] %v2220_v4  ;;  %2380 = vst [vmem:[%s3485_s28 + $0x3f0] sm:$0xff] %v2252_v59  ;;  %v2221_v2 = vmax.f32 %v2100_v24, 0.0  ;;  %v2253_v46 = vmax.f32 %v2124_v29, 0.0  ;;  %v2104_v56 = vadd.f32 %v2103_v33, %v1943_v48 }
 0x260   : > { %v2105_v58 = vpop.f32.mrf.mxu0 }
 0x261   : > { %2349 = vst [vmem:[%s3485_s28 + $0x2f8] sm:$0xff] %v2221_v2  ;;  %2381 = vst [vmem:[%s3485_s28 + $0x3f8] sm:$0xff] %v2253_v46  ;;  %v2228_v40 = vmax.f32 %v2104_v56, 0.0  ;;  %v2106_v55 = vadd.f32 %v2105_v58, %v1945_v16 }
 0x263   : > { %2356 = vst [vmem:[%s3485_s28 + $0x330] sm:$0xff] %v2228_v40  ;;  %v2229_v11 = vmax.f32 %v2106_v55, 0.0 }
 0x265   : > { %2357 = vst [vmem:[%s3485_s28 + $0x338] sm:$0xff] %v2229_v11 }
 0x266   : > { %2732 = shalt.err (!%p2729_p3)
}
 0x267   : > { %s2733_s11 = scalar_lea.hbm %s4299_s6, 16384  ;;  %s2737_s20 = scalar_lea.hbm %s4350_s3, 32768 }
 0x268   : > { %p2734_p2 = scmp.ne.s32.totalorder %s4299_s6, %s2733_s11  ;;  %p2738_p7 = scmp.lt.s32.totalorder %s4299_s6, %s4350_s3 }
 0x269   : > { %p2739_p6 = scmp.lt.s32.totalorder %s2737_s20, %s2733_s11 }
 0x26a   : > { %p2735_p4 = pnand %p2734_p2, %p2854_p5 }
 0x26b   : > { %p2740_p9 = por %p2739_p6, %p2738_p7 }
 0x26c   : > { %p2736_p13 = pneg %p2735_p4 }
 0x26e   : > { %p2741_p10 = pnand %p2740_p9, %p2736_p13 }
 0x270   : > { %2744 = shalt.err (!%p2741_p10)
}
 0x271   : > { %s2794_s26 = smov 1024   ;;  %s2795_s27 = smov 64  }
 0x272   : > { %2610 = dma.vmem_to_hbm [thread:$0]  (%p2854_p5), %s4301_s30, 16384, %s4299_s6, %s4307_s16, %s2794_s26, %s2794_s26, %s2795_s27  }
 0x273 PF: > { %p2627_p12 = scmp.ge.s32.totalorder %s2787_s15, 2  ;;  %s2412_s28 = sand.u32 1, %s2775_s12  }
 0x274   : > { %p4559_p8 = scmp.ne.s32.totalorder %s4423_s23, 0  ;;  %s2413_s29 = scalar_lea.sflag [#allocation4], %s2412_s28 }
 0x276   : > { %p2620_p11 = pnand %p2627_p12, %p4559_p8 }
 0x278   : > { %p2621_p0 = pneg %p2620_p11 }
 0x27a   : > { %2770 = dma.done.wait (%p2621_p0), %s2413_s29, 16384  }
 0x27b   : > { %2772 = vsyncadd (%p2621_p0), %s2413_s29, 4294950912  ;;  %p15_p1 = scmp.ge.s32.totalorder %s2841_s18, 4   ;;  %s4560_s12 = smov %s2779_s13 }
 0x27c   : > { %s4561_s13 = smov %s2783_s14  ;;  %s4562_s14 = smov %s2852_s21 }
 0x27d   : > { %s4563_s15 = smov %s2841_s18  ;;  %17 = sbr.rel (!%p15_p1) target bundleno = 5 (0x5), region = 76 }
 0x282   :  { %2418 = vsyncpa [#allocation3], 1 }
 0x283   :  { %2420 = vsyncpa [#allocation3 + $0x1], 1 }
 0x284   :  { %2421 = vsyncpa [#allocation6], 1 }
 0x285   :  { %2422 = vsyncpa [#allocation4], 1 }
 0x286   :  { %2424 = vsyncpa [#allocation4 + $0x1], 1 }

</bundles_post_ra>
